<compile_context>
chip_gen: v6e
topology: v6e:2x2x1
jax: 0.10.0
libtpu: 0.0.40
codegen_flags: <defaults>
</compile_context>

<pallas_src>
import functools

import numpy as np

import jax
import jax.numpy as jnp
from jax import lax
from jax.experimental import pallas as pl
from jax.experimental.pallas import tpu as pltpu


_VMEM_LIMIT = 32 * 1024 * 1024


def _round_up(n, m):
    return ((n + m - 1) // m) * m


def make_grid_nodes(res, gp=None):
    """Grid node integer indices, (Gp, 3) and (3, Gp), padded rows -> -1e4
    (B-spline weight exactly 0, so padded nodes never contribute)."""
    g = res ** 3
    if gp is None:
        gp = _round_up(g, 128)
    ii = np.arange(res, dtype=np.float32)
    gx, gy, gz = np.meshgrid(ii, ii, ii, indexing="ij")
    gidx = np.stack([gx.ravel(), gy.ravel(), gz.ravel()], axis=1)  # (G, 3)
    if gp > g:
        gidx = np.concatenate(
            [gidx, np.full((gp - g, 3), -1.0e4, np.float32)], axis=0)
    return jnp.asarray(gidx), jnp.asarray(np.ascontiguousarray(gidx.T))


def _bspline_weights(gidx_nd, xT, inv_dx):
    """Dense quadratic B-spline weights, shape (Gp, TILE_N).

    gidx_nd: (Gp, 3) node indices (float); xT: (3, TILE_N) positions.
    Branch-reduced form: w = where(a<0.5, 0.75-a^2, 0.5*max(1.5-a,0)^2).
    """
    w = None
    for d in range(3):
        a = jnp.abs(gidx_nd[:, d:d + 1] - xT[d:d + 1, :] * inv_dx)  # (Gp, TN)
        t = jnp.maximum(1.5 - a, 0.0)
        wd = jnp.where(a < 0.5, 0.75 - a * a, 0.5 * t * t)
        w = wd if w is None else w * wd
    return w


# --------------------------------------------------------------------------
# Phase 1: P2G (fused matmul) + grid update, reduction over particle blocks.
# --------------------------------------------------------------------------
def _p2g_kernel(xT_ref, vT_ref, CT_ref, ST_ref, volT_ref, massT_ref,
                gidx_nd_ref, gidxT_ref, gfeat_ref, acc_ref,
                *, dt, dx, res, bound, gravity):
    inv_dx = 1.0 / dx
    pb = pl.program_id(0)

    @pl.when(pb == 0)
    def _():
        acc_ref[...] = jnp.zeros_like(acc_ref)

    xT = xT_ref[...]        # (3, TN)
    vT = vT_ref[...]        # (3, TN)
    CT = CT_ref[...]        # (9, TN)
    ST = ST_ref[...]        # (9, TN)
    vol = volT_ref[...]     # (1, TN)
    mass = massT_ref[...]   # (1, TN)
    tn = xT.shape[1]

    w = _bspline_weights(gidx_nd_ref[...], xT, inv_dx)       # (Gp, TN)

    # Affine term A = -dt*vol*4*inv_dx^2 * stress + mass * C   (9, TN)
    A = (-dt * 4.0 * inv_dx * inv_dx) * vol * ST + mass * CT
    # src_i = mass*v_i - sum_j A[3i+j]*x_j     (full-width VPU FMAs)
    src_rows = []
    for i in range(3):
        ax_i = (A[3 * i + 0:3 * i + 1, :] * xT[0:1, :]
                + A[3 * i + 1:3 * i + 2, :] * xT[1:2, :]
                + A[3 * i + 2:3 * i + 3, :] * xT[2:3, :])
        src_rows.append(mass * vT[i:i + 1, :] - ax_i)

    # Fused P2G payload: rows [src(3), A(9), mass(1), pad(3)] -> (16, TN)
    p16 = jnp.concatenate(
        src_rows + [A, mass, jnp.zeros((3, tn), jnp.float32)], axis=0)

    # One MXU matmul per particle block: (16, TN) x (Gp, TN)^T -> (16, Gp)
    acc_ref[...] += lax.dot_general(
        p16, w, (((1,), (1,)), ((), ())),
        preferred_element_type=jnp.float32)

    # Grid update on the last particle block -> gfeat = [gv(3), gv*xg(9)].
    @pl.when(pb == pl.num_programs(0) - 1)
    def _():
        acc = acc_ref[...]                          # (16, Gp)
        gid = gidxT_ref[...]                        # (3, Gp) node indices
        xg = [gid[d:d + 1, :] * dx for d in range(3)]
        m = acc[12:13, :]                           # (1, Gp)
        nonempty = m > 0.0
        inv_m = jnp.where(
            nonempty,
            pl.reciprocal(jnp.where(nonempty, m, 1.0), approx=True),
            0.0)
        gv_rows = []
        for d in range(3):
            mom_d = (acc[d:d + 1, :]
                     + acc[3 + 3 * d + 0:3 + 3 * d + 1, :] * xg[0]
                     + acc[3 + 3 * d + 1:3 + 3 * d + 2, :] * xg[1]
                     + acc[3 + 3 * d + 2:3 + 3 * d + 3, :] * xg[2])
            v_d = jnp.where(nonempty, mom_d * inv_m + dt * gravity[d], 0.0)
            low = gid[d:d + 1, :] < (bound - 0.5)
            high = gid[d:d + 1, :] > (res - bound + 0.5)
            v_d = jnp.where(low & (v_d < 0.0), 0.0, v_d)
            v_d = jnp.where(high & (v_d > 0.0), 0.0, v_d)
            gv_rows.append(v_d)
        gvx_rows = [gv_rows[i] * xg[j] for i in range(3) for j in range(3)]
        gfeat_ref[...] = jnp.concatenate(gv_rows + gvx_rows, axis=0)  # (12,Gp)


# --------------------------------------------------------------------------
# Phase 2: G2P (fused matmul) + advection + F update, parallel over blocks.
# --------------------------------------------------------------------------
def _g2p_kernel(xT_ref, FT_ref, gidx_nd_ref, gfeat_ref,
                xn_ref, vn_ref, Cn_ref, Fn_ref, *, dt, dx):
    inv_dx = 1.0 / dx
    xT = xT_ref[...]                                  # (3, TN)
    FT = FT_ref[...]                                  # (9, TN)

    w = _bspline_weights(gidx_nd_ref[...], xT, inv_dx)        # (Gp, TN)
    # One MXU matmul: (12, Gp) @ (Gp, TN) -> (12, TN) = [v_next(3), B(9)]
    p12 = jnp.dot(gfeat_ref[...], w, preferred_element_type=jnp.float32)

    c4 = 4.0 * inv_dx * inv_dx
    xrow = [xT[d:d + 1, :] for d in range(3)]
    vrow = [p12[d:d + 1, :] for d in range(3)]
    Brow = [p12[3 + e:4 + e, :] for e in range(9)]
    Frow = [FT[e:e + 1, :] for e in range(9)]

    Cn_rows = [c4 * (Brow[3 * i + j] - vrow[i] * xrow[j])
               for i in range(3) for j in range(3)]

    v_next = p12[0:3, :]
    xn_ref[...] = xT + dt * v_next
    vn_ref[...] = v_next
    Cn_ref[...] = jnp.concatenate(Cn_rows, axis=0)

    # F_next[3i+j] = F[3i+j] + dt * sum_k C_next[3i+k] * F[3k+j]
    Fn_rows = []
    for i in range(3):
        for j in range(3):
            row = Frow[3 * i + j]
            for k in range(3):
                row = row + dt * Cn_rows[3 * i + k] * Frow[3 * k + j]
            Fn_rows.append(row)
    Fn_ref[...] = jnp.concatenate(Fn_rows, axis=0)


def mpm_step_pallas(x, v, C, F, stress, vol, mass, *, dt, dx, res, bound,
                    gravity, grid_nodes=None, tile_n=128):
    assert tile_n % 128 == 0
    N = x.shape[0]
    f32 = jnp.float32
    Np = _round_up(max(N, tile_n), tile_n)
    npb = Np // tile_n

    def pt(a, feat, pad_value=0.0):
        a = a.reshape(N, feat).astype(f32).T          # (feat, N) lane-dense
        if Np > N:
            a = jnp.pad(a, ((0, 0), (0, Np - N)), constant_values=pad_value)
        return a

    # Padded particles get mass = vol = 0 (no P2G contribution) and are
    # parked mid-domain; their G2P outputs are sliced away below.
    xT = pt(x, 3, pad_value=0.5)
    vT = pt(v, 3)
    CT = pt(C, 9)
    FT = pt(F, 9)
    ST = pt(stress, 9)
    volT = pt(vol, 1)
    massT = pt(mass, 1)

    G = res ** 3
    Gp = _round_up(G, 128)
    if grid_nodes is None:
        grid_nodes = make_grid_nodes(res, Gp)
    gidx_nd, gidxT = grid_nodes

    part_spec3 = pl.BlockSpec((3, tile_n), lambda i: (0, i))
    part_spec9 = pl.BlockSpec((9, tile_n), lambda i: (0, i))
    part_spec1 = pl.BlockSpec((1, tile_n), lambda i: (0, i))
    gidx_nd_spec = pl.BlockSpec((Gp, 3), lambda i: (0, 0))
    gidxT_spec = pl.BlockSpec((3, Gp), lambda i: (0, 0))

    # ---- phase 1: P2G + grid update -------------------------------------
    gfeat = pl.pallas_call(
        functools.partial(_p2g_kernel, dt=dt, dx=dx, res=res, bound=bound,
                          gravity=gravity),
        grid=(npb,),
        in_specs=[part_spec3, part_spec3, part_spec9, part_spec9,
                  part_spec1, part_spec1, gidx_nd_spec, gidxT_spec],
        out_specs=pl.BlockSpec((12, Gp), lambda i: (0, 0)),
        out_shape=jax.ShapeDtypeStruct((12, Gp), f32),
        scratch_shapes=[pltpu.VMEM((16, Gp), f32)],
        compiler_params=pltpu.CompilerParams(
            dimension_semantics=("arbitrary",),
            vmem_limit_bytes=_VMEM_LIMIT),
    )(xT, vT, CT, ST, volT, massT, gidx_nd, gidxT)

    # ---- phase 2: G2P + advection + F update -----------------------------
    xnT, vnT, CnT, FnT = pl.pallas_call(
        functools.partial(_g2p_kernel, dt=dt, dx=dx),
        grid=(npb,),
        in_specs=[part_spec3, part_spec9, gidx_nd_spec,
                  pl.BlockSpec((12, Gp), lambda i: (0, 0))],
        out_specs=(part_spec3, part_spec3, part_spec9, part_spec9),
        out_shape=(
            jax.ShapeDtypeStruct((3, Np), f32),
            jax.ShapeDtypeStruct((3, Np), f32),
            jax.ShapeDtypeStruct((9, Np), f32),
            jax.ShapeDtypeStruct((9, Np), f32),
        ),
        compiler_params=pltpu.CompilerParams(
            dimension_semantics=("parallel",),
            vmem_limit_bytes=_VMEM_LIMIT),
    )(xT, FT, gidx_nd, gfeat)

    xn = xnT[:, :N].T
    vn = vnT[:, :N].T
    Cn = CnT[:, :N].T.reshape(N, 3, 3)
    Fn = FnT[:, :N].T.reshape(N, 3, 3)
    return xn, vn, Cn, Fn


# --------------------------------------------------------------------------
# Pure-JAX reference (same math, exact division) for a sanity check.
# --------------------------------------------------------------------------
def mpm_step_reference(x, v, C, F, stress, vol, mass, *, dt, dx, res, bound,
                       gravity):
    inv_dx = 1.0 / dx
    ii = jnp.arange(res, dtype=jnp.float32)
    gx, gy, gz = jnp.meshgrid(ii, ii, ii, indexing="ij")
    gidx = jnp.stack([gx.ravel(), gy.ravel(), gz.ravel()], axis=1)   # (G, 3)
    xg = gidx * dx
    a = jnp.abs(x[:, None, :] * inv_dx - gidx[None, :, :])           # (N,G,3)
    t = jnp.maximum(1.5 - a, 0.0)
    wd = jnp.where(a < 0.5, 0.75 - a * a, 0.5 * t * t)
    W = wd.prod(-1)                                                  # (N, G)

    A = (-dt * 4.0 * inv_dx ** 2) * vol[:, :, None] * stress \
        + mass[:, :, None] * C                                       # (N,3,3)
    src = mass * v - jnp.einsum("nij,nj->ni", A, x)                  # (N, 3)
    grid_mom = jnp.einsum("ng,ni->gi", W, src) \
        + jnp.einsum("ng,nij,gj->gi", W, A, xg)                      # (G, 3)
    grid_m = W.T @ mass                                              # (G, 1)

    nonempty = grid_m > 0.0
    gv = jnp.where(nonempty, grid_mom / jnp.where(nonempty, grid_m, 1.0), 0.0)
    gv = jnp.where(nonempty, gv + dt * jnp.asarray(gravity, jnp.float32), 0.0)
    low = gidx < (bound - 0.5)
    high = gidx > (res - bound + 0.5)
    gv = jnp.where(low & (gv < 0.0), 0.0, gv)
    gv = jnp.where(high & (gv > 0.0), 0.0, gv)

    v_next = W @ gv                                                  # (N, 3)
    B = jnp.einsum("ng,gi,gj->nij", W, gv, xg)
    C_next = 4.0 * inv_dx ** 2 * (B - v_next[:, :, None] * x[:, None, :])
    x_next = x + dt * v_next
    F_next = jnp.einsum("nik,nkj->nij",
                        jnp.eye(3, dtype=jnp.float32) + dt * C_next, F)
    return x_next, v_next, C_next, F_next


class MPMStatics:
    """Per-particle static quantities (volume, mass)."""

    def __init__(self, vol, mass):
        self.vol = vol    # (N, 1)
        self.mass = mass  # (N, 1)


class MPMCacheDiffSimPallas:
    """JAX/Pallas analogue of MPMCacheDiffSim (forward pass only)."""

    # TODO(synk): the custom autograd backward (warp Tape replay + in-place
    # nan_to_num_ on the gradients) has no clean Pallas equivalent here;
    # forward semantics only.

    def __init__(self, num_steps, *, dt=2e-4, res=8, bound=2,
                 gravity=(0.0, -9.8, 0.0), tile_n=128):
        self.num_steps = num_steps
        self.dt = float(dt)
        self.res = int(res)
        self.dx = 1.0 / self.res
        self.bound = int(bound)
        self.gravity = tuple(float(g) for g in gravity)
        self.tile_n = tile_n
        # Grid node index tables are simulation constants; build them once.
        self._grid_nodes = make_grid_nodes(self.res)
        # cached per-step states (no effect on forward values; mirrors the
        # torch module's state caching which only matters for backward).
        self.curr_states = [None for _ in range(num_steps)]
        self.next_states = [None for _ in range(num_steps)]

    def forward(self, statics, step, x, v, C, F, stress):
        self.curr_states[step] = (x, v, C, F, stress)
        out = mpm_step_pallas(
            x, v, C, F, stress, statics.vol, statics.mass,
            dt=self.dt, dx=self.dx, res=self.res, bound=self.bound,
            gravity=self.gravity, grid_nodes=self._grid_nodes,
            tile_n=self.tile_n)
        self.next_states[step] = out
        return out


def _check_close(name, got, want):
    scale = float(jnp.max(jnp.abs(want))) + 1e-3
    err = float(jnp.max(jnp.abs(got - want)))
    assert err <= 5e-2 * scale, f"{name}: max err {err} vs scale {scale}"


if __name__ == "__main__":
    N = 64
    res = 8
    dx = 1.0 / res

    key = jax.random.PRNGKey(0)
    kx, kv, kc, kf, ks = jax.random.split(key, 5)

    # particles well inside the domain [0, 1]^3
    x = jax.random.uniform(kx, (N, 3), jnp.float32, minval=0.3, maxval=0.7)
    v = 0.1 * jax.random.normal(kv, (N, 3), jnp.float32)
    C = 0.1 * jax.random.normal(kc, (N, 3, 3), jnp.float32)
    F = jnp.eye(3, dtype=jnp.float32)[None] + \
        0.01 * jax.random.normal(kf, (N, 3, 3), jnp.float32)
    stress = 0.1 * jax.random.normal(ks, (N, 3, 3), jnp.float32)

    vol = jnp.full((N, 1), (dx * 0.5) ** 3, dtype=jnp.float32)
    mass = vol * 1.0  # rho = 1.0
    statics = MPMStatics(vol=vol, mass=mass)

    sim = MPMCacheDiffSimPallas(num_steps=4, dt=2e-4, res=res, bound=2,
                                gravity=(0.0, -9.8, 0.0))

    x_next, v_next, C_next, F_next = sim.forward(statics, 0, x, v, C, F, stress)
    jax.block_until_ready((x_next, v_next, C_next, F_next))

    assert x_next.shape == (N, 3) and v_next.shape == (N, 3)
    assert C_next.shape == (N, 3, 3) and F_next.shape == (N, 3, 3)
    assert bool(jnp.all(jnp.isfinite(x_next)) & jnp.all(jnp.isfinite(v_next))
                & jnp.all(jnp.isfinite(C_next)) & jnp.all(jnp.isfinite(F_next)))

    ref = mpm_step_reference(x, v, C, F, stress, vol, mass, dt=2e-4, dx=dx,
                             res=res, bound=2, gravity=(0.0, -9.8, 0.0))
    for name, got, want in zip(("x_next", "v_next", "C_next", "F_next"),
                               (x_next, v_next, C_next, F_next), ref):
        _check_close(name, got, want)

    print("KERNEL_OK")
</pallas_src>

<mosaic_0001>
module attributes {stable_mosaic.version = 11 : i64} {
  func.func @_p2g_kernel(%arg0: i32, %arg1: memref<3x128xf32, #tpu.memory_space<vmem>>, %arg2: memref<3x128xf32, #tpu.memory_space<vmem>>, %arg3: memref<9x128xf32, #tpu.memory_space<vmem>>, %arg4: memref<9x128xf32, #tpu.memory_space<vmem>>, %arg5: memref<1x128xf32, #tpu.memory_space<vmem>>, %arg6: memref<1x128xf32, #tpu.memory_space<vmem>>, %arg7: memref<512x3xf32, #tpu.memory_space<vmem>>, %arg8: memref<3x512xf32, #tpu.memory_space<vmem>>, %arg9: memref<12x512xf32, #tpu.memory_space<vmem>>, %arg10: memref<16x512xf32, #tpu.memory_space<vmem>>) attributes {dimension_semantics = [#tpu.dimension_semantics<arbitrary>], iteration_bounds = array<i64: 1>, scalar_prefetch = 0 : i64, scratch_operands = 1 : i64, tpu.core_type = #tpu.core_type<tc>, window_params = [{transform_indices = @transform_0, window_bounds = array<i64: 3, 128>}, {transform_indices = @transform_1, window_bounds = array<i64: 3, 128>}, {transform_indices = @transform_2, window_bounds = array<i64: 9, 128>}, {transform_indices = @transform_3, window_bounds = array<i64: 9, 128>}, {transform_indices = @transform_4, window_bounds = array<i64: 1, 128>}, {transform_indices = @transform_5, window_bounds = array<i64: 1, 128>}, {pipeline_mode = #tpu.pipeline_mode<synchronous>, transform_indices = @transform_6, window_bounds = array<i64: 512, 3>}, {pipeline_mode = #tpu.pipeline_mode<synchronous>, transform_indices = @transform_7, window_bounds = array<i64: 3, 512>}, {pipeline_mode = #tpu.pipeline_mode<synchronous>, transform_indices = @transform_8, window_bounds = array<i64: 12, 512>}]} {
    %c0_i32 = arith.constant 0 : i32
    %0 = arith.cmpi eq, %arg0, %c0_i32 : i32
    %1 = arith.extui %0 : i1 to i32
    %c0_i32_0 = arith.constant 0 : i32
    %2 = arith.cmpi ne, %1, %c0_i32_0 : i32
    scf.if %2 {
      %cst_40 = arith.constant 0.000000e+00 : f32
      %133 = vector.broadcast %cst_40 : f32 to vector<16x512xf32>
      %c0_41 = arith.constant 0 : index
      %c0_42 = arith.constant 0 : index
      %134 = vector.load %arg10[%c0_41, %c0_42] : memref<16x512xf32, #tpu.memory_space<vmem>>, vector<16x512xf32>
      tpu.vector_store %arg10[%c0_41, %c0_42], %133 {strides = array<i32>} : memref<16x512xf32, #tpu.memory_space<vmem>>, vector<16x512xf32>,
    } else {
    }
    %c0 = arith.constant 0 : index
    %c0_1 = arith.constant 0 : index
    %3 = vector.load %arg1[%c0, %c0_1] : memref<3x128xf32, #tpu.memory_space<vmem>>, vector<3x128xf32>
    %c0_2 = arith.constant 0 : index
    %c0_3 = arith.constant 0 : index
    %4 = vector.load %arg2[%c0_2, %c0_3] : memref<3x128xf32, #tpu.memory_space<vmem>>, vector<3x128xf32>
    %c0_4 = arith.constant 0 : index
    %c0_5 = arith.constant 0 : index
    %5 = vector.load %arg3[%c0_4, %c0_5] : memref<9x128xf32, #tpu.memory_space<vmem>>, vector<9x128xf32>
    %c0_6 = arith.constant 0 : index
    %c0_7 = arith.constant 0 : index
    %6 = vector.load %arg4[%c0_6, %c0_7] : memref<9x128xf32, #tpu.memory_space<vmem>>, vector<9x128xf32>
    %c0_8 = arith.constant 0 : index
    %c0_9 = arith.constant 0 : index
    %7 = vector.load %arg5[%c0_8, %c0_9] : memref<1x128xf32, #tpu.memory_space<vmem>>, vector<1x128xf32>
    %c0_10 = arith.constant 0 : index
    %c0_11 = arith.constant 0 : index
    %8 = vector.load %arg6[%c0_10, %c0_11] : memref<1x128xf32, #tpu.memory_space<vmem>>, vector<1x128xf32>
    %c0_12 = arith.constant 0 : index
    %c0_13 = arith.constant 0 : index
    %9 = vector.load %arg7[%c0_12, %c0_13] : memref<512x3xf32, #tpu.memory_space<vmem>>, vector<512x3xf32>
    %10 = vector.extract_strided_slice %9 {offsets = [0, 0], sizes = [512, 1], strides = [1, 1]} : vector<512x3xf32> to vector<512x1xf32>
    %11 = vector.extract_strided_slice %3 {offsets = [0, 0], sizes = [1, 128], strides = [1, 1]} : vector<3x128xf32> to vector<1x128xf32>
    %cst = arith.constant 8.000000e+00 : f32
    %12 = vector.broadcast %cst : f32 to vector<1x128xf32>
    %13 = arith.mulf %11, %12 : vector<1x128xf32>
    %14 = vector.broadcast %10 : vector<512x1xf32> to vector<512x128xf32>
    %15 = vector.broadcast %13 : vector<1x128xf32> to vector<512x128xf32>
    %16 = arith.subf %14, %15 : vector<512x128xf32>
    %17 = math.absf %16 : vector<512x128xf32>
    %cst_14 = arith.constant 1.500000e+00 : f32
    %18 = vector.broadcast %cst_14 : f32 to vector<512x128xf32>
    %19 = arith.subf %18, %17 : vector<512x128xf32>
    %cst_15 = arith.constant 0.000000e+00 : f32
    %20 = vector.broadcast %cst_15 : f32 to vector<512x128xf32>
    %21 = arith.maximumf %19, %20 : vector<512x128xf32>
    %cst_16 = arith.constant 5.000000e-01 : f32
    %22 = vector.broadcast %cst_16 : f32 to vector<512x128xf32>
    %23 = arith.cmpf olt, %17, %22 : vector<512x128xf32>
    %24 = arith.mulf %17, %17 : vector<512x128xf32>
    %cst_17 = arith.constant 7.500000e-01 : f32
    %25 = vector.broadcast %cst_17 : f32 to vector<512x128xf32>
    %26 = arith.subf %25, %24 : vector<512x128xf32>
    %cst_18 = arith.constant 5.000000e-01 : f32
    %27 = vector.broadcast %cst_18 : f32 to vector<512x128xf32>
    %28 = arith.mulf %27, %21 : vector<512x128xf32>
    %29 = arith.mulf %28, %21 : vector<512x128xf32>
    %30 = arith.select %23, %26, %29 : vector<512x128xi1>, vector<512x128xf32>
    %31 = vector.extract_strided_slice %9 {offsets = [0, 1], sizes = [512, 1], strides = [1, 1]} : vector<512x3xf32> to vector<512x1xf32>
    %32 = vector.extract_strided_slice %3 {offsets = [1, 0], sizes = [1, 128], strides = [1, 1]} : vector<3x128xf32> to vector<1x128xf32>
    %cst_19 = arith.constant 8.000000e+00 : f32
    %33 = vector.broadcast %cst_19 : f32 to vector<1x128xf32>
    %34 = arith.mulf %32, %33 : vector<1x128xf32>
    %35 = vector.broadcast %31 : vector<512x1xf32> to vector<512x128xf32>
    %36 = vector.broadcast %34 : vector<1x128xf32> to vector<512x128xf32>
    %37 = arith.subf %35, %36 : vector<512x128xf32>
    %38 = math.absf %37 : vector<512x128xf32>
    %cst_20 = arith.constant 1.500000e+00 : f32
    %39 = vector.broadcast %cst_20 : f32 to vector<512x128xf32>
    %40 = arith.subf %39, %38 : vector<512x128xf32>
    %cst_21 = arith.constant 0.000000e+00 : f32
    %41 = vector.broadcast %cst_21 : f32 to vector<512x128xf32>
    %42 = arith.maximumf %40, %41 : vector<512x128xf32>
    %cst_22 = arith.constant 5.000000e-01 : f32
    %43 = vector.broadcast %cst_22 : f32 to vector<512x128xf32>
    %44 = arith.cmpf olt, %38, %43 : vector<512x128xf32>
    %45 = arith.mulf %38, %38 : vector<512x128xf32>
    %cst_23 = arith.constant 7.500000e-01 : f32
    %46 = vector.broadcast %cst_23 : f32 to vector<512x128xf32>
    %47 = arith.subf %46, %45 : vector<512x128xf32>
    %cst_24 = arith.constant 5.000000e-01 : f32
    %48 = vector.broadcast %cst_24 : f32 to vector<512x128xf32>
    %49 = arith.mulf %48, %42 : vector<512x128xf32>
    %50 = arith.mulf %49, %42 : vector<512x128xf32>
    %51 = arith.select %44, %47, %50 : vector<512x128xi1>, vector<512x128xf32>
    %52 = arith.mulf %30, %51 : vector<512x128xf32>
    %53 = vector.extract_strided_slice %9 {offsets = [0, 2], sizes = [512, 1], strides = [1, 1]} : vector<512x3xf32> to vector<512x1xf32>
    %54 = vector.extract_strided_slice %3 {offsets = [2, 0], sizes = [1, 128], strides = [1, 1]} : vector<3x128xf32> to vector<1x128xf32>
    %cst_25 = arith.constant 8.000000e+00 : f32
    %55 = vector.broadcast %cst_25 : f32 to vector<1x128xf32>
    %56 = arith.mulf %54, %55 : vector<1x128xf32>
    %57 = vector.broadcast %53 : vector<512x1xf32> to vector<512x128xf32>
    %58 = vector.broadcast %56 : vector<1x128xf32> to vector<512x128xf32>
    %59 = arith.subf %57, %58 : vector<512x128xf32>
    %60 = math.absf %59 : vector<512x128xf32>
    %cst_26 = arith.constant 1.500000e+00 : f32
    %61 = vector.broadcast %cst_26 : f32 to vector<512x128xf32>
    %62 = arith.subf %61, %60 : vector<512x128xf32>
    %cst_27 = arith.constant 0.000000e+00 : f32
    %63 = vector.broadcast %cst_27 : f32 to vector<512x128xf32>
    %64 = arith.maximumf %62, %63 : vector<512x128xf32>
    %cst_28 = arith.constant 5.000000e-01 : f32
    %65 = vector.broadcast %cst_28 : f32 to vector<512x128xf32>
    %66 = arith.cmpf olt, %60, %65 : vector<512x128xf32>
    %67 = arith.mulf %60, %60 : vector<512x128xf32>
    %cst_29 = arith.constant 7.500000e-01 : f32
    %68 = vector.broadcast %cst_29 : f32 to vector<512x128xf32>
    %69 = arith.subf %68, %67 : vector<512x128xf32>
    %cst_30 = arith.constant 5.000000e-01 : f32
    %70 = vector.broadcast %cst_30 : f32 to vector<512x128xf32>
    %71 = arith.mulf %70, %64 : vector<512x128xf32>
    %72 = arith.mulf %71, %64 : vector<512x128xf32>
    %73 = arith.select %66, %69, %72 : vector<512x128xi1>, vector<512x128xf32>
    %74 = arith.mulf %52, %73 : vector<512x128xf32>
    %cst_31 = arith.constant -5.120000e-02 : f32
    %75 = vector.broadcast %cst_31 : f32 to vector<1x128xf32>
    %76 = arith.mulf %75, %7 : vector<1x128xf32>
    %77 = vector.broadcast %76 : vector<1x128xf32> to vector<9x128xf32>
    %78 = arith.mulf %77, %6 : vector<9x128xf32>
    %79 = vector.broadcast %8 : vector<1x128xf32> to vector<9x128xf32>
    %80 = arith.mulf %79, %5 : vector<9x128xf32>
    %81 = arith.addf %78, %80 : vector<9x128xf32>
    %82 = vector.extract_strided_slice %81 {offsets = [0, 0], sizes = [1, 128], strides = [1, 1]} : vector<9x128xf32> to vector<1x128xf32>
    %83 = vector.extract_strided_slice %3 {offsets = [0, 0], sizes = [1, 128], strides = [1, 1]} : vector<3x128xf32> to vector<1x128xf32>
    %84 = arith.mulf %82, %83 : vector<1x128xf32>
    %85 = vector.extract_strided_slice %81 {offsets = [1, 0], sizes = [1, 128], strides = [1, 1]} : vector<9x128xf32> to vector<1x128xf32>
    %86 = vector.extract_strided_slice %3 {offsets = [1, 0], sizes = [1, 128], strides = [1, 1]} : vector<3x128xf32> to vector<1x128xf32>
    %87 = arith.mulf %85, %86 : vector<1x128xf32>
    %88 = arith.addf %84, %87 : vector<1x128xf32>
    %89 = vector.extract_strided_slice %81 {offsets = [2, 0], sizes = [1, 128], strides = [1, 1]} : vector<9x128xf32> to vector<1x128xf32>
    %90 = vector.extract_strided_slice %3 {offsets = [2, 0], sizes = [1, 128], strides = [1, 1]} : vector<3x128xf32> to vector<1x128xf32>
    %91 = arith.mulf %89, %90 : vector<1x128xf32>
    %92 = arith.addf %88, %91 : vector<1x128xf32>
    %93 = vector.extract_strided_slice %4 {offsets = [0, 0], sizes = [1, 128], strides = [1, 1]} : vector<3x128xf32> to vector<1x128xf32>
    %94 = arith.mulf %8, %93 : vector<1x128xf32>
    %95 = arith.subf %94, %92 : vector<1x128xf32>
    %96 = vector.extract_strided_slice %81 {offsets = [3, 0], sizes = [1, 128], strides = [1, 1]} : vector<9x128xf32> to vector<1x128xf32>
    %97 = vector.extract_strided_slice %3 {offsets = [0, 0], sizes = [1, 128], strides = [1, 1]} : vector<3x128xf32> to vector<1x128xf32>
    %98 = arith.mulf %96, %97 : vector<1x128xf32>
    %99 = vector.extract_strided_slice %81 {offsets = [4, 0], sizes = [1, 128], strides = [1, 1]} : vector<9x128xf32> to vector<1x128xf32>
    %100 = vector.extract_strided_slice %3 {offsets = [1, 0], sizes = [1, 128], strides = [1, 1]} : vector<3x128xf32> to vector<1x128xf32>
    %101 = arith.mulf %99, %100 : vector<1x128xf32>
    %102 = arith.addf %98, %101 : vector<1x128xf32>
    %103 = vector.extract_strided_slice %81 {offsets = [5, 0], sizes = [1, 128], strides = [1, 1]} : vector<9x128xf32> to vector<1x128xf32>
    %104 = vector.extract_strided_slice %3 {offsets = [2, 0], sizes = [1, 128], strides = [1, 1]} : vector<3x128xf32> to vector<1x128xf32>
    %105 = arith.mulf %103, %104 : vector<1x128xf32>
    %106 = arith.addf %102, %105 : vector<1x128xf32>
    %107 = vector.extract_strided_slice %4 {offsets = [1, 0], sizes = [1, 128], strides = [1, 1]} : vector<3x128xf32> to vector<1x128xf32>
    %108 = arith.mulf %8, %107 : vector<1x128xf32>
    %109 = arith.subf %108, %106 : vector<1x128xf32>
    %110 = vector.extract_strided_slice %81 {offsets = [6, 0], sizes = [1, 128], strides = [1, 1]} : vector<9x128xf32> to vector<1x128xf32>
    %111 = vector.extract_strided_slice %3 {offsets = [0, 0], sizes = [1, 128], strides = [1, 1]} : vector<3x128xf32> to vector<1x128xf32>
    %112 = arith.mulf %110, %111 : vector<1x128xf32>
    %113 = vector.extract_strided_slice %81 {offsets = [7, 0], sizes = [1, 128], strides = [1, 1]} : vector<9x128xf32> to vector<1x128xf32>
    %114 = vector.extract_strided_slice %3 {offsets = [1, 0], sizes = [1, 128], strides = [1, 1]} : vector<3x128xf32> to vector<1x128xf32>
    %115 = arith.mulf %113, %114 : vector<1x128xf32>
    %116 = arith.addf %112, %115 : vector<1x128xf32>
    %117 = vector.extract_strided_slice %81 {offsets = [8, 0], sizes = [1, 128], strides = [1, 1]} : vector<9x128xf32> to vector<1x128xf32>
    %118 = vector.extract_strided_slice %3 {offsets = [2, 0], sizes = [1, 128], strides = [1, 1]} : vector<3x128xf32> to vector<1x128xf32>
    %119 = arith.mulf %117, %118 : vector<1x128xf32>
    %120 = arith.addf %116, %119 : vector<1x128xf32>
    %121 = vector.extract_strided_slice %4 {offsets = [2, 0], sizes = [1, 128], strides = [1, 1]} : vector<3x128xf32> to vector<1x128xf32>
    %122 = arith.mulf %8, %121 : vector<1x128xf32>
    %123 = arith.subf %122, %120 : vector<1x128xf32>
    %cst_32 = arith.constant 0.000000e+00 : f32
    %124 = vector.broadcast %cst_32 : f32 to vector<3x128xf32>
    %125 = tpu.concatenate %95, %109, %123, %81, %8, %124 in 0 : vector<1x128xf32>, vector<1x128xf32>, vector<1x128xf32>, vector<9x128xf32>, vector<1x128xf32>, vector<3x128xf32> -> vector<16x128xf32>
    %c0_33 = arith.constant 0 : index
    %c0_34 = arith.constant 0 : index
    %126 = vector.load %arg10[%c0_33, %c0_34] : memref<16x512xf32, #tpu.memory_space<vmem>>, vector<16x512xf32>
    %cst_35 = arith.constant dense<0.000000e+00> : vector<16x512xf32>
    %127 = tpu.matmul %125, %74, %cst_35 {dimension_numbers = #tpu.dot_dimension_numbers<[1], [1], [0], [0], [0, 0, 1, 0], [], []>} : vector<16x128xf32>, vector<512x128xf32>, vector<16x512xf32> -> vector<16x512xf32>
    %128 = arith.addf %126, %127 : vector<16x512xf32>
    %c0_36 = arith.constant 0 : index
    %c0_37 = arith.constant 0 : index
    %129 = vector.load %arg10[%c0_36, %c0_37] : memref<16x512xf32, #tpu.memory_space<vmem>>, vector<16x512xf32>
    tpu.vector_store %arg10[%c0_36, %c0_37], %128 {strides = array<i32>} : memref<16x512xf32, #tpu.memory_space<vmem>>, vector<16x512xf32>,
    %c0_i32_38 = arith.constant 0 : i32
    %130 = arith.cmpi eq, %arg0, %c0_i32_38 : i32
    %131 = arith.extui %130 : i1 to i32
    %c0_i32_39 = arith.constant 0 : i32
    %132 = arith.cmpi ne, %131, %c0_i32_39 : i32
    scf.if %132 {
      %c0_40 = arith.constant 0 : index
      %c0_41 = arith.constant 0 : index
      %133 = vector.load %arg10[%c0_40, %c0_41] : memref<16x512xf32, #tpu.memory_space<vmem>>, vector<16x512xf32>
      %c0_42 = arith.constant 0 : index
      %c0_43 = arith.constant 0 : index
      %134 = vector.load %arg8[%c0_42, %c0_43] : memref<3x512xf32, #tpu.memory_space<vmem>>, vector<3x512xf32>
      %135 = vector.extract_strided_slice %134 {offsets = [0, 0], sizes = [1, 512], strides = [1, 1]} : vector<3x512xf32> to vector<1x512xf32>
      %cst_44 = arith.constant 1.250000e-01 : f32
      %136 = vector.broadcast %cst_44 : f32 to vector<1x512xf32>
      %137 = arith.mulf %135, %136 : vector<1x512xf32>
      %138 = vector.extract_strided_slice %134 {offsets = [1, 0], sizes = [1, 512], strides = [1, 1]} : vector<3x512xf32> to vector<1x512xf32>
      %cst_45 = arith.constant 1.250000e-01 : f32
      %139 = vector.broadcast %cst_45 : f32 to vector<1x512xf32>
      %140 = arith.mulf %138, %139 : vector<1x512xf32>
      %141 = vector.extract_strided_slice %134 {offsets = [2, 0], sizes = [1, 512], strides = [1, 1]} : vector<3x512xf32> to vector<1x512xf32>
      %cst_46 = arith.constant 1.250000e-01 : f32
      %142 = vector.broadcast %cst_46 : f32 to vector<1x512xf32>
      %143 = arith.mulf %141, %142 : vector<1x512xf32>
      %144 = vector.extract_strided_slice %133 {offsets = [12, 0], sizes = [1, 512], strides = [1, 1]} : vector<16x512xf32> to vector<1x512xf32>
      %cst_47 = arith.constant 0.000000e+00 : f32
      %145 = vector.broadcast %cst_47 : f32 to vector<1x512xf32>
      %146 = arith.cmpf ogt, %144, %145 : vector<1x512xf32>
      %cst_48 = arith.constant 1.000000e+00 : f32
      %147 = vector.broadcast %cst_48 : f32 to vector<1x512xf32>
      %148 = arith.select %146, %144, %147 : vector<1x512xi1>, vector<1x512xf32>
      %149 = tpu.reciprocal %148 {approx = true} : vector<1x512xf32> -> vector<1x512xf32>
      %cst_49 = arith.constant 0.000000e+00 : f32
      %150 = vector.broadcast %cst_49 : f32 to vector<1x512xf32>
      %151 = arith.select %146, %149, %150 : vector<1x512xi1>, vector<1x512xf32>
      %152 = vector.extract_strided_slice %133 {offsets = [0, 0], sizes = [1, 512], strides = [1, 1]} : vector<16x512xf32> to vector<1x512xf32>
      %153 = vector.extract_strided_slice %133 {offsets = [3, 0], sizes = [1, 512], strides = [1, 1]} : vector<16x512xf32> to vector<1x512xf32>
      %154 = arith.mulf %153, %137 : vector<1x512xf32>
      %155 = arith.addf %152, %154 : vector<1x512xf32>
      %156 = vector.extract_strided_slice %133 {offsets = [4, 0], sizes = [1, 512], strides = [1, 1]} : vector<16x512xf32> to vector<1x512xf32>
      %157 = arith.mulf %156, %140 : vector<1x512xf32>
      %158 = arith.addf %155, %157 : vector<1x512xf32>
      %159 = vector.extract_strided_slice %133 {offsets = [5, 0], sizes = [1, 512], strides = [1, 1]} : vector<16x512xf32> to vector<1x512xf32>
      %160 = arith.mulf %159, %143 : vector<1x512xf32>
      %161 = arith.addf %158, %160 : vector<1x512xf32>
      %162 = arith.mulf %161, %151 : vector<1x512xf32>
      %cst_50 = arith.constant 0.000000e+00 : f32
      %163 = vector.broadcast %cst_50 : f32 to vector<1x512xf32>
      %164 = arith.addf %162, %163 : vector<1x512xf32>
      %cst_51 = arith.constant 0.000000e+00 : f32
      %165 = vector.broadcast %cst_51 : f32 to vector<1x512xf32>
      %166 = arith.select %146, %164, %165 : vector<1x512xi1>, vector<1x512xf32>
      %167 = vector.extract_strided_slice %134 {offsets = [0, 0], sizes = [1, 512], strides = [1, 1]} : vector<3x512xf32> to vector<1x512xf32>
      %cst_52 = arith.constant 1.500000e+00 : f32
      %168 = vector.broadcast %cst_52 : f32 to vector<1x512xf32>
      %169 = arith.cmpf olt, %167, %168 : vector<1x512xf32>
      %170 = vector.extract_strided_slice %134 {offsets = [0, 0], sizes = [1, 512], strides = [1, 1]} : vector<3x512xf32> to vector<1x512xf32>
      %cst_53 = arith.constant 6.500000e+00 : f32
      %171 = vector.broadcast %cst_53 : f32 to vector<1x512xf32>
      %172 = arith.cmpf ogt, %170, %171 : vector<1x512xf32>
      %cst_54 = arith.constant 0.000000e+00 : f32
      %173 = vector.broadcast %cst_54 : f32 to vector<1x512xf32>
      %174 = arith.cmpf olt, %166, %173 : vector<1x512xf32>
      %175 = arith.andi %169, %174 : vector<1x512xi1>
      %cst_55 = arith.constant 0.000000e+00 : f32
      %176 = vector.broadcast %cst_55 : f32 to vector<1x512xf32>
      %177 = arith.select %175, %176, %166 : vector<1x512xi1>, vector<1x512xf32>
      %cst_56 = arith.constant 0.000000e+00 : f32
      %178 = vector.broadcast %cst_56 : f32 to vector<1x512xf32>
      %179 = arith.cmpf ogt, %177, %178 : vector<1x512xf32>
      %180 = arith.andi %172, %179 : vector<1x512xi1>
      %cst_57 = arith.constant 0.000000e+00 : f32
      %181 = vector.broadcast %cst_57 : f32 to vector<1x512xf32>
      %182 = arith.select %180, %181, %177 : vector<1x512xi1>, vector<1x512xf32>
      %183 = vector.extract_strided_slice %133 {offsets = [1, 0], sizes = [1, 512], strides = [1, 1]} : vector<16x512xf32> to vector<1x512xf32>
      %184 = vector.extract_strided_slice %133 {offsets = [6, 0], sizes = [1, 512], strides = [1, 1]} : vector<16x512xf32> to vector<1x512xf32>
      %185 = arith.mulf %184, %137 : vector<1x512xf32>
      %186 = arith.addf %183, %185 : vector<1x512xf32>
      %187 = vector.extract_strided_slice %133 {offsets = [7, 0], sizes = [1, 512], strides = [1, 1]} : vector<16x512xf32> to vector<1x512xf32>
      %188 = arith.mulf %187, %140 : vector<1x512xf32>
      %189 = arith.addf %186, %188 : vector<1x512xf32>
      %190 = vector.extract_strided_slice %133 {offsets = [8, 0], sizes = [1, 512], strides = [1, 1]} : vector<16x512xf32> to vector<1x512xf32>
      %191 = arith.mulf %190, %143 : vector<1x512xf32>
      %192 = arith.addf %189, %191 : vector<1x512xf32>
      %193 = arith.mulf %192, %151 : vector<1x512xf32>
      %cst_58 = arith.constant -1.960000e-03 : f32
      %194 = vector.broadcast %cst_58 : f32 to vector<1x512xf32>
      %195 = arith.addf %193, %194 : vector<1x512xf32>
      %cst_59 = arith.constant 0.000000e+00 : f32
      %196 = vector.broadcast %cst_59 : f32 to vector<1x512xf32>
      %197 = arith.select %146, %195, %196 : vector<1x512xi1>, vector<1x512xf32>
      %198 = vector.extract_strided_slice %134 {offsets = [1, 0], sizes = [1, 512], strides = [1, 1]} : vector<3x512xf32> to vector<1x512xf32>
      %cst_60 = arith.constant 1.500000e+00 : f32
      %199 = vector.broadcast %cst_60 : f32 to vector<1x512xf32>
      %200 = arith.cmpf olt, %198, %199 : vector<1x512xf32>
      %201 = vector.extract_strided_slice %134 {offsets = [1, 0], sizes = [1, 512], strides = [1, 1]} : vector<3x512xf32> to vector<1x512xf32>
      %cst_61 = arith.constant 6.500000e+00 : f32
      %202 = vector.broadcast %cst_61 : f32 to vector<1x512xf32>
      %203 = arith.cmpf ogt, %201, %202 : vector<1x512xf32>
      %cst_62 = arith.constant 0.000000e+00 : f32
      %204 = vector.broadcast %cst_62 : f32 to vector<1x512xf32>
      %205 = arith.cmpf olt, %197, %204 : vector<1x512xf32>
      %206 = arith.andi %200, %205 : vector<1x512xi1>
      %cst_63 = arith.constant 0.000000e+00 : f32
      %207 = vector.broadcast %cst_63 : f32 to vector<1x512xf32>
      %208 = arith.select %206, %207, %197 : vector<1x512xi1>, vector<1x512xf32>
      %cst_64 = arith.constant 0.000000e+00 : f32
      %209 = vector.broadcast %cst_64 : f32 to vector<1x512xf32>
      %210 = arith.cmpf ogt, %208, %209 : vector<1x512xf32>
      %211 = arith.andi %203, %210 : vector<1x512xi1>
      %cst_65 = arith.constant 0.000000e+00 : f32
      %212 = vector.broadcast %cst_65 : f32 to vector<1x512xf32>
      %213 = arith.select %211, %212, %208 : vector<1x512xi1>, vector<1x512xf32>
      %214 = vector.extract_strided_slice %133 {offsets = [2, 0], sizes = [1, 512], strides = [1, 1]} : vector<16x512xf32> to vector<1x512xf32>
      %215 = vector.extract_strided_slice %133 {offsets = [9, 0], sizes = [1, 512], strides = [1, 1]} : vector<16x512xf32> to vector<1x512xf32>
      %216 = arith.mulf %215, %137 : vector<1x512xf32>
      %217 = arith.addf %214, %216 : vector<1x512xf32>
      %218 = vector.extract_strided_slice %133 {offsets = [10, 0], sizes = [1, 512], strides = [1, 1]} : vector<16x512xf32> to vector<1x512xf32>
      %219 = arith.mulf %218, %140 : vector<1x512xf32>
      %220 = arith.addf %217, %219 : vector<1x512xf32>
      %221 = vector.extract_strided_slice %133 {offsets = [11, 0], sizes = [1, 512], strides = [1, 1]} : vector<16x512xf32> to vector<1x512xf32>
      %222 = arith.mulf %221, %143 : vector<1x512xf32>
      %223 = arith.addf %220, %222 : vector<1x512xf32>
      %224 = arith.mulf %223, %151 : vector<1x512xf32>
      %cst_66 = arith.constant 0.000000e+00 : f32
      %225 = vector.broadcast %cst_66 : f32 to vector<1x512xf32>
      %226 = arith.addf %224, %225 : vector<1x512xf32>
      %cst_67 = arith.constant 0.000000e+00 : f32
      %227 = vector.broadcast %cst_67 : f32 to vector<1x512xf32>
      %228 = arith.select %146, %226, %227 : vector<1x512xi1>, vector<1x512xf32>
      %229 = vector.extract_strided_slice %134 {offsets = [2, 0], sizes = [1, 512], strides = [1, 1]} : vector<3x512xf32> to vector<1x512xf32>
      %cst_68 = arith.constant 1.500000e+00 : f32
      %230 = vector.broadcast %cst_68 : f32 to vector<1x512xf32>
      %231 = arith.cmpf olt, %229, %230 : vector<1x512xf32>
      %232 = vector.extract_strided_slice %134 {offsets = [2, 0], sizes = [1, 512], strides = [1, 1]} : vector<3x512xf32> to vector<1x512xf32>
      %cst_69 = arith.constant 6.500000e+00 : f32
      %233 = vector.broadcast %cst_69 : f32 to vector<1x512xf32>
      %234 = arith.cmpf ogt, %232, %233 : vector<1x512xf32>
      %cst_70 = arith.constant 0.000000e+00 : f32
      %235 = vector.broadcast %cst_70 : f32 to vector<1x512xf32>
      %236 = arith.cmpf olt, %228, %235 : vector<1x512xf32>
      %237 = arith.andi %231, %236 : vector<1x512xi1>
      %cst_71 = arith.constant 0.000000e+00 : f32
      %238 = vector.broadcast %cst_71 : f32 to vector<1x512xf32>
      %239 = arith.select %237, %238, %228 : vector<1x512xi1>, vector<1x512xf32>
      %cst_72 = arith.constant 0.000000e+00 : f32
      %240 = vector.broadcast %cst_72 : f32 to vector<1x512xf32>
      %241 = arith.cmpf ogt, %239, %240 : vector<1x512xf32>
      %242 = arith.andi %234, %241 : vector<1x512xi1>
      %cst_73 = arith.constant 0.000000e+00 : f32
      %243 = vector.broadcast %cst_73 : f32 to vector<1x512xf32>
      %244 = arith.select %242, %243, %239 : vector<1x512xi1>, vector<1x512xf32>
      %245 = arith.mulf %182, %137 : vector<1x512xf32>
      %246 = arith.mulf %182, %140 : vector<1x512xf32>
      %247 = arith.mulf %182, %143 : vector<1x512xf32>
      %248 = arith.mulf %213, %137 : vector<1x512xf32>
      %249 = arith.mulf %213, %140 : vector<1x512xf32>
      %250 = arith.mulf %213, %143 : vector<1x512xf32>
      %251 = arith.mulf %244, %137 : vector<1x512xf32>
      %252 = arith.mulf %244, %140 : vector<1x512xf32>
      %253 = arith.mulf %244, %143 : vector<1x512xf32>
      %254 = tpu.concatenate %182, %213, %244, %245, %246, %247, %248, %249, %250, %251, %252, %253 in 0 : vector<1x512xf32>, vector<1x512xf32>, vector<1x512xf32>, vector<1x512xf32>, vector<1x512xf32>, vector<1x512xf32>, vector<1x512xf32>, vector<1x512xf32>, vector<1x512xf32>, vector<1x512xf32>, vector<1x512xf32>, vector<1x512xf32> -> vector<12x512xf32>
      %c0_74 = arith.constant 0 : index
      %c0_75 = arith.constant 0 : index
      %255 = vector.load %arg9[%c0_74, %c0_75] : memref<12x512xf32, #tpu.memory_space<vmem>>, vector<12x512xf32>
      tpu.vector_store %arg9[%c0_74, %c0_75], %254 {strides = array<i32>} : memref<12x512xf32, #tpu.memory_space<vmem>>, vector<12x512xf32>,
    } else {
    }
    return
  }
  func.func @transform_0(%arg0: i32) -> (i32, i32) {
    %c0_i32 = arith.constant 0 : i32
    %c0_i32_0 = arith.constant 0 : i32
    return %c0_i32, %arg0 : i32, i32
  }
  func.func @transform_1(%arg0: i32) -> (i32, i32) {
    %c0_i32 = arith.constant 0 : i32
    %c0_i32_0 = arith.constant 0 : i32
    return %c0_i32, %arg0 : i32, i32
  }
  func.func @transform_2(%arg0: i32) -> (i32, i32) {
    %c0_i32 = arith.constant 0 : i32
    %c0_i32_0 = arith.constant 0 : i32
    return %c0_i32, %arg0 : i32, i32
  }
  func.func @transform_3(%arg0: i32) -> (i32, i32) {
    %c0_i32 = arith.constant 0 : i32
    %c0_i32_0 = arith.constant 0 : i32
    return %c0_i32, %arg0 : i32, i32
  }
  func.func @transform_4(%arg0: i32) -> (i32, i32) {
    %c0_i32 = arith.constant 0 : i32
    %c0_i32_0 = arith.constant 0 : i32
    return %c0_i32, %arg0 : i32, i32
  }
  func.func @transform_5(%arg0: i32) -> (i32, i32) {
    %c0_i32 = arith.constant 0 : i32
    %c0_i32_0 = arith.constant 0 : i32
    return %c0_i32, %arg0 : i32, i32
  }
  func.func @transform_6(%arg0: i32) -> (i32, i32) {
    %c0_i32 = arith.constant 0 : i32
    %c0_i32_0 = arith.constant 0 : i32
    %c0_i32_1 = arith.constant 0 : i32
    return %c0_i32, %c0_i32_0 : i32, i32
  }
  func.func @transform_7(%arg0: i32) -> (i32, i32) {
    %c0_i32 = arith.constant 0 : i32
    %c0_i32_0 = arith.constant 0 : i32
    %c0_i32_1 = arith.constant 0 : i32
    return %c0_i32, %c0_i32_0 : i32, i32
  }
  func.func @transform_8(%arg0: i32) -> (i32, i32) {
    %c0_i32 = arith.constant 0 : i32
    %c0_i32_0 = arith.constant 0 : i32
    %c0_i32_1 = arith.constant 0 : i32
    return %c0_i32, %c0_i32_0 : i32, i32
  }
}

</mosaic_0001>

<bundles_post_ra>
// kernel: tpu_custom_call.1
= control target key start
LH: loop header
LB: loop body
LE: loop exit
PB: predicated region body
PF: predicated region fallthrough
CT: control target
= control target key end

     0   :  { %v8764_v2 = vmov 0   ;;  %s8755_s0 = inlined_call_operand.vmem [shape: f32[3,128], index: 0, kind: input, shape index: {}]   ;;  %s8756_s1 = inlined_call_operand.vmem [shape: f32[3,128], index: 1, kind: input, shape index: {}]   ;;  %s8757_s2 = inlined_call_operand.vmem [shape: f32[9,128], index: 2, kind: input, shape index: {}]   ;;  %s8758_s3 = inlined_call_operand.vmem [shape: f32[9,128], index: 3, kind: input, shape index: {}]   ;;  %s8759_s4 = inlined_call_operand.vmem [shape: f32[1,128], index: 4, kind: input, shape index: {}]   ;;  %s8760_s5 = inlined_call_operand.vmem [shape: f32[1,128], index: 5, kind: input, shape index: {}]   ;;  %s8761_s6 = inlined_call_operand.vmem [shape: f32[512,3], index: 6, kind: input, shape index: {}]   ;;  %s8762_s7 = inlined_call_operand.vmem [shape: f32[3,512], index: 7, kind: input, shape index: {}]   ;;  %s8763_s8 = inlined_call_operand.hbm [shape: f32[12,512], index: 8, kind: output, shape index: {}]  }
   0x1   :  { %v4396_v0 = vld [vmem:[%s8761_s6 + $0x10] sm:$0xff]  ;;  %v4401_v1 = vld [vmem:[%s8761_s6] sm:$0xff]  ;;  %4219 = vset.pattern.permute.xlu1 %v8764_v2  ;;  %4218 = vset.pattern.permute.xlu0 %v8764_v2  ;;  %v4410_v3 = vld [vmem:[%s8761_s6 + $0x18] sm:$0xff] }
   0x2   :  { %127 = vperm.xlu1 %4219, %v4396_v0   ;;  %117 = vperm.xlu0 %4218, %v4401_v1   ;;  %v4415_v4 = vld [vmem:[%s8761_s6 + $0x8] sm:$0xff]  ;;  %v4427_v6 = vld [vmem:[%s8761_s6 + $0x20] sm:$0xff]  ;;  %v4434_v7 = vld [vmem:[%s8761_s6 + $0x38] sm:$0xff] }
   0x3   :  { %v4422_v5 = vld [vmem:[%s8761_s6 + $0x28] sm:$0xff]  ;;  %v4439_v8 = vld [vmem:[%s8761_s6 + $0x30] sm:$0xff]  ;;  %v4451_v10 = vld [vmem:[%s8761_s6 + $0x40] sm:$0xff] }
   0x4   :  { %v4446_v9 = vld [vmem:[%s8761_s6 + $0x48] sm:$0xff]  ;;  %v4458_v11 = vld [vmem:[%s8761_s6 + $0x58] sm:$0xff]  ;;  %v4463_v12 = vld [vmem:[%s8761_s6 + $0x50] sm:$0xff] }
   0x6   :  { %132 = vperm.xlu1 %4219, %v4410_v3   ;;  %122 = vperm.xlu0 %4218, %v4415_v4  }
   0xa   :  { %142 = vperm.xlu1 %4219, %v4422_v5   ;;  %137 = vperm.xlu0 %4218, %v4427_v6  }
   0xe   :  { %152 = vperm.xlu1 %4219, %v4434_v7   ;;  %147 = vperm.xlu0 %4218, %v4439_v8  }
  0x12   :  { %162 = vperm.xlu1 %4219, %v4446_v9   ;;  %157 = vperm.xlu0 %4218, %v4451_v10  }
  0x13   :  { %13 = vsyncpa [#allocation4], 0  ;;  %v4470_v13 = vld [vmem:[%s8761_s6 + $0x68] sm:$0xff]  ;;  %v4475_v14 = vld [vmem:[%s8761_s6 + $0x60] sm:$0xff] }
  0x14   :  { %v4482_v15 = vld [vmem:[%s8761_s6 + $0x78] sm:$0xff]  ;;  %v4487_v16 = vld [vmem:[%s8761_s6 + $0x70] sm:$0xff]  ;;  %v4494_v17 = vld [vmem:[%s8761_s6 + $0x88] sm:$0xff] }
  0x15   :  { %9126 = vst [vmem:[#allocation6_spill] sm:$0xff] %v4487_v16  ;;  %v4499_v18 = vld [vmem:[%s8761_s6 + $0x80] sm:$0xff]  ;;  %v4506_v19 = vld [vmem:[%s8761_s6 + $0x98] sm:$0xff]  ;;  %v4511_v20 = vld [vmem:[%s8761_s6 + $0x90] sm:$0xff] }
  0x16   :  { %172 = vperm.xlu1 %4219, %v4458_v11   ;;  %167 = vperm.xlu0 %4218, %v4463_v12   ;;  %v4518_v21 = vld [vmem:[%s8761_s6 + $0xa8] sm:$0xff]  ;;  %v4523_v22 = vld [vmem:[%s8761_s6 + $0xa0] sm:$0xff]  ;;  %v4530_v23 = vld [vmem:[%s8761_s6 + $0xb8] sm:$0xff] }
  0x17   :  { %v4535_v24 = vld [vmem:[%s8761_s6 + $0xb0] sm:$0xff]  ;;  %v4542_v25 = vld [vmem:[%s8761_s6 + $0xc8] sm:$0xff]  ;;  %v4547_v26 = vld [vmem:[%s8761_s6 + $0xc0] sm:$0xff] }
  0x18   :  { %v4554_v27 = vld [vmem:[%s8761_s6 + $0xd8] sm:$0xff]  ;;  %v4559_v28 = vld [vmem:[%s8761_s6 + $0xd0] sm:$0xff]  ;;  %v4566_v29 = vld [vmem:[%s8761_s6 + $0xe8] sm:$0xff] }
  0x19   :  { %v4571_v30 = vld [vmem:[%s8761_s6 + $0xe0] sm:$0xff]  ;;  %v4578_v31 = vld [vmem:[%s8761_s6 + $0xf8] sm:$0xff]  ;;  %v4583_v32 = vld [vmem:[%s8761_s6 + $0xf0] sm:$0xff] }
  0x1a   :  { %182 = vperm.xlu1 %4219, %v4470_v13   ;;  %177 = vperm.xlu0 %4218, %v4475_v14   ;;  %v83_v33 = vld [vmem:[%s8761_s6 + $0x108] sm:$0xff]  ;;  %v82_v34 = vld [vmem:[%s8761_s6 + $0x100] sm:$0xff]  ;;  %v85_v35 = vld [vmem:[%s8761_s6 + $0x118] sm:$0xff] }
  0x1b   :  { %v84_v36 = vld [vmem:[%s8761_s6 + $0x110] sm:$0xff]  ;;  %v87_v37 = vld [vmem:[%s8761_s6 + $0x128] sm:$0xff]  ;;  %v86_v38 = vld [vmem:[%s8761_s6 + $0x120] sm:$0xff] }
  0x1c   :  { %v89_v39 = vld [vmem:[%s8761_s6 + $0x138] sm:$0xff]  ;;  %v88_v40 = vld [vmem:[%s8761_s6 + $0x130] sm:$0xff]  ;;  %v91_v41 = vld [vmem:[%s8761_s6 + $0x148] sm:$0xff] }
  0x1d   :  { %v90_v42 = vld [vmem:[%s8761_s6 + $0x140] sm:$0xff]  ;;  %v93_v43 = vld [vmem:[%s8761_s6 + $0x158] sm:$0xff]  ;;  %v92_v44 = vld [vmem:[%s8761_s6 + $0x150] sm:$0xff] }
  0x1e   :  { %192 = vperm.xlu1 %4219, %v4482_v15   ;;  %187 = vperm.xlu0 %4218, %v4487_v16   ;;  %v4626_v45 = vld [vmem:[%s8761_s6 + $0x168] sm:$0xff]  ;;  %v94_v46 = vld [vmem:[%s8761_s6 + $0x160] sm:$0xff]  ;;  %v4635_v47 = vld [vmem:[%s8761_s6 + $0x178] sm:$0xff] }
  0x1f   :  { %9127 = vst [vmem:[#allocation7_spill] sm:$0xff] %v4626_v45  ;;  %v4640_v48 = vld [vmem:[%s8761_s6 + $0x170] sm:$0xff]  ;;  %v99_v49 = vld [vmem:[%s8761_s6 + $0x188] sm:$0xff]  ;;  %v98_v50 = vld [vmem:[%s8761_s6 + $0x180] sm:$0xff] }
  0x20   :  { %v4653_v51 = vld [vmem:[%s8761_s6 + $0x198] sm:$0xff]  ;;  %v4658_v52 = vld [vmem:[%s8761_s6 + $0x190] sm:$0xff]  ;;  %v4665_v53 = vld [vmem:[%s8761_s6 + $0x1a8] sm:$0xff] }
  0x21   :  { %9128 = vst [vmem:[#allocation8_spill] sm:$0xff] %v4653_v51  ;;  %9129 = vst [vmem:[#allocation9_spill] sm:$0xff] %v4658_v52  ;;  %v4670_v54 = vld [vmem:[%s8761_s6 + $0x1a0] sm:$0xff]  ;;  %v4677_v55 = vld [vmem:[%s8761_s6 + $0x1b8] sm:$0xff] }
  0x22   :  { %202 = vperm.xlu1 %4219, %v4494_v17   ;;  %197 = vperm.xlu0 %4218, %v4499_v18   ;;  %9130 = vst [vmem:[#allocation10_spill] sm:$0xff] %v4665_v53  ;;  %9131 = vst [vmem:[#allocation11_spill] sm:$0xff] %v4670_v54  ;;  %v4682_v56 = vld [vmem:[%s8761_s6 + $0x1b0] sm:$0xff]  ;;  %v4689_v57 = vld [vmem:[%s8761_s6 + $0x1c8] sm:$0xff] }
  0x23   :  { %9132 = vst [vmem:[#allocation12_spill] sm:$0xff] %v4677_v55  ;;  %9133 = vst [vmem:[#allocation13_spill] sm:$0xff] %v4682_v56  ;;  %v4694_v58 = vld [vmem:[%s8761_s6 + $0x1c0] sm:$0xff]  ;;  %v4701_v59 = vld [vmem:[%s8761_s6 + $0x1d8] sm:$0xff] }
  0x24   :  { %9134 = vst [vmem:[#allocation14_spill] sm:$0xff] %v4694_v58  ;;  %v4706_v60 = vld [vmem:[%s8761_s6 + $0x1d0] sm:$0xff]  ;;  %v4713_v61 = vld [vmem:[%s8761_s6 + $0x1e8] sm:$0xff]  ;;  %v4718_v62 = vld [vmem:[%s8761_s6 + $0x1e0] sm:$0xff] }
  0x25   :  { %v4725_v63 = vld [vmem:[%s8761_s6 + $0x1f8] sm:$0xff] }
  0x26   :  { %212 = vperm.xlu1 %4219, %v4506_v19   ;;  %207 = vperm.xlu0 %4218, %v4511_v20  }
  0x2a   :  { %222 = vperm.xlu1 %4219, %v4518_v21   ;;  %217 = vperm.xlu0 %4218, %v4523_v22  }
  0x2e   :  { %232 = vperm.xlu1 %4219, %v4530_v23   ;;  %227 = vperm.xlu0 %4218, %v4535_v24  }
  0x32   :  { %242 = vperm.xlu1 %4219, %v4542_v25   ;;  %237 = vperm.xlu0 %4218, %v4547_v26  }
  0x36   :  { %252 = vperm.xlu1 %4219, %v4554_v27   ;;  %247 = vperm.xlu0 %4218, %v4559_v28  }
  0x3a   :  { %262 = vperm.xlu1 %4219, %v4566_v29   ;;  %257 = vperm.xlu0 %4218, %v4571_v30  }
  0x3e   :  { %272 = vperm.xlu1 %4219, %v4578_v31   ;;  %267 = vperm.xlu0 %4218, %v4583_v32  }
  0x42   :  { %282 = vperm.xlu1 %4219, %v83_v33   ;;  %277 = vperm.xlu0 %4218, %v82_v34   ;;  %v4730_v33 = vld [vmem:[%s8761_s6 + $0x1f0] sm:$0xff] }
  0x46   :  { %292 = vperm.xlu1 %4219, %v85_v35   ;;  %287 = vperm.xlu0 %4218, %v84_v36  }
  0x4a   :  { %302 = vperm.xlu1 %4219, %v87_v37   ;;  %297 = vperm.xlu0 %4218, %v86_v38   ;;  %v8766_v38 = vmov 1  }
  0x4e   :  { %312 = vperm.xlu1 %4219, %v89_v39   ;;  %307 = vperm.xlu0 %4218, %v88_v40  }
  0x52   :  { %322 = vperm.xlu1 %4219, %v91_v41   ;;  %317 = vperm.xlu0 %4218, %v90_v42  }
  0x56   :  { %332 = vperm.xlu1 %4219, %v93_v43   ;;  %327 = vperm.xlu0 %4218, %v92_v44   ;;  %v435_v43 = vlaneseq }
  0x5a   :  { %342 = vperm.xlu1 %4219, %v4626_v45   ;;  %337 = vperm.xlu0 %4218, %v94_v46  }
  0x5e   :  { %352 = vperm.xlu1 %4219, %v4635_v47   ;;  %347 = vperm.xlu0 %4218, %v4640_v48  }
  0x62   :  { %362 = vperm.xlu1 %4219, %v99_v49   ;;  %357 = vperm.xlu0 %4218, %v98_v50  }
  0x66   :  { %372 = vperm.xlu1 %4219, %v4653_v51   ;;  %367 = vperm.xlu0 %4218, %v4658_v52  }
  0x6a   :  { %382 = vperm.xlu1 %4219, %v4665_v53   ;;  %377 = vperm.xlu0 %4218, %v4670_v54  }
  0x6e   :  { %392 = vperm.xlu1 %4219, %v4677_v55   ;;  %387 = vperm.xlu0 %4218, %v4682_v56  }
  0x72   :  { %402 = vperm.xlu1 %4219, %v4689_v57   ;;  %397 = vperm.xlu0 %4218, %v4694_v58  }
  0x76   :  { %412 = vperm.xlu1 %4219, %v4701_v59   ;;  %407 = vperm.xlu0 %4218, %v4706_v60  }
  0x7a   :  { %422 = vperm.xlu1 %4219, %v4713_v61   ;;  %417 = vperm.xlu0 %4218, %v4718_v62  }
  0x7d   :  { %v128_v34 = vpop.permute.xlu1 %127  ;;  %v118_v35 = vpop.permute.xlu0 %117 }
  0x7e   :  { %432 = vperm.xlu1 %4219, %v4725_v63   ;;  %427 = vperm.xlu0 %4218, %v4730_v33  }
  0x81   :  { %v133_v36 = vpop.permute.xlu1 %132  ;;  %v123_v37 = vpop.permute.xlu0 %122 }
  0x82   :  { %4221 = vset.pattern.permute.xlu1 %v8766_v38  ;;  %4220 = vset.pattern.permute.xlu0 %v8766_v38 }
  0x83   :  { %1084 = vperm.xlu1 %4221, %v4415_v4   ;;  %1080 = vperm.xlu0 %4220, %v4401_v1   ;;  %v4750_v1 = vshrl.u32 %v435_v43, 7 }
  0x85   :  { %v143_v39 = vpop.permute.xlu1 %142  ;;  %v138_v40 = vpop.permute.xlu0 %137  ;;  %9135 = vst [vmem:[#allocation15_spill] sm:$0xff] %v4750_v1 }
  0x87   :  { %1088 = vperm.xlu1 %4221, %v4396_v0   ;;  %1092 = vperm.xlu0 %4220, %v4410_v3   ;;  %v42_v0 = vld [vmem:[%s8755_s0] sm:$0x7] }
  0x89   :  { %v4740_v41 = vpop.permute.xlu1 %152  ;;  %v4742_v42 = vpop.permute.xlu0 %147 }
  0x8b   :  { %1096 = vperm.xlu1 %4221, %v4427_v6   ;;  %1100 = vperm.xlu0 %4220, %v4422_v5   ;;  %v4762_v5 = vsub.s32 0, %v4750_v1  ;;  %v4764_v6 = vmul.f32 8.0, %v42_v0 }
  0x8d   :  { %v4746_v44 = vpop.permute.xlu1 %162  ;;  %v4748_v4 = vpop.permute.xlu0 %157  ;;  %9136 = vst [vmem:[#allocation16_spill] sm:$0xff] %v4762_v5  ;;  %9137 = vst [vmem:[#allocation17_spill] sm:$0xff] %v4764_v6 }
  0x8f   :  { %1104 = vperm.xlu1 %4221, %v4439_v8   ;;  %1108 = vperm.xlu0 %4220, %v4434_v7   ;;  %v4774_v7 = vrot.slane %v4764_v6, %v4762_v5 }
  0x91   :  { %v4757_v3 = vpop.permute.xlu1 %172  ;;  %v4759_v46 = vpop.permute.xlu0 %167  ;;  %v444_v5 = vsub.f32 %v143_v39, %v4774_v7  ;;  %v446_v53 = vsub.f32 %v4740_v41, %v4774_v7 }
  0x93   :  { %1112 = vperm.xlu1 %4221, %v4451_v10   ;;  %1116 = vperm.xlu0 %4220, %v4446_v9   ;;  %v441_v10 = vsub.f32 %v128_v34, %v4774_v7  ;;  %v439_v9 = vsub.f32 %v118_v35, %v4774_v7  ;;  %v440_v34 = vsub.f32 %v123_v37, %v4774_v7  ;;  %v4816_v54 = vand.u32 2147483647, %v444_v5 }
  0x95   :  { %v4768_v49 = vpop.permute.xlu1 %182  ;;  %v4770_v50 = vpop.permute.xlu0 %177  ;;  %v4790_v38 = vand.u32 2147483647, %v441_v10  ;;  %v4810_v6 = vand.u32 2147483647, %v440_v34  ;;  %9142 = vst [vmem:[#allocation22_spill] sm:$0xff] %v4816_v54 }
  0x97   :  { %1120 = vperm.xlu1 %4221, %v4463_v12   ;;  %1124 = vperm.xlu0 %4220, %v4458_v11   ;;  %9138 = vst [vmem:[#allocation18_spill] sm:$0xff] %v4790_v38  ;;  %v4792_v12 = vand.u32 2147483647, %v439_v9  ;;  %v442_v11 = vsub.f32 %v133_v36, %v4774_v7  ;;  %v443_v36 = vsub.f32 %v138_v40, %v4774_v7  ;;  %9141 = vst [vmem:[#allocation21_spill] sm:$0xff] %v4810_v6 }
  0x98   :  { %v445_v40 = vsub.f32 %v4742_v42, %v4774_v7  ;;  %v568_v5 = vsub.f32 1.5, %v4810_v6 }
  0x99   :  { %v4778_v8 = vpop.permute.xlu1 %192  ;;  %v4780_v43 = vpop.permute.xlu0 %187  ;;  %9139 = vst [vmem:[#allocation19_spill] sm:$0xff] %v4792_v12  ;;  %v567_v10 = vsub.f32 1.5, %v4792_v12  ;;  %v4807_v9 = vand.u32 2147483647, %v442_v11  ;;  %v4829_v11 = vmul.f32 %v4790_v38, %v4790_v38 }
  0x9a   :  { %v4850_v45 = vand.u32 2147483647, %v445_v40  ;;  %v632_v58 = vmax.f32 %v568_v5, 0.0 }
  0x9b   :  { %1128 = vperm.xlu1 %4221, %v4475_v14   ;;  %1132 = vperm.xlu0 %4220, %v4470_v13   ;;  %v569_v13 = vsub.f32 1.5, %v4790_v38  ;;  %9140 = vst [vmem:[#allocation20_spill] sm:$0xff] %v4807_v9  ;;  %v631_v39 = vmax.f32 %v567_v10, 0.0  ;;  %9144 = vst [vmem:[#allocation24_spill] sm:$0xff] %v4829_v11  ;;  %v4843_v42 = vmul.f32 %v4807_v9, %v4807_v9 }
  0x9c   :  { %9148 = vst [vmem:[#allocation28_spill] sm:$0xff] %v4850_v45  ;;  %v451_v11 = vsub.f32 %v4770_v50, %v4774_v7 }
  0x9d   :  { %v4786_v0 = vpop.permute.xlu1 %202  ;;  %v4788_v2 = vpop.permute.xlu0 %197  ;;  %v633_v51 = vmax.f32 %v569_v13, 0.0  ;;  %v572_v13 = vsub.f32 1.5, %v4816_v54  ;;  %v887_v10 = vmul.f32 0.5, %v631_v39  ;;  %9146 = vst [vmem:[#allocation26_spill] sm:$0xff] %v4843_v42 }
  0x9f   :  { %1136 = vperm.xlu1 %4221, %v4487_v16   ;;  %1140 = vperm.xlu0 %4220, %v4482_v15   ;;  %v636_v40 = vmax.f32 %v572_v13, 0.0  ;;  %v888_v13 = vmul.f32 0.5, %v632_v58 }
  0xa1   :  { %v4798_v35 = vpop.permute.xlu1 %212  ;;  %v4800_v14 = vpop.permute.xlu0 %207 }
  0xa3   :  { %1144 = vperm.xlu1 %4221, %v4499_v18   ;;  %1148 = vperm.xlu0 %4220, %v4494_v17   ;;  %v570_v17 = vsub.f32 1.5, %v4807_v9  ;;  %v4823_v18 = vand.u32 2147483647, %v443_v36  ;;  %v4845_v36 = vand.u32 2147483647, %v446_v53  ;;  %v447_v9 = vsub.f32 %v4748_v4, %v4774_v7 }
  0xa4   :  { %v450_v4 = vsub.f32 %v4757_v3, %v4774_v7  ;;  %v449_v3 = vsub.f32 %v4759_v46, %v4774_v7 }
  0xa5   :  { %v4812_v37 = vpop.permute.xlu1 %222  ;;  %v4814_v52 = vpop.permute.xlu0 %217  ;;  %9143 = vst [vmem:[#allocation23_spill] sm:$0xff] %v4823_v18  ;;  %9147 = vst [vmem:[#allocation27_spill] sm:$0xff] %v4845_v36  ;;  %v634_v38 = vmax.f32 %v570_v17, 0.0  ;;  %v571_v56 = vsub.f32 1.5, %v4823_v18  ;;  %v4866_v17 = vmul.f32 %v4810_v6, %v4810_v6  ;;  %v574_v55 = vsub.f32 1.5, %v4845_v36 }
  0xa6   :  { %v4902_v46 = vand.u32 2147483647, %v450_v4 }
  0xa7   :  { %1152 = vperm.xlu1 %4221, %v4511_v20   ;;  %1156 = vperm.xlu0 %4220, %v4506_v19   ;;  %v889_v20 = vmul.f32 0.5, %v633_v51  ;;  %v4838_v19 = vmul.f32 %v4792_v12, %v4792_v12  ;;  %v448_v12 = vsub.f32 %v4746_v44, %v4774_v7  ;;  %9150 = vst [vmem:[#allocation30_spill] sm:$0xff] %v4866_v17  ;;  %v638_v6 = vmax.f32 %v574_v55, 0.0 }
  0xa8   :  { %v4868_v44 = vmul.f32 %v887_v10, %v631_v39  ;;  %v4881_v39 = vmul.f32 %v4816_v54, %v4816_v54  ;;  %v4883_v10 = vand.u32 2147483647, %v447_v9  ;;  %v4900_v9 = vmul.f32 %v4845_v36, %v4845_v36  ;;  %9157 = vst [vmem:[#allocation37_spill] sm:$0xff] %v4902_v46 }
  0xa9   :  { %v4832_v34 = vpop.permute.xlu1 %232  ;;  %v4834_v41 = vpop.permute.xlu0 %227  ;;  %9145 = vst [vmem:[#allocation25_spill] sm:$0xff] %v4838_v19  ;;  %v4877_v19 = vand.u32 2147483647, %v448_v12  ;;  %v4894_v12 = vmul.f32 %v4823_v18, %v4823_v18  ;;  %v4911_v55 = vmul.f32 %v888_v13, %v632_v58  ;;  %v4915_v18 = vand.u32 2147483647, %v449_v3 }
  0xaa   :  { %9151 = vst [vmem:[#allocation31_spill] sm:$0xff] %v4868_v44  ;;  %9153 = vst [vmem:[#allocation33_spill] sm:$0xff] %v4881_v39  ;;  %v452_v44 = vsub.f32 %v4768_v49, %v4774_v7  ;;  %v575_v4 = vsub.f32 1.5, %v4883_v10  ;;  %v578_v13 = vsub.f32 1.5, %v4902_v46  ;;  %v4932_v3 = vand.u32 2147483647, %v451_v11 }
  0xab   :  { %1160 = vperm.xlu1 %4221, %v4523_v22   ;;  %1164 = vperm.xlu0 %4220, %v4518_v21   ;;  %v4861_v22 = vmul.f32 %v889_v20, %v633_v51  ;;  %v890_v51 = vmul.f32 0.5, %v634_v38  ;;  %v635_v20 = vmax.f32 %v571_v56, 0.0  ;;  %v573_v21 = vsub.f32 1.5, %v4850_v45  ;;  %9152 = vst [vmem:[#allocation32_spill] sm:$0xff] %v4877_v19  ;;  %9154 = vst [vmem:[#allocation34_spill] sm:$0xff] %v4883_v10 }
  0xac   :  { %v892_v56 = vmul.f32 0.5, %v636_v40  ;;  %9155 = vst [vmem:[#allocation35_spill] sm:$0xff] %v4894_v12  ;;  %9156 = vst [vmem:[#allocation36_spill] sm:$0xff] %v4900_v9  ;;  %v576_v49 = vsub.f32 1.5, %v4877_v19  ;;  %v4928_v58 = vand.u32 2147483647, %v452_v44  ;;  %v4940_v42 = vmul.f32 %v4877_v19, %v4877_v19 }
  0xad   :  { %v4857_v53 = vpop.permute.xlu1 %242  ;;  %v4859_v16 = vpop.permute.xlu0 %237  ;;  %9149 = vst [vmem:[#allocation29_spill] sm:$0xff] %v4861_v22  ;;  %v891_v17 = vmul.f32 0.5, %v635_v20  ;;  %v637_v22 = vmax.f32 %v573_v21, 0.0  ;;  %9159 = vst [vmem:[#allocation39_spill] sm:$0xff] %v4911_v55  ;;  %v639_v44 = vmax.f32 %v575_v4, 0.0  ;;  %v577_v21 = vsub.f32 1.5, %v4915_v18 }
  0xae   :  { %9160 = vst [vmem:[#allocation40_spill] sm:$0xff] %v4915_v18  ;;  %9163 = vst [vmem:[#allocation43_spill] sm:$0xff] %v4928_v58  ;;  %v453_v55 = vsub.f32 %v4780_v43, %v4774_v7  ;;  %v456_v11 = vsub.f32 %v4786_v0, %v4774_v7  ;;  %v4958_v4 = vsub.s32 1, %v4750_v1  ;;  %v642_v43 = vmax.f32 %v578_v13, 0.0 }
  0xaf   :  { %1168 = vperm.xlu1 %4221, %v4535_v24   ;;  %1172 = vperm.xlu0 %4220, %v4530_v23   ;;  %v4908_v23 = vmul.f32 %v890_v51, %v634_v38  ;;  %v4926_v38 = vmul.f32 %v4850_v45, %v4850_v45  ;;  %v894_v51 = vmul.f32 0.5, %v638_v6  ;;  %9164 = vst [vmem:[#allocation44_spill] sm:$0xff] %v4932_v3  ;;  %9166 = vst [vmem:[#allocation46_spill] sm:$0xff] %v4940_v42 }
  0xb0   :  { %9168 = vst [vmem:[#allocation48_spill] sm:$0xff] %v4958_v4  ;;  %v579_v0 = vsub.f32 1.5, %v4932_v3  ;;  %v454_v12 = vsub.f32 %v4778_v8, %v4774_v7  ;;  %v4974_v13 = vand.u32 2147483647, %v453_v55  ;;  %v898_v9 = vmul.f32 0.5, %v642_v43 }
  0xb1   :  { %v4887_v5 = vpop.permute.xlu1 %252  ;;  %v4889_v24 = vpop.permute.xlu0 %247  ;;  %9158 = vst [vmem:[#allocation38_spill] sm:$0xff] %v4908_v23  ;;  %9162 = vst [vmem:[#allocation42_spill] sm:$0xff] %v4926_v38  ;;  %v4960_v23 = vmul.f32 %v894_v51, %v638_v6  ;;  %v895_v6 = vmul.f32 0.5, %v639_v44  ;;  %v641_v51 = vmax.f32 %v577_v21, 0.0  ;;  %v4976_v38 = vand.u32 2147483647, %v456_v11 }
  0xb2   :  { %v4991_v55 = vmul.f32 %v4928_v58, %v4928_v58  ;;  %v643_v21 = vmax.f32 %v579_v0, 0.0  ;;  %v4993_v11 = vand.u32 2147483647, %v454_v12  ;;  %v581_v12 = vsub.f32 1.5, %v4974_v13 }
  0xb3   :  { %1176 = vperm.xlu1 %4221, %v4547_v26   ;;  %1180 = vperm.xlu0 %4220, %v4542_v25   ;;  %v4921_v26 = vmul.f32 %v892_v56, %v636_v40  ;;  %v4936_v40 = vmul.f32 %v891_v17, %v635_v20  ;;  %v893_v56 = vmul.f32 0.5, %v637_v22  ;;  %v640_v25 = vmax.f32 %v576_v49, 0.0  ;;  %9169 = vst [vmem:[#allocation49_spill] sm:$0xff] %v4960_v23 }
  0xb4   :  { %v4954_v20 = vmul.f32 %v4883_v10, %v4883_v10  ;;  %v580_v49 = vsub.f32 1.5, %v4928_v58  ;;  %9172 = vst [vmem:[#allocation52_spill] sm:$0xff] %v4976_v38  ;;  %9174 = vst [vmem:[#allocation54_spill] sm:$0xff] %v4991_v55  ;;  %v5004_v45 = vmul.f32 %v895_v6, %v639_v44  ;;  %v897_v36 = vmul.f32 0.5, %v641_v51  ;;  %v9243_v58 = vld [vmem:[#allocation10_spill] sm:$0xff] }
  0xb5   :  { %v4917_v54 = vpop.permute.xlu1 %262  ;;  %v4919_v50 = vpop.permute.xlu0 %257  ;;  %9161 = vst [vmem:[#allocation41_spill] sm:$0xff] %v4921_v26  ;;  %9165 = vst [vmem:[#allocation45_spill] sm:$0xff] %v4936_v40  ;;  %v4967_v17 = vmul.f32 %v893_v56, %v637_v22  ;;  %v896_v39 = vmul.f32 0.5, %v640_v25  ;;  %v4972_v26 = vmul.f32 %v4902_v46, %v4902_v46  ;;  %v4985_v56 = vmul.f32 %v4915_v18, %v4915_v18 }
  0xb6   :  { %9167 = vst [vmem:[#allocation47_spill] sm:$0xff] %v4954_v20  ;;  %v644_v40 = vmax.f32 %v580_v49, 0.0  ;;  %v458_v49 = vsub.f32 %v4798_v35, %v4774_v7  ;;  %9176 = vst [vmem:[#allocation56_spill] sm:$0xff] %v5004_v45  ;;  %v584_v0 = vsub.f32 1.5, %v4976_v38  ;;  %v5015_v35 = vmul.f32 %v4932_v3, %v4932_v3 }
  0xb7   :  { %1184 = vperm.xlu1 %4221, %v4559_v28   ;;  %1188 = vperm.xlu0 %4220, %v4554_v27   ;;  %9170 = vst [vmem:[#allocation50_spill] sm:$0xff] %v4967_v17  ;;  %9171 = vst [vmem:[#allocation51_spill] sm:$0xff] %v4972_v26  ;;  %v455_v17 = vsub.f32 %v4788_v2, %v4774_v7  ;;  %v4997_v22 = vmul.f32 %v896_v39, %v640_v25  ;;  %v899_v6 = vmul.f32 0.5, %v643_v21 }
  0xb8   :  { %9173 = vst [vmem:[#allocation53_spill] sm:$0xff] %v4985_v56  ;;  %v457_v2 = vsub.f32 %v4800_v14, %v4774_v7  ;;  %v900_v25 = vmul.f32 0.5, %v644_v40  ;;  %9177 = vst [vmem:[#allocation57_spill] sm:$0xff] %v5015_v35  ;;  %v5019_v14 = vmul.f32 %v898_v9, %v642_v43  ;;  %v582_v45 = vsub.f32 1.5, %v4993_v11 }
  0xb9   :  { %v4947_v28 = vpop.permute.xlu1 %272  ;;  %v4949_v27 = vpop.permute.xlu0 %267  ;;  %9175 = vst [vmem:[#allocation55_spill] sm:$0xff] %v4997_v22  ;;  %v5017_v23 = vand.u32 2147483647, %v455_v17  ;;  %v5027_v39 = vmul.f32 %v4993_v11, %v4993_v11  ;;  %v5029_v22 = vand.u32 2147483647, %v458_v49  ;;  %v460_v9 = vsub.f32 %v4812_v37, %v4774_v7 }
  0xba   :  { %9179 = vst [vmem:[#allocation59_spill] sm:$0xff] %v5019_v14  ;;  %v5031_v10 = vand.u32 2147483647, %v457_v2  ;;  %v5035_v17 = vmul.f32 %v897_v36, %v641_v51  ;;  %v645_v43 = vmax.f32 %v581_v12, 0.0  ;;  %v648_v44 = vmax.f32 %v584_v0, 0.0 }
  0xbb   :  { %1192 = vperm.xlu1 %4221, %v4571_v30   ;;  %1196 = vperm.xlu0 %4220, %v4566_v29   ;;  %9178 = vst [vmem:[#allocation58_spill] sm:$0xff] %v5017_v23  ;;  %9180 = vst [vmem:[#allocation60_spill] sm:$0xff] %v5029_v22  ;;  %v5043_v18 = vmul.f32 %v900_v25, %v644_v40  ;;  %v5048_v2 = vmul.f32 %v4974_v13, %v4974_v13  ;;  %v583_v37 = vsub.f32 1.5, %v5017_v23  ;;  %v8815_v40 = vmov 2  }
  0xbc   :  { %9181 = vst [vmem:[#allocation61_spill] sm:$0xff] %v5031_v10  ;;  %9182 = vst [vmem:[#allocation62_spill] sm:$0xff] %v5035_v17  ;;  %v5051_v36 = vmul.f32 %v899_v6, %v643_v21  ;;  %v5053_v51 = vmax.f32 %v582_v45, 0.0  ;;  %v461_v12 = vsub.f32 %v4834_v41, %v4774_v7  ;;  %v586_v25 = vsub.f32 1.5, %v5029_v22 }
  0xbd   :  { %v4978_v8 = vpop.permute.xlu1 %282  ;;  %v4980_v30 = vpop.permute.xlu0 %277  ;;  %9183 = vst [vmem:[#allocation63_spill] sm:$0xff] %v5043_v18  ;;  %9184 = vst [vmem:[#allocation64_spill] sm:$0xff] %v5048_v2  ;;  %v585_v21 = vsub.f32 1.5, %v5031_v10  ;;  %v5064_v6 = vand.u32 2147483647, %v460_v9  ;;  %v901_v45 = vmul.f32 0.5, %v645_v43  ;;  %v5080_v9 = vmul.f32 %v5017_v23, %v5017_v23 }
  0xbe   :  { %9185 = vst [vmem:[#allocation65_spill] sm:$0xff] %v5051_v36  ;;  %v904_v41 = vmul.f32 0.5, %v648_v44  ;;  %v647_v17 = vmax.f32 %v583_v37, 0.0  ;;  %v5091_v26 = vand.u32 2147483647, %v461_v12  ;;  %v464_v14 = vsub.f32 %v4857_v53, %v4774_v7 }
  0xbf   :  { %1200 = vperm.xlu1 %4221, %v4583_v32   ;;  %1204 = vperm.xlu0 %4220, %v4578_v31   ;;  %9186 = vst [vmem:[#allocation66_spill] sm:$0xff] %v5064_v6  ;;  %9189 = vst [vmem:[#allocation69_spill] sm:$0xff] %v5080_v9  ;;  %v650_v37 = vmax.f32 %v586_v25, 0.0  ;;  %v649_v0 = vmax.f32 %v585_v21, 0.0  ;;  %v588_v23 = vsub.f32 1.5, %v5064_v6  ;;  %v5100_v46 = vmul.f32 %v901_v45, %v645_v43 }
  0xc0   :  { %9192 = vst [vmem:[#allocation72_spill] sm:$0xff] %v5091_v26  ;;  %v5103_v12 = vmul.f32 %v904_v41, %v648_v44  ;;  %v903_v21 = vmul.f32 0.5, %v647_v17  ;;  %v589_v44 = vsub.f32 1.5, %v5091_v26  ;;  %v5118_v43 = vand.u32 2147483647, %v464_v14 }
  0xc1   :  { %v5008_v20 = vpop.permute.xlu1 %292  ;;  %v5010_v42 = vpop.permute.xlu0 %287  ;;  %9193 = vst [vmem:[#allocation73_spill] sm:$0xff] %v5100_v46  ;;  %v466_v45 = vsub.f32 %v4887_v5, %v4774_v7  ;;  %v906_v41 = vmul.f32 0.5, %v650_v37  ;;  %v905_v25 = vmul.f32 0.5, %v649_v0  ;;  %v5128_v36 = vmul.f32 %v5064_v6, %v5064_v6 }
  0xc2   :  { %9194 = vst [vmem:[#allocation74_spill] sm:$0xff] %v5103_v12  ;;  %9196 = vst [vmem:[#allocation76_spill] sm:$0xff] %v5118_v43  ;;  %v465_v5 = vsub.f32 %v4889_v24, %v4774_v7  ;;  %vm710_vm4 = vcmp.lt.f32.partialorder %v4993_v11, 0.5  ;;  %vm709_vm8 = vcmp.lt.f32.partialorder %v4974_v13, 0.5 }
  0xc3   :  { %1332 = vperm.xlu1 %4221, %v4725_v63   ;;  %1268 = vperm.xlu0 %4220, %v4635_v47   ;;  %v459_v63 = vsub.f32 %v4814_v52, %v4774_v7  ;;  %v462_v52 = vsub.f32 %v4832_v34, %v4774_v7  ;;  %v5069_v34 = vmul.f32 %v4976_v38, %v4976_v38  ;;  %v5087_v38 = vmul.f32 0.5, %v5053_v51 }
  0xc4   :  { %9198 = vst [vmem:[#allocation78_spill] sm:$0xff] %v5128_v36  ;;  %v5150_v24 = vand.u32 2147483647, %v466_v45  ;;  %v5153_v6 = vmul.f32 %v906_v41, %v650_v37  ;;  %v5171_v37 = vmul.f32 %v5091_v26, %v5091_v26  ;;  %v467_v41 = vsub.f32 %v4919_v50, %v4774_v7 }
  0xc5   :  { %v5039_v19 = vpop.permute.xlu1 %302  ;;  %v5041_v56 = vpop.permute.xlu0 %297  ;;  %9187 = vst [vmem:[#allocation67_spill] sm:$0xff] %v5069_v34  ;;  %v5071_v49 = vand.u32 2147483647, %v459_v63  ;;  %v5089_v63 = vand.u32 2147483647, %v462_v52  ;;  %v652_v52 = vmax.f32 %v588_v23, 0.0  ;;  %v5140_v23 = vmul.f32 %v903_v21, %v647_v17 }
  0xc6   :  { %9202 = vst [vmem:[#allocation82_spill] sm:$0xff] %v5150_v24  ;;  %9203 = vst [vmem:[#allocation83_spill] sm:$0xff] %v5153_v6  ;;  %v5155_v17 = vmul.f32 %v905_v25, %v649_v0  ;;  %v470_v0 = vsub.f32 %v4947_v28, %v4774_v7  ;;  %v5187_v36 = vmul.f32 %v5118_v43, %v5118_v43  ;;  %v5205_v26 = vand.u32 2147483647, %v467_v41 }
  0xc7   :  { %4222 = vset.pattern.permute.xlu1 %v8815_v40  ;;  %1328 = vperm.xlu0 %4220, %v4730_v33   ;;  %9188 = vst [vmem:[#allocation68_spill] sm:$0xff] %v5071_v49  ;;  %9191 = vst [vmem:[#allocation71_spill] sm:$0xff] %v5089_v63  ;;  %v587_v35 = vsub.f32 1.5, %v5071_v49  ;;  %v5132_v14 = vmul.f32 %v5071_v49, %v5071_v49  ;;  %v592_v49 = vsub.f32 1.5, %v5118_v43  ;;  %v908_v21 = vmul.f32 0.5, %v652_v52 }
  0xc8   :  { %2168 = vperm.xlu1 %4222, %v4578_v31   ;;  %v5084_v31 = vmul.f32 %v5029_v22, %v5029_v22  ;;  %v463_v22 = vsub.f32 %v4859_v16, %v4774_v7  ;;  %v590_v16 = vsub.f32 1.5, %v5089_v63  ;;  %9200 = vst [vmem:[#allocation80_spill] sm:$0xff] %v5140_v23  ;;  %9204 = vst [vmem:[#allocation84_spill] sm:$0xff] %v5155_v17  ;;  %v9205_v23 = vmov 1  }
  0xc9   :  { %v5073_v40 = vpop.permute.xlu1 %312  ;;  %v5075_v33 = vpop.permute.xlu0 %307  ;;  %v651_v34 = vmax.f32 %v587_v35, 0.0  ;;  %9199 = vst [vmem:[#allocation79_spill] sm:$0xff] %v5132_v14  ;;  %v468_v35 = vsub.f32 %v4917_v54, %v4774_v7  ;;  %9207 = vst [vmem:[#allocation86_spill] sm:$0xff] %v5171_v37  ;;  %v594_v17 = vsub.f32 1.5, %v5150_v24  ;;  %v5179_v6 = vmul.f32 %v908_v21, %v652_v52 }
  0xca   :  { %9190 = vst [vmem:[#allocation70_spill] sm:$0xff] %v5084_v31  ;;  %v5123_v9 = vand.u32 2147483647, %v463_v22  ;;  %v5145_v22 = vmul.f32 %v5089_v63, %v5089_v63  ;;  %v653_v31 = vmax.f32 %v589_v44, 0.0  ;;  %v5161_v44 = vand.u32 2147483647, %v465_v5 }
  0xcb   :  { %1324 = vperm.xlu0 %4220, %v4713_v61   ;;  %v5173_v25 = vand.u32 2147483647, %v468_v35  ;;  %9209 = vst [vmem:[#allocation88_spill] sm:$0xff] %v5179_v6  ;;  %v469_v35 = vsub.f32 %v4949_v27, %v4774_v7  ;;  %9210 = vst [vmem:[#allocation89_spill] sm:$0xff] %v5187_v36 }
  0xcc   :  { %2104 = vperm.xlu1 %4222, %v4482_v15   ;;  %v5114_v15 = vmul.f32 %v5031_v10, %v5031_v10  ;;  %9197 = vst [vmem:[#allocation77_spill] sm:$0xff] %v5123_v9  ;;  %9201 = vst [vmem:[#allocation81_spill] sm:$0xff] %v5145_v22  ;;  %v654_v10 = vmax.f32 %v590_v16, 0.0  ;;  %v907_v16 = vmul.f32 0.5, %v651_v34  ;;  %v909_v5 = vmul.f32 0.5, %v653_v31 }
  0xcd   :  { %v5106_v53 = vpop.permute.xlu1 %322  ;;  %v5108_v61 = vpop.permute.xlu0 %317  ;;  %9206 = vst [vmem:[#allocation85_spill] sm:$0xff] %v5161_v44  ;;  %9208 = vst [vmem:[#allocation87_spill] sm:$0xff] %v5173_v25  ;;  %v5191_v50 = vmul.f32 %v5123_v9, %v5123_v9  ;;  %v596_v6 = vsub.f32 1.5, %v5173_v25  ;;  %v5219_v21 = vand.u32 2147483647, %v469_v35  ;;  %v474_v35 = vsub.f32 %v5008_v20, %v4774_v7 }
  0xce   :  { %9195 = vst [vmem:[#allocation75_spill] sm:$0xff] %v5114_v15  ;;  %v910_v54 = vmul.f32 0.5, %v654_v10  ;;  %v656_v15 = vmax.f32 %v592_v49, 0.0  ;;  %v593_v49 = vsub.f32 1.5, %v5161_v44  ;;  %v5201_v27 = vmul.f32 %v907_v16, %v651_v34  ;;  %9214 = vst [vmem:[#allocation92_spill] sm:$0xff] %v5205_v26 }
  0xcf   :  { %1320 = vperm.xlu0 %4220, %v4718_v62   ;;  %9211 = vst [vmem:[#allocation90_spill] sm:$0xff] %v5191_v50  ;;  %v5210_v63 = vmul.f32 %v909_v5, %v653_v31  ;;  %v5215_v34 = vmul.f32 %v5150_v24, %v5150_v24  ;;  %v5217_v16 = vand.u32 2147483647, %v470_v0  ;;  %v595_v5 = vsub.f32 1.5, %v5205_v26 }
  0xd0   :  { %2232 = vperm.xlu1 %4222, %v4635_v47   ;;  %v591_v47 = vsub.f32 1.5, %v5123_v9  ;;  %9213 = vst [vmem:[#allocation91_spill] sm:$0xff] %v5201_v27  ;;  %v5208_v22 = vmul.f32 %v910_v54, %v654_v10  ;;  %v658_v9 = vmax.f32 %v594_v17, 0.0  ;;  %v657_v10 = vmax.f32 %v593_v49, 0.0  ;;  %v9219_v27 = vld [vmem:[#allocation6_spill] sm:$0xff] }
  0xd1   :  { %v5136_v62 = vpop.permute.xlu1 %332  ;;  %v5138_v12 = vpop.permute.xlu0 %327  ;;  %9216 = vst [vmem:[#allocation94_spill] sm:$0xff] %v5210_v63  ;;  %9217 = vst [vmem:[#allocation95_spill] sm:$0xff] %v5215_v34  ;;  %v471_v0 = vsub.f32 %v4980_v30, %v4774_v7  ;;  %v598_v20 = vsub.f32 1.5, %v5217_v16  ;;  %v473_v63 = vsub.f32 %v5010_v42, %v4774_v7  ;;  %vm726_vm2 = vcmp.lt.f32.partialorder %v5217_v16, 0.5 }
  0xd2   :  { %v655_v14 = vmax.f32 %v591_v47, 0.0  ;;  %v9212_v47 = vmov 2   ;;  %9215 = vst [vmem:[#allocation93_spill] sm:$0xff] %v5208_v22  ;;  %v914_v49 = vmul.f32 0.5, %v658_v9  ;;  %v476_v22 = vsub.f32 %v5039_v19, %v4774_v7 }
  0xd3   :  { %1316 = vperm.xlu0 %4220, %v4701_v59   ;;  %v5260_v30 = vand.u32 2147483647, %v471_v0  ;;  %v5271_v19 = vmul.f32 %v5205_v26, %v5205_v26  ;;  %v5274_v34 = vmax.f32 %v598_v20, 0.0  ;;  %vm725_vm5 = vcmp.lt.f32.partialorder %v5219_v21, 0.5 }
  0xd4   :  { %4223 = vset.pattern.permute.xlu1 %v9205_v23  ;;  %v911_v43 = vmul.f32 0.5, %v655_v14  ;;  %v5265_v36 = vmul.f32 %v914_v49, %v658_v9  ;;  %v5284_v49 = vand.u32 2147483647, %v473_v63  ;;  %v5300_v63 = vmul.f32 %v5219_v21, %v5219_v21 }
  0xd5   :  { %v5163_v45 = vpop.permute.xlu1 %342  ;;  %1264 = vperm.xlu1 %4223, %v4640_v48   ;;  %v5166_v59 = vpop.permute.xlu0 %337  ;;  %9225 = vst [vmem:[#allocation99_spill] sm:$0xff] %v5260_v30  ;;  %9228 = vst [vmem:[#allocation102_spill] sm:$0xff] %v5271_v19 }
  0xd6   :  { %v5246_v37 = vmul.f32 %v911_v43, %v655_v14  ;;  %v659_v14 = vmax.f32 %v595_v5, 0.0  ;;  %9227 = vst [vmem:[#allocation101_spill] sm:$0xff] %v5265_v36  ;;  %v5278_v5 = vmul.f32 %v5217_v16, %v5217_v16  ;;  %9231 = vst [vmem:[#allocation103_spill] sm:$0xff] %v5284_v49  ;;  %v599_v36 = vsub.f32 1.5, %v5260_v30 }
  0xd7   :  { %1312 = vperm.xlu0 %4220, %v4706_v60   ;;  %v472_v60 = vsub.f32 %v4978_v8, %v4774_v7  ;;  %v912_v8 = vmul.f32 0.5, %v656_v15  ;;  %9234 = vst [vmem:[#allocation106_spill] sm:$0xff] %v5300_v63  ;;  %v601_v19 = vsub.f32 1.5, %v5284_v49 }
  0xd8   :  { %v663_v26 = vmax.f32 %v599_v36, 0.0 }
  0xd9   :  { %v5196_v52 = vpop.permute.xlu1 %352  ;;  %4224 = vset.pattern.permute.xlu1 %v9212_v47  ;;  %v5199_v28 = vpop.permute.xlu0 %347  ;;  %v5223_v31 = vand.u32 2147483647, %v472_v60  ;;  %v5235_v41 = vmul.f32 %v912_v8, %v656_v15  ;;  %v5239_v60 = vmul.f32 %v5161_v44, %v5161_v44  ;;  %v597_v15 = vsub.f32 1.5, %v5219_v21  ;;  %v9229_v44 = vld [vmem:[#allocation12_spill] sm:$0xff] }
  0xda   :  { %2164 = vperm.xlu1 %4224, %v4583_v32   ;;  %v9223_v32 = vld [vmem:[#allocation14_spill] sm:$0xff] }
  0xdb   :  { %1308 = vperm.xlu0 %4220, %v4689_v57   ;;  %9218 = vst [vmem:[#allocation96_spill] sm:$0xff] %v5223_v31  ;;  %v660_v57 = vmax.f32 %v596_v6, 0.0  ;;  %9220 = vst [vmem:[#allocation6_spill] sm:$0xff] %v5235_v41  ;;  %v5243_v6 = vmul.f32 %v5173_v25, %v5173_v25  ;;  %v600_v8 = vsub.f32 1.5, %v5223_v31  ;;  %v661_v0 = vmax.f32 %v597_v15, 0.0 }
  0xdc   :  { %9221 = vst [vmem:[#allocation97_spill] sm:$0xff] %v5239_v60  ;;  %9224 = vst [vmem:[#allocation14_spill] sm:$0xff] %v5246_v37  ;;  %v5262_v37 = vand.u32 2147483647, %v474_v35  ;;  %v5286_v41 = vand.u32 2147483647, %v476_v22  ;;  %v478_v22 = vsub.f32 %v5073_v40, %v4774_v7  ;;  %v5316_v24 = vmul.f32 %v5223_v31, %v5223_v31 }
  0xdd   :  { %v5225_v54 = vpop.permute.xlu1 %362  ;;  %v5227_v17 = vpop.permute.xlu0 %357  ;;  %9222 = vst [vmem:[#allocation98_spill] sm:$0xff] %v5243_v6  ;;  %v916_v43 = vmul.f32 0.5, %v660_v57  ;;  %v664_v35 = vmax.f32 %v600_v8, 0.0  ;;  %v915_v60 = vmul.f32 0.5, %v659_v14  ;;  %v5331_v31 = vmul.f32 %v5260_v30, %v5260_v30 }
  0xde   :  { %2100 = vperm.xlu1 %4224, %v9219_v27   ;;  %v913_v27 = vmul.f32 0.5, %v657_v10  ;;  %9226 = vst [vmem:[#allocation100_spill] sm:$0xff] %v5262_v37  ;;  %9232 = vst [vmem:[#allocation104_spill] sm:$0xff] %v5286_v41  ;;  %v602_v15 = vsub.f32 1.5, %v5262_v37  ;;  %v5333_v6 = vand.u32 2147483647, %v478_v22  ;;  %v5343_v36 = vmul.f32 %v5262_v37, %v5262_v37 }
  0xdf   :  { %1304 = vperm.xlu0 %4220, %v9223_v32   ;;  %v5292_v20 = vmul.f32 %v916_v43, %v660_v57  ;;  %v9235_v57 = vld [vmem:[#allocation7_spill] sm:$0xff]  ;;  %v5310_v43 = vmul.f32 0.5, %v5274_v34  ;;  %v920_v40 = vmul.f32 0.5, %v664_v35  ;;  %v5324_v8 = vmul.f32 %v915_v60, %v659_v14  ;;  %9240 = vst [vmem:[#allocation108_spill] sm:$0xff] %v5331_v31 }
  0xe0   :  { %v5282_v9 = vmul.f32 %v913_v27, %v657_v10  ;;  %v477_v10 = vsub.f32 %v5075_v33, %v4774_v7  ;;  %v9236_v27 = vld [vmem:[#allocation13_spill] sm:$0xff]  ;;  %v604_v33 = vsub.f32 1.5, %v5286_v41  ;;  %v666_v55 = vmax.f32 %v602_v15, 0.0  ;;  %9241 = vst [vmem:[#allocation109_spill] sm:$0xff] %v5333_v6  ;;  %9244 = vst [vmem:[#allocation10_spill] sm:$0xff] %v5343_v36 }
  0xe1   :  { %v5256_v50 = vpop.permute.xlu1 %372  ;;  %v5258_v32 = vpop.permute.xlu0 %367  ;;  %9233 = vst [vmem:[#allocation105_spill] sm:$0xff] %v5292_v20  ;;  %9238 = vst [vmem:[#allocation13_spill] sm:$0xff] %v5316_v24  ;;  %v479_v14 = vsub.f32 %v5108_v61, %v4774_v7  ;;  %v5350_v22 = vmul.f32 %v920_v40, %v664_v35  ;;  %v5358_v37 = vmul.f32 %v5284_v49, %v5284_v49  ;;  %v606_v61 = vsub.f32 1.5, %v5333_v6  ;;  %v9248_v40 = vld [vmem:[#allocation11_spill] sm:$0xff]  ;;  %v9263_v36 = vld [vmem:[#allocation9_spill] sm:$0xff] }
  0xe2   :  { %2228 = vperm.xlu1 %4224, %v4640_v48   ;;  %v475_v48 = vsub.f32 %v5041_v56, %v4774_v7  ;;  %9230 = vst [vmem:[#allocation12_spill] sm:$0xff] %v5282_v9  ;;  %v917_v56 = vmul.f32 0.5, %v661_v0  ;;  %9239 = vst [vmem:[#allocation107_spill] sm:$0xff] %v5324_v8  ;;  %v5335_v20 = vand.u32 2147483647, %v477_v10  ;;  %v665_v10 = vmax.f32 %v601_v19, 0.0 }
  0xe3   :  { %1300 = vperm.xlu0 %4220, %v9229_v44   ;;  %9245 = vst [vmem:[#allocation111_spill] sm:$0xff] %v5350_v22  ;;  %v668_v18 = vmax.f32 %v604_v33, 0.0  ;;  %v922_v30 = vmul.f32 0.5, %v666_v55  ;;  %9246 = vst [vmem:[#allocation112_spill] sm:$0xff] %v5358_v37  ;;  %v482_v19 = vsub.f32 %v5136_v62, %v4774_v7  ;;  %v5371_v15 = vmul.f32 %v5286_v41, %v5286_v41 }
  0xe4   :  { %v5312_v9 = vand.u32 2147483647, %v475_v48  ;;  %v480_v48 = vsub.f32 %v5106_v53, %v4774_v7  ;;  %9242 = vst [vmem:[#allocation110_spill] sm:$0xff] %v5335_v20  ;;  %v5339_v60 = vmul.f32 %v917_v56, %v661_v0  ;;  %v919_v56 = vmul.f32 0.5, %v663_v26 }
  0xe5   :  { %v5288_v42 = vpop.permute.xlu1 %382  ;;  %v5290_v44 = vpop.permute.xlu0 %377  ;;  %v605_v35 = vsub.f32 1.5, %v5335_v20  ;;  %9249 = vst [vmem:[#allocation11_spill] sm:$0xff] %v5371_v15  ;;  %v921_v31 = vmul.f32 0.5, %v665_v10  ;;  %v924_v22 = vmul.f32 0.5, %v668_v18  ;;  %v670_v41 = vmax.f32 %v606_v61, 0.0 }
  0xe6   :  { %4225 = vset.pattern.permute.xlu1 %v9205_v23  ;;  %9237 = vst [vmem:[#allocation7_spill] sm:$0xff] %v5312_v9  ;;  %v603_v53 = vsub.f32 1.5, %v5312_v9  ;;  %v5360_v8 = vand.u32 2147483647, %v480_v48  ;;  %v5373_v48 = vand.u32 2147483647, %v479_v14  ;;  %v5380_v62 = vmul.f32 %v5312_v9, %v5312_v9 }
  0xe7   :  { %1260 = vperm.xlu1 %4225, %v9235_v57   ;;  %1296 = vperm.xlu0 %4220, %v9236_v27   ;;  %v5390_v14 = vmul.f32 %v922_v30, %v666_v55  ;;  %v669_v25 = vmax.f32 %v605_v35, 0.0  ;;  %v5394_v2 = vand.u32 2147483647, %v482_v19  ;;  %v484_v9 = vsub.f32 %v5163_v45, %v4774_v7 }
  0xe8   :  { %9247 = vst [vmem:[#allocation113_spill] sm:$0xff] %v5360_v8  ;;  %v667_v24 = vmax.f32 %v603_v53, 0.0  ;;  %9250 = vst [vmem:[#allocation114_spill] sm:$0xff] %v5373_v48  ;;  %v5388_v53 = vmul.f32 %v919_v56, %v663_v26  ;;  %v607_v26 = vsub.f32 1.5, %v5373_v48  ;;  %v483_v55 = vsub.f32 %v5166_v59, %v4774_v7 }
  0xe9   :  { %v5320_v3 = vpop.permute.xlu1 %392  ;;  %v5322_v27 = vpop.permute.xlu0 %387  ;;  %9251 = vst [vmem:[#allocation115_spill] sm:$0xff] %v5380_v62  ;;  %9253 = vst [vmem:[#allocation117_spill] sm:$0xff] %v5390_v14  ;;  %v5404_v30 = vmul.f32 %v921_v31, %v665_v10  ;;  %v5406_v56 = vmul.f32 %v924_v22, %v668_v18  ;;  %v5421_v59 = vmul.f32 %v5335_v20, %v5335_v20  ;;  %v925_v22 = vmul.f32 0.5, %v669_v25 }
  0xea   :  { %9252 = vst [vmem:[#allocation116_spill] sm:$0xff] %v5388_v53  ;;  %9254 = vst [vmem:[#allocation118_spill] sm:$0xff] %v5394_v2  ;;  %v923_v63 = vmul.f32 0.5, %v667_v24  ;;  %v5425_v18 = vmul.f32 %v5360_v8, %v5360_v8  ;;  %v610_v10 = vsub.f32 1.5, %v5394_v2  ;;  %v671_v46 = vmax.f32 %v607_v26, 0.0 }
  0xeb   :  { %4226 = vset.pattern.permute.xlu1 %v9212_v47  ;;  %1292 = vperm.xlu0 %4220, %v9243_v58   ;;  %9257 = vst [vmem:[#allocation119_spill] sm:$0xff] %v5406_v56  ;;  %9260 = vst [vmem:[#allocation122_spill] sm:$0xff] %v5421_v59  ;;  %v5433_v53 = vand.u32 2147483647, %v483_v55  ;;  %v5440_v37 = vmul.f32 %v5373_v48, %v5373_v48  ;;  %v5468_v56 = vld [vmem:[%s8761_s6 + $0x188] sm:$0xff]  ;;  %v5473_v55 = vmul.f32 %v5394_v2, %v5394_v2 }
  0xec   :  { %2160 = vperm.xlu1 %4226, %v4566_v29   ;;  %v4262_v29 = vld [vmem:[%s8761_s6 + $0x68] sm:$0xff]  ;;  %9261 = vst [vmem:[#allocation123_spill] sm:$0xff] %v5425_v18  ;;  %v5431_v61 = vmul.f32 %v923_v63, %v667_v24  ;;  %v488_v24 = vsub.f32 %v5225_v54, %v4774_v7  ;;  %v5462_v54 = vmul.f32 %v925_v22, %v669_v25  ;;  %v927_v26 = vmul.f32 0.5, %v671_v46 }
  0xed   :  { %v5352_v58 = vpop.permute.xlu1 %402  ;;  %v5354_v0 = vpop.permute.xlu0 %397  ;;  %9265 = vst [vmem:[#allocation125_spill] sm:$0xff] %v5433_v53  ;;  %9266 = vst [vmem:[#allocation126_spill] sm:$0xff] %v5440_v37  ;;  %v487_v20 = vsub.f32 %v5227_v17, %v4774_v7  ;;  %v489_v17 = vsub.f32 %v5258_v32, %v4774_v7  ;;  %v492_v32 = vsub.f32 %v5288_v42, %v4774_v7 }
  0xee   :  { %9264 = vst [vmem:[#allocation9_spill] sm:$0xff] %v5431_v61  ;;  %9268 = vst [vmem:[#allocation128_spill] sm:$0xff] %v5462_v54  ;;  %v674_v61 = vmax.f32 %v610_v10, 0.0 }
  0xef   :  { %1288 = vperm.xlu0 %4220, %v9248_v40   ;;  %v481_v40 = vsub.f32 %v5138_v12, %v4774_v7  ;;  %v9255_v12 = vld [vmem:[#allocation8_spill] sm:$0xff]  ;;  %9269 = vst [vmem:[#allocation129_spill] sm:$0xff] %v5473_v55  ;;  %v5556_v55 = vand.u32 2147483647, %v492_v32  ;;  %v494_v32 = vsub.f32 %v5320_v3, %v4774_v7 }
  0xf0   :  { %2096 = vperm.xlu1 %4226, %v4262_v29   ;;  %v608_v29 = vsub.f32 1.5, %v5360_v8  ;;  %9256 = vst [vmem:[#allocation8_spill] sm:$0xff] %v5404_v30 }
  0xf1   :  { %v5384_v33 = vpop.permute.xlu1 %412  ;;  %v5386_v49 = vpop.permute.xlu0 %407  ;;  %v5409_v35 = vand.u32 2147483647, %v481_v40  ;;  %v5428_v40 = vand.u32 2147483647, %v484_v9  ;;  %v485_v9 = vsub.f32 %v5199_v28, %v4774_v7  ;;  %v5481_v28 = vand.u32 2147483647, %v488_v24 }
  0xf2   :  { %v672_v31 = vmax.f32 %v608_v29, 0.0  ;;  %v486_v29 = vsub.f32 %v5196_v52, %v4774_v7  ;;  %v5452_v52 = vld [vmem:[%s8761_s6 + $0x160] sm:$0xff]  ;;  %9285 = vst [vmem:[#allocation145_spill] sm:$0xff] %v5556_v55  ;;  %v620_v3 = vsub.f32 1.5, %v5556_v55 }
  0xf3   :  { %1284 = vperm.xlu0 %4220, %v9255_v12   ;;  %9258 = vst [vmem:[#allocation120_spill] sm:$0xff] %v5409_v35  ;;  %v5417_v12 = vmul.f32 %v5333_v6, %v5333_v6  ;;  %9262 = vst [vmem:[#allocation124_spill] sm:$0xff] %v5428_v40  ;;  %v609_v30 = vsub.f32 1.5, %v5409_v35  ;;  %v612_v15 = vsub.f32 1.5, %v5428_v40  ;;  %v5479_v10 = vand.u32 2147483647, %v485_v9 }
  0xf4   :  { %2224 = vperm.xlu1 %4226, %v9235_v57   ;;  %v926_v57 = vmul.f32 0.5, %v670_v41  ;;  %v928_v14 = vmul.f32 0.5, %v672_v31  ;;  %9272 = vst [vmem:[#allocation132_spill] sm:$0xff] %v5481_v28  ;;  %v5488_v54 = vmul.f32 %v5409_v35, %v5409_v35  ;;  %v5503_v25 = vmul.f32 %v5428_v40, %v5428_v40 }
  0xf5   :  { %v5411_v45 = vpop.permute.xlu1 %422  ;;  %v5413_v19 = vpop.permute.xlu0 %417  ;;  %9259 = vst [vmem:[#allocation121_spill] sm:$0xff] %v5417_v12  ;;  %v673_v22 = vmax.f32 %v609_v30, 0.0  ;;  %9271 = vst [vmem:[#allocation131_spill] sm:$0xff] %v5479_v10  ;;  %v4265_v30 = vld [vmem:[%s8761_s6 + $0xe0] sm:$0xff]  ;;  %v613_v37 = vsub.f32 1.5, %v5479_v10  ;;  %v616_v48 = vsub.f32 1.5, %v5481_v28  ;;  %v496_v40 = vsub.f32 %v5352_v58, %v4774_v7 }
  0xf6   :  { %v5460_v62 = vmul.f32 %v926_v57, %v670_v41  ;;  %v611_v41 = vsub.f32 1.5, %v5433_v53  ;;  %v5476_v57 = vand.u32 2147483647, %v486_v29  ;;  %v5484_v59 = vmul.f32 %v928_v14, %v672_v31  ;;  %9274 = vst [vmem:[#allocation134_spill] sm:$0xff] %v5488_v54  ;;  %9275 = vst [vmem:[#allocation135_spill] sm:$0xff] %v5503_v25  ;;  %v4271_v58 = vld [vmem:[%s8761_s6 + $0x1e8] sm:$0xff] }
  0xf7   :  { %1280 = vperm.xlu0 %4220, %v9263_v36   ;;  %v490_v29 = vsub.f32 %v5256_v50, %v4774_v7  ;;  %v930_v14 = vmul.f32 0.5, %v674_v61  ;;  %v676_v31 = vmax.f32 %v612_v15, 0.0  ;;  %v5510_v50 = vld [vmem:[%s8761_s6 + $0x180] sm:$0xff]  ;;  %v929_v6 = vmul.f32 0.5, %v673_v22 }
  0xf8   :  { %4227 = vset.pattern.permute.xlu1 %v9205_v23  ;;  %9267 = vst [vmem:[#allocation127_spill] sm:$0xff] %v5460_v62  ;;  %9270 = vst [vmem:[#allocation130_spill] sm:$0xff] %v5476_v57  ;;  %v675_v62 = vmax.f32 %v611_v41, 0.0  ;;  %v614_v15 = vsub.f32 1.5, %v5476_v57  ;;  %v4267_v41 = vld [vmem:[%s8761_s6 + $0x60] sm:$0xff]  ;;  %v5547_v35 = vmul.f32 %v5476_v57, %v5476_v57  ;;  %v680_v18 = vmax.f32 %v616_v48, 0.0 }
  0xf9   :  { %v5447_v63 = vpop.permute.xlu1 %432  ;;  %1256 = vperm.xlu1 %4227, %v5452_v52   ;;  %v5455_v36 = vpop.permute.xlu0 %427  ;;  %9273 = vst [vmem:[#allocation133_spill] sm:$0xff] %v5484_v59  ;;  %v5524_v59 = vmul.f32 %v5433_v53, %v5433_v53  ;;  %v5537_v42 = vmul.f32 %v930_v14, %v674_v61  ;;  %v932_v8 = vmul.f32 0.5, %v676_v31  ;;  %v5540_v54 = vand.u32 2147483647, %v489_v17  ;;  %v4268_v61 = vld [vmem:[%s8761_s6 + $0x1f8] sm:$0xff] }
  0xfa   :  { %9283 = vst [vmem:[#allocation143_spill] sm:$0xff] %v5547_v35  ;;  %v5554_v14 = vmul.f32 %v929_v6, %v673_v22  ;;  %v677_v17 = vmax.f32 %v613_v37, 0.0  ;;  %v5574_v48 = vmul.f32 %v5481_v28, %v5481_v28  ;;  %v936_v28 = vmul.f32 0.5, %v680_v18 }
  0xfb   :  { %1276 = vperm.xlu0 %4220, %v5468_v56   ;;  %9277 = vst [vmem:[#allocation137_spill] sm:$0xff] %v5524_v59  ;;  %9280 = vst [vmem:[#allocation140_spill] sm:$0xff] %v5537_v42  ;;  %v5561_v42 = vmul.f32 %v5479_v10, %v5479_v10  ;;  %v5570_v37 = vmul.f32 %v932_v8, %v676_v31  ;;  %v617_v22 = vsub.f32 1.5, %v5540_v54  ;;  %v4269_v8 = vld [vmem:[%s8761_s6 + $0x1f0] sm:$0xff] }
  0xfc   :  { %9281 = vst [vmem:[#allocation141_spill] sm:$0xff] %v5540_v54  ;;  %9284 = vst [vmem:[#allocation144_spill] sm:$0xff] %v5554_v14  ;;  %v933_v31 = vmul.f32 0.5, %v677_v17 }
  0xfd   :  { %4228 = vset.pattern.permute.xlu1 %v9212_v47  ;;  %9286 = vst [vmem:[#allocation146_spill] sm:$0xff] %v5561_v42  ;;  %9287 = vst [vmem:[#allocation147_spill] sm:$0xff] %v5570_v37  ;;  %v681_v53 = vmax.f32 %v617_v22, 0.0  ;;  %v495_v22 = vsub.f32 %v5354_v0, %v4774_v7  ;;  %v5633_v0 = vmul.f32 %v5540_v54, %v5540_v54 }
  0xfe   :  { %2156 = vperm.xlu1 %4228, %v4265_v30   ;;  %v5497_v9 = vpop.permute.xlu1 %1084  ;;  %v5499_v24 = vpop.permute.xlu0 %1080  ;;  %v5513_v30 = vmul.f32 %v927_v26, %v671_v46  ;;  %v5526_v46 = vand.u32 2147483647, %v487_v20  ;;  %v5528_v26 = vand.u32 2147483647, %v490_v29  ;;  %v931_v20 = vmul.f32 0.5, %v675_v62  ;;  %9288 = vst [vmem:[#allocation148_spill] sm:$0xff] %v5574_v48 }
  0xff   :  { %1272 = vperm.xlu0 %4220, %v5510_v50   ;;  %v5543_v29 = vmax.f32 %v614_v15, 0.0  ;;  %v5626_v37 = vmul.f32 %v933_v31, %v677_v17  ;;  %9297 = vst [vmem:[#allocation157_spill] sm:$0xff] %v5633_v0  ;;  %v5648_v48 = vand.u32 2147483647, %v495_v22  ;;  %v500_v22 = vsub.f32 %v5411_v45, %v4774_v7 }
 0x100   :  { %9276 = vst [vmem:[#allocation136_spill] sm:$0xff] %v5513_v30  ;;  %9278 = vst [vmem:[#allocation138_spill] sm:$0xff] %v5526_v46  ;;  %v615_v2 = vsub.f32 1.5, %v5526_v46  ;;  %v5592_v59 = vmul.f32 %v5526_v46, %v5526_v46  ;;  %v5604_v46 = vand.u32 2147483647, %v494_v32  ;;  %v498_v32 = vsub.f32 %v5384_v33, %v4774_v7 }
 0x101   :  { %9279 = vst [vmem:[#allocation139_spill] sm:$0xff] %v5528_v26  ;;  %9282 = vst [vmem:[#allocation142_spill] sm:$0xff] %v5543_v29 }
 0x102   :  { %2092 = vperm.xlu1 %4228, %v4267_v41   ;;  %v5533_v12 = vpop.permute.xlu1 %1088  ;;  %v5535_v30 = vpop.permute.xlu0 %1092  ;;  %v491_v41 = vsub.f32 %v5290_v44, %v4774_v7  ;;  %v618_v44 = vsub.f32 1.5, %v5528_v26  ;;  %9292 = vst [vmem:[#allocation152_spill] sm:$0xff] %v5592_v59  ;;  %9293 = vst [vmem:[#allocation153_spill] sm:$0xff] %v5604_v46  ;;  %v622_v17 = vsub.f32 1.5, %v5604_v46  ;;  %v4272_v59 = vld [vmem:[%s8761_s6 + $0xd8] sm:$0xff] }
 0x103   :  { %4251 = vset.pattern.permute.xlu0 %v9212_v47  ;;  %9295 = vst [vmem:[#allocation155_spill] sm:$0xff] %v5626_v37  ;;  %9300 = vst [vmem:[#allocation160_spill] sm:$0xff] %v5648_v48 }
 0x104   :  { %2296 = vperm.xlu0 %4251, %v4268_v61   ;;  %v5579_v61 = vmul.f32 %v931_v20, %v675_v62  ;;  %v5585_v14 = vand.u32 2147483647, %v491_v41  ;;  %v679_v20 = vmax.f32 %v615_v2, 0.0  ;;  %v682_v15 = vmax.f32 %v618_v44, 0.0  ;;  %v5611_v2 = vld [vmem:[%s8761_s6 + $0x158] sm:$0xff] }
 0x105   :  { %v493_v41 = vsub.f32 %v5322_v27, %v4774_v7  ;;  %v5616_v27 = vmul.f32 %v5528_v26, %v5528_v26  ;;  %v5628_v62 = vmul.f32 %v936_v28, %v680_v18  ;;  %v684_v26 = vmax.f32 %v620_v3, 0.0 }
 0x106   :  { %2220 = vperm.xlu1 %4228, %v5452_v52   ;;  %v5566_v25 = vpop.permute.xlu1 %1096  ;;  %v5568_v6 = vpop.permute.xlu0 %1100  ;;  %9289 = vst [vmem:[#allocation149_spill] sm:$0xff] %v5579_v61  ;;  %v5583_v52 = vmul.f32 0.5, %v5543_v29  ;;  %9291 = vst [vmem:[#allocation151_spill] sm:$0xff] %v5585_v14  ;;  %v619_v44 = vsub.f32 1.5, %v5585_v14  ;;  %v935_v42 = vmul.f32 0.5, %v679_v20  ;;  %v938_v35 = vmul.f32 0.5, %v682_v15 }
 0x107   :  { %9294 = vst [vmem:[#allocation154_spill] sm:$0xff] %v5616_v27  ;;  %9296 = vst [vmem:[#allocation156_spill] sm:$0xff] %v5628_v62  ;;  %v5635_v57 = vand.u32 2147483647, %v493_v41  ;;  %v5642_v18 = vand.u32 2147483647, %v496_v40  ;;  %v497_v28 = vsub.f32 %v5386_v49, %v4774_v7  ;;  %v5660_v49 = vmul.f32 %v5556_v55, %v5556_v55 }
 0x108   :  { %9290 = vst [vmem:[#allocation150_spill] sm:$0xff] %v5583_v52  ;;  %2292 = vperm.xlu0 %4251, %v4269_v8   ;;  %v683_v3 = vmax.f32 %v619_v44, 0.0  ;;  %v5650_v41 = vand.u32 2147483647, %v498_v32  ;;  %v4273_v40 = vld [vmem:[%s8761_s6 + $0x1e0] sm:$0xff]  ;;  %v940_v31 = vmul.f32 0.5, %v684_v26  ;;  %v5664_v44 = vmul.f32 %v5585_v14, %v5585_v14 }
 0x109   :  { %9298 = vst [vmem:[#allocation158_spill] sm:$0xff] %v5635_v57  ;;  %9299 = vst [vmem:[#allocation159_spill] sm:$0xff] %v5642_v18  ;;  %v5668_v32 = vmul.f32 %v935_v42, %v679_v20  ;;  %v686_v37 = vmax.f32 %v622_v17, 0.0  ;;  %v624_v14 = vsub.f32 1.5, %v5642_v18  ;;  %v5681_v29 = vand.u32 2147483647, %v497_v28 }
 0x10a   :  { %4229 = vset.pattern.permute.xlu1 %v9205_v23  ;;  %v5599_v61 = vpop.permute.xlu1 %1104  ;;  %v5601_v8 = vpop.permute.xlu0 %1108  ;;  %9301 = vst [vmem:[#allocation161_spill] sm:$0xff] %v5650_v41  ;;  %9302 = vst [vmem:[#allocation162_spill] sm:$0xff] %v5660_v49  ;;  %v939_v45 = vmul.f32 0.5, %v683_v3  ;;  %v623_v42 = vsub.f32 1.5, %v5648_v48  ;;  %v4274_v20 = vld [vmem:[%s8761_s6 + $0x58] sm:$0xff]  ;;  %v5696_v17 = vmul.f32 %v940_v31, %v684_v26  ;;  %v5703_v0 = vmul.f32 %v5635_v57, %v5635_v57 }
 0x10b   :  { %1252 = vperm.xlu1 %4229, %v5611_v2   ;;  %9303 = vst [vmem:[#allocation163_spill] sm:$0xff] %v5664_v44  ;;  %9304 = vst [vmem:[#allocation164_spill] sm:$0xff] %v5668_v32  ;;  %v5699_v62 = vand.u32 2147483647, %v500_v22  ;;  %v942_v26 = vmul.f32 0.5, %v686_v37  ;;  %v688_v31 = vmax.f32 %v624_v14, 0.0  ;;  %v5727_v14 = vmul.f32 %v5642_v18, %v5642_v18 }
 0x10c   :  { %2288 = vperm.xlu0 %4251, %v4271_v58   ;;  %v937_v58 = vmul.f32 0.5, %v681_v53  ;;  %9307 = vst [vmem:[#allocation167_spill] sm:$0xff] %v5681_v29  ;;  %9309 = vst [vmem:[#allocation169_spill] sm:$0xff] %v5696_v17  ;;  %v625_v22 = vsub.f32 1.5, %v5681_v29 }
 0x10d   :  { %9310 = vst [vmem:[#allocation170_spill] sm:$0xff] %v5699_v62  ;;  %9311 = vst [vmem:[#allocation171_spill] sm:$0xff] %v5703_v0  ;;  %v5745_v17 = vmul.f32 %v942_v26, %v686_v37  ;;  %v4277_v37 = vld [vmem:[%s8761_s6 + $0x1c8] sm:$0xff] }
 0x10e   :  { %v5637_v33 = vpop.permute.xlu1 %1112  ;;  %v5639_v52 = vpop.permute.xlu0 %1116  ;;  %v5678_v55 = vmul.f32 %v937_v58, %v681_v53  ;;  %v4275_v53 = vld [vmem:[%s8761_s6 + $0x1d8] sm:$0xff]  ;;  %9315 = vst [vmem:[#allocation173_spill] sm:$0xff] %v5727_v14 }
 0x10f   :  { %4230 = vset.pattern.permute.xlu1 %v9212_v47  ;;  %9319 = vst [vmem:[#allocation177_spill] sm:$0xff] %v5745_v17  ;;  %v5783_v17 = vmul.f32 %v5681_v29, %v5681_v29 }
 0x110   :  { %2152 = vperm.xlu1 %4230, %v4272_v59   ;;  %2284 = vperm.xlu0 %4251, %v4273_v40   ;;  %v5670_v59 = vmul.f32 %v938_v35, %v682_v15  ;;  %v621_v40 = vsub.f32 1.5, %v5635_v57  ;;  %9306 = vst [vmem:[#allocation166_spill] sm:$0xff] %v5678_v55  ;;  %v5685_v35 = vmul.f32 %v5604_v46, %v5604_v46  ;;  %v626_v15 = vsub.f32 1.5, %v5650_v41 }
 0x111   :  { %v501_v55 = vsub.f32 %v5455_v36, %v4774_v7  ;;  %v4276_v36 = vld [vmem:[%s8761_s6 + $0x1d0] sm:$0xff]  ;;  %v944_v57 = vmul.f32 0.5, %v688_v31  ;;  %9324 = vst [vmem:[#allocation182_spill] sm:$0xff] %v5783_v17 }
 0x112   :  { %9305 = vst [vmem:[#allocation165_spill] sm:$0xff] %v5670_v59  ;;  %v5674_v54 = vpop.permute.xlu1 %1120  ;;  %v5676_v27 = vpop.permute.xlu0 %1124  ;;  %9308 = vst [vmem:[#allocation168_spill] sm:$0xff] %v5685_v35  ;;  %v685_v32 = vmax.f32 %v621_v40, 0.0  ;;  %v9312_v40 = vld [vmem:[#allocation17_spill] sm:$0xff]  ;;  %v5718_v59 = vmul.f32 %v939_v45, %v683_v3  ;;  %v690_v49 = vmax.f32 %v626_v15, 0.0  ;;  %v628_v3 = vsub.f32 1.5, %v5699_v62 }
 0x113   :  { %v5716_v28 = vrot.slane %v9312_v40, %v4958_v4  ;;  %v5731_v4 = vmul.f32 %v5648_v48, %v5648_v48  ;;  %v502_v45 = vsub.f32 %v5447_v63, %v4774_v7  ;;  %v5739_v44 = vand.u32 2147483647, %v501_v55 }
 0x114   :  { %2088 = vperm.xlu1 %4230, %v4274_v20   ;;  %2280 = vperm.xlu0 %4251, %v4275_v53   ;;  %v499_v20 = vsub.f32 %v5413_v19, %v4774_v7  ;;  %9314 = vst [vmem:[#allocation172_spill] sm:$0xff] %v5718_v59  ;;  %v687_v19 = vmax.f32 %v623_v42, 0.0  ;;  %v941_v42 = vmul.f32 0.5, %v685_v32  ;;  %v689_v35 = vmax.f32 %v625_v22, 0.0 }
 0x115   :  { %9313 = vst [vmem:[#allocation17_spill] sm:$0xff] %v5716_v28  ;;  %9316 = vst [vmem:[#allocation174_spill] sm:$0xff] %v5731_v4  ;;  %v1340_v46 = vsub.f32 %v5497_v9, %v5716_v28  ;;  %v5751_v7 = vmul.f32 %v5650_v41, %v5650_v41  ;;  %v946_v63 = vmul.f32 0.5, %v690_v49  ;;  %v1339_v55 = vsub.f32 %v5499_v24, %v5716_v28 }
 0x116   :  { %v5709_v53 = vpop.permute.xlu1 %1128  ;;  %v5711_v58 = vpop.permute.xlu0 %1132  ;;  %v5737_v15 = vand.u32 2147483647, %v499_v20  ;;  %9318 = vst [vmem:[#allocation176_spill] sm:$0xff] %v5739_v44  ;;  %v943_v48 = vmul.f32 0.5, %v687_v19  ;;  %v692_v26 = vmax.f32 %v628_v3, 0.0  ;;  %v5769_v24 = vmul.f32 %v941_v42, %v685_v32 }
 0x117   :  { %9320 = vst [vmem:[#allocation178_spill] sm:$0xff] %v5751_v7  ;;  %v5761_v22 = vand.u32 2147483647, %v502_v45  ;;  %v1341_v20 = vsub.f32 %v5533_v12, %v5716_v28  ;;  %v5779_v45 = vmul.f32 %v944_v57, %v688_v31  ;;  %v945_v4 = vmul.f32 0.5, %v689_v35  ;;  %v4279_v57 = vld [vmem:[%s8761_s6 + $0x1c0] sm:$0xff] }
 0x118   :  { %2216 = vperm.xlu1 %4230, %v5611_v2   ;;  %2276 = vperm.xlu0 %4251, %v4276_v36   ;;  %9317 = vst [vmem:[#allocation175_spill] sm:$0xff] %v5737_v15  ;;  %v5766_v2 = vld [vmem:[%s8761_s6 + $0x150] sm:$0xff]  ;;  %9322 = vst [vmem:[#allocation180_spill] sm:$0xff] %v5769_v24  ;;  %v627_v0 = vsub.f32 1.5, %v5737_v15  ;;  %v5785_v32 = vand.u32 2147483647, %v1340_v46  ;;  %v5787_v42 = vmul.f32 %v943_v48, %v687_v19 }
 0x119   :  { %9321 = vst [vmem:[#allocation179_spill] sm:$0xff] %v5761_v22  ;;  %9323 = vst [vmem:[#allocation181_spill] sm:$0xff] %v5779_v45  ;;  %v5790_v14 = vmul.f32 %v946_v63, %v690_v49  ;;  %v5792_v12 = vand.u32 2147483647, %v1339_v55  ;;  %v5799_v31 = vmul.f32 %v5699_v62, %v5699_v62  ;;  %v948_v45 = vmul.f32 0.5, %v692_v26 }
 0x11a   :  { %v5741_v36 = vpop.permute.xlu1 %1136  ;;  %v5743_v59 = vpop.permute.xlu0 %1140  ;;  %9325 = vst [vmem:[#allocation183_spill] sm:$0xff] %v5785_v32  ;;  %9326 = vst [vmem:[#allocation184_spill] sm:$0xff] %v5787_v42  ;;  %v5803_v46 = vmul.f32 %v5737_v15, %v5737_v15  ;;  %v630_v48 = vsub.f32 1.5, %v5761_v22  ;;  %v691_v49 = vmax.f32 %v627_v0, 0.0  ;;  %v5807_v63 = vand.u32 2147483647, %v1341_v20 }
 0x11b   :  { %9327 = vst [vmem:[#allocation185_spill] sm:$0xff] %v5790_v14  ;;  %9328 = vst [vmem:[#allocation186_spill] sm:$0xff] %v5792_v12  ;;  %v1342_v55 = vsub.f32 %v5535_v30, %v5716_v28  ;;  %v5819_v7 = vmul.f32 %v945_v4, %v689_v35  ;;  %v1468_v0 = vsub.f32 1.5, %v5785_v32  ;;  %v1343_v20 = vsub.f32 %v5566_v25, %v5716_v28  ;;  %v4281_v4 = vld [vmem:[%s8761_s6 + $0x1b8] sm:$0xff] }
 0x11c   :  { %4231 = vset.pattern.permute.xlu1 %v9205_v23  ;;  %2272 = vperm.xlu0 %4251, %v4277_v37   ;;  %v629_v37 = vsub.f32 1.5, %v5739_v44  ;;  %9329 = vst [vmem:[#allocation187_spill] sm:$0xff] %v5799_v31  ;;  %9330 = vst [vmem:[#allocation188_spill] sm:$0xff] %v5803_v46  ;;  %v5826_v30 = vmul.f32 %v5761_v22, %v5761_v22  ;;  %v1344_v18 = vsub.f32 %v5568_v6, %v5716_v28  ;;  %v4282_v6 = vld [vmem:[%s8761_s6 + $0x50] sm:$0xff] }
 0x11d   :  { %1248 = vperm.xlu1 %4231, %v5766_v2   ;;  %9331 = vst [vmem:[#allocation189_spill] sm:$0xff] %v5807_v63  ;;  %9332 = vst [vmem:[#allocation190_spill] sm:$0xff] %v5819_v7  ;;  %v5839_v35 = vmul.f32 %v948_v45, %v692_v26  ;;  %v5842_v7 = vmax.f32 %v630_v48, 0.0  ;;  %v947_v14 = vmul.f32 0.5, %v691_v49  ;;  %v1469_v41 = vsub.f32 1.5, %v5807_v63 }
 0x11e   :  { %v5775_v9 = vpop.permute.xlu1 %1144  ;;  %v5777_v3 = vpop.permute.xlu0 %1148  ;;  %v693_v19 = vmax.f32 %v629_v37, 0.0  ;;  %9333 = vst [vmem:[#allocation191_spill] sm:$0xff] %v5826_v30  ;;  %v5830_v37 = vmul.f32 %v5739_v44, %v5739_v44  ;;  %v5845_v15 = vand.u32 2147483647, %v1342_v55  ;;  %v1532_v26 = vmax.f32 %v1468_v0, 0.0 }
 0x11f   :  { %9335 = vst [vmem:[#allocation193_spill] sm:$0xff] %v5839_v35  ;;  %9336 = vst [vmem:[#allocation194_spill] sm:$0xff] %v5842_v7  ;;  %v5854_v45 = vand.u32 2147483647, %v1343_v20  ;;  %v1345_v48 = vsub.f32 %v5599_v61, %v5716_v28  ;;  %v1346_v17 = vsub.f32 %v5601_v8, %v5716_v28  ;;  %v5862_v35 = vand.u32 2147483647, %v1344_v18 }
 0x120   :  { %2268 = vperm.xlu0 %4251, %v4279_v57   ;;  %v4280_v57 = vld [vmem:[%s8761_s6 + $0xd0] sm:$0xff]  ;;  %9334 = vst [vmem:[#allocation192_spill] sm:$0xff] %v5830_v37  ;;  %v949_v29 = vmul.f32 0.5, %v693_v19  ;;  %9337 = vst [vmem:[#allocation195_spill] sm:$0xff] %v5845_v15  ;;  %v5868_v0 = vmul.f32 0.5, %v5842_v7  ;;  %v5872_v61 = vmul.f32 %v5785_v32, %v5785_v32  ;;  %v5876_v8 = vmul.f32 %v5792_v12, %v5792_v12 }
 0x121   :  { %4232 = vset.pattern.permute.xlu1 %v9212_v47  ;;  %9338 = vst [vmem:[#allocation196_spill] sm:$0xff] %v5854_v45  ;;  %9339 = vst [vmem:[#allocation197_spill] sm:$0xff] %v5862_v35  ;;  %v1347_v18 = vsub.f32 %v5637_v33, %v5716_v28  ;;  %v5880_v20 = vmul.f32 %v947_v14, %v691_v49  ;;  %v1533_v46 = vmax.f32 %v1469_v41, 0.0  ;;  %v1788_v37 = vmul.f32 0.5, %v1532_v26 }
 0x122   :  { %2148 = vperm.xlu1 %4232, %v4280_v57   ;;  %v5814_v24 = vpop.permute.xlu1 %1152  ;;  %v5816_v42 = vpop.permute.xlu0 %1156  ;;  %v1467_v57 = vsub.f32 1.5, %v5792_v12  ;;  %9340 = vst [vmem:[#allocation198_spill] sm:$0xff] %v5868_v0  ;;  %9341 = vst [vmem:[#allocation199_spill] sm:$0xff] %v5872_v61  ;;  %v1471_v12 = vsub.f32 1.5, %v5854_v45  ;;  %v5891_v62 = vand.u32 2147483647, %v1345_v48  ;;  %v1348_v14 = vsub.f32 %v5639_v52, %v5716_v28 }
 0x123   :  { %9342 = vst [vmem:[#allocation200_spill] sm:$0xff] %v5876_v8  ;;  %9343 = vst [vmem:[#allocation201_spill] sm:$0xff] %v5880_v20  ;;  %v5893_v30 = vand.u32 2147483647, %v1346_v17  ;;  %v1472_v41 = vsub.f32 1.5, %v5862_v35  ;;  %v1349_v48 = vsub.f32 %v5674_v54, %v5716_v28  ;;  %v5917_v52 = vmul.f32 %v5854_v45, %v5854_v45  ;;  %v5931_v8 = vld [vmem:[%s8761_s6 + $0x148] sm:$0xff] }
 0x124   :  { %2264 = vperm.xlu0 %4251, %v4281_v4   ;;  %v1531_v31 = vmax.f32 %v1467_v57, 0.0  ;;  %v5882_v57 = vmul.f32 %v949_v29, %v693_v19  ;;  %9345 = vst [vmem:[#allocation203_spill] sm:$0xff] %v5891_v62  ;;  %v5897_v29 = vmul.f32 %v5807_v63, %v5807_v63  ;;  %v5907_v19 = vand.u32 2147483647, %v1347_v18 }
 0x125   :  { %9346 = vst [vmem:[#allocation204_spill] sm:$0xff] %v5893_v30  ;;  %v1789_v63 = vmul.f32 0.5, %v1533_v46  ;;  %9350 = vst [vmem:[#allocation208_spill] sm:$0xff] %v5917_v52  ;;  %v5924_v18 = vmul.f32 %v1788_v37, %v1532_v26  ;;  %v1535_v49 = vmax.f32 %v1471_v12, 0.0  ;;  %v1473_v54 = vsub.f32 1.5, %v5891_v62  ;;  %v4286_v12 = vld [vmem:[%s8761_s6 + $0x1a0] sm:$0xff] }
 0x126   :  { %2084 = vperm.xlu1 %4232, %v4282_v6   ;;  %v5850_v4 = vpop.permute.xlu1 %1160  ;;  %v5852_v25 = vpop.permute.xlu0 %1164  ;;  %v4283_v6 = vld [vmem:[%s8761_s6 + $0x1b0] sm:$0xff]  ;;  %9344 = vst [vmem:[#allocation202_spill] sm:$0xff] %v5882_v57  ;;  %v1787_v33 = vmul.f32 0.5, %v1531_v31  ;;  %9347 = vst [vmem:[#allocation205_spill] sm:$0xff] %v5897_v29  ;;  %v5913_v57 = vmul.f32 %v5845_v15, %v5845_v15  ;;  %v1536_v45 = vmax.f32 %v1472_v41, 0.0  ;;  %v1475_v37 = vsub.f32 1.5, %v5907_v19 }
 0x127   :  { %9348 = vst [vmem:[#allocation206_spill] sm:$0xff] %v5907_v19  ;;  %9351 = vst [vmem:[#allocation209_spill] sm:$0xff] %v5924_v18  ;;  %v5937_v22 = vand.u32 2147483647, %v1348_v14  ;;  %v5943_v26 = vand.u32 2147483647, %v1349_v48  ;;  %v1350_v18 = vsub.f32 %v5676_v27, %v5716_v28  ;;  %v5959_v48 = vmul.f32 %v5862_v35, %v5862_v35 }
 0x128   :  { %2260 = vperm.xlu0 %4251, %v4283_v6   ;;  %v1470_v6 = vsub.f32 1.5, %v5845_v15  ;;  %9349 = vst [vmem:[#allocation207_spill] sm:$0xff] %v5913_v57  ;;  %v5934_v61 = vmul.f32 %v1787_v33, %v1531_v31  ;;  %v1351_v31 = vsub.f32 %v5709_v53, %v5716_v28  ;;  %v5949_v33 = vmul.f32 %v1789_v63, %v1533_v46  ;;  %v4287_v15 = vld [vmem:[%s8761_s6 + $0xc8] sm:$0xff] }
 0x129   :  { %9353 = vst [vmem:[#allocation211_spill] sm:$0xff] %v5937_v22  ;;  %9354 = vst [vmem:[#allocation212_spill] sm:$0xff] %v5943_v26  ;;  %v1791_v29 = vmul.f32 0.5, %v1535_v49  ;;  %v1537_v27 = vmax.f32 %v1473_v54, 0.0  ;;  %v1792_v53 = vmul.f32 0.5, %v1536_v45  ;;  %v5964_v46 = vmul.f32 %v5891_v62, %v5891_v62  ;;  %v4288_v54 = vld [vmem:[%s8761_s6 + $0x198] sm:$0xff] }
 0x12a   :  { %2212 = vperm.xlu1 %4232, %v5766_v2   ;;  %v5886_v55 = vpop.permute.xlu1 %1168  ;;  %v5888_v32 = vpop.permute.xlu0 %1172  ;;  %v4284_v2 = vld [vmem:[%s8761_s6 + $0x1a8] sm:$0xff]  ;;  %v1534_v20 = vmax.f32 %v1470_v6, 0.0  ;;  %v1474_v6 = vsub.f32 1.5, %v5893_v30  ;;  %9352 = vst [vmem:[#allocation210_spill] sm:$0xff] %v5934_v61  ;;  %9355 = vst [vmem:[#allocation213_spill] sm:$0xff] %v5949_v33  ;;  %v1476_v63 = vsub.f32 1.5, %v5937_v22  ;;  %v1352_v41 = vsub.f32 %v5711_v58, %v5716_v28 }
 0x12b   :  { %9356 = vst [vmem:[#allocation214_spill] sm:$0xff] %v5959_v48  ;;  %9357 = vst [vmem:[#allocation215_spill] sm:$0xff] %v5964_v46  ;;  %v1477_v33 = vsub.f32 1.5, %v5943_v26  ;;  %v5976_v57 = vand.u32 2147483647, %v1350_v18  ;;  %v5984_v58 = vmul.f32 %v5893_v30, %v5893_v30  ;;  %v5996_v18 = vmul.f32 %v1791_v29, %v1535_v49  ;;  %v4290_v29 = vld [vmem:[%s8761_s6 + $0x190] sm:$0xff] }
 0x12c   :  { %2256 = vperm.xlu0 %4251, %v4284_v2   ;;  %v1790_v14 = vmul.f32 0.5, %v1534_v20  ;;  %v1538_v0 = vmax.f32 %v1474_v6, 0.0  ;;  %v1539_v6 = vmax.f32 %v1475_v37, 0.0  ;;  %v5978_v52 = vand.u32 2147483647, %v1351_v31 }
 0x12d   :  { %9358 = vst [vmem:[#allocation216_spill] sm:$0xff] %v5976_v57  ;;  %9361 = vst [vmem:[#allocation219_spill] sm:$0xff] %v5984_v58  ;;  %v1793_v31 = vmul.f32 0.5, %v1537_v27  ;;  %v1540_v7 = vmax.f32 %v1476_v63, 0.0  ;;  %v6016_v30 = vmul.f32 %v5937_v22, %v5937_v22  ;;  %v1355_v63 = vsub.f32 %v5775_v9, %v5716_v28 }
 0x12e   :  { %4233 = vset.pattern.permute.xlu1 %v9205_v23  ;;  %v5920_v2 = vpop.permute.xlu1 %1176  ;;  %v5922_v17 = vpop.permute.xlu0 %1180  ;;  %9359 = vst [vmem:[#allocation217_spill] sm:$0xff] %v5978_v52  ;;  %v5980_v35 = vmul.f32 %v1790_v14, %v1534_v20  ;;  %9363 = vst [vmem:[#allocation221_spill] sm:$0xff] %v5996_v18  ;;  %v1794_v14 = vmul.f32 0.5, %v1538_v0  ;;  %v1795_v49 = vmul.f32 0.5, %v1539_v6  ;;  %v1541_v20 = vmax.f32 %v1477_v33, 0.0 }
 0x12f   :  { %1244 = vperm.xlu1 %4233, %v5931_v8   ;;  %9366 = vst [vmem:[#allocation224_spill] sm:$0xff] %v6016_v30  ;;  %v6034_v46 = vmul.f32 %v5943_v26, %v5943_v26  ;;  %v1356_v58 = vsub.f32 %v5777_v3, %v5716_v28  ;;  %v1357_v3 = vsub.f32 %v5814_v24, %v5716_v28 }
 0x130   :  { %2252 = vperm.xlu0 %4251, %v4286_v12   ;;  %9360 = vst [vmem:[#allocation218_spill] sm:$0xff] %v5980_v35  ;;  %v5999_v35 = vmul.f32 %v1792_v53, %v1536_v45  ;;  %v1478_v45 = vsub.f32 1.5, %v5976_v57  ;;  %v1479_v53 = vsub.f32 1.5, %v5978_v52  ;;  %v6026_v33 = vmul.f32 %v1794_v14, %v1538_v0 }
 0x131   :  { %9369 = vst [vmem:[#allocation227_spill] sm:$0xff] %v6034_v46  ;;  %v6041_v0 = vmul.f32 %v1795_v49, %v1539_v6  ;;  %v6046_v14 = vmul.f32 %v5976_v57, %v5976_v57  ;;  %v6061_v49 = vand.u32 2147483647, %v1355_v63  ;;  %v1359_v63 = vsub.f32 %v5850_v4, %v5716_v28 }
 0x132   :  { %v5953_v61 = vpop.permute.xlu1 %1184  ;;  %v5955_v12 = vpop.permute.xlu0 %1188  ;;  %9364 = vst [vmem:[#allocation222_spill] sm:$0xff] %v5999_v35  ;;  %9368 = vst [vmem:[#allocation226_spill] sm:$0xff] %v6026_v33  ;;  %v1354_v35 = vsub.f32 %v5743_v59, %v5716_v28  ;;  %v1797_v59 = vmul.f32 0.5, %v1541_v20 }
 0x133   :  { %4234 = vset.pattern.permute.xlu1 %v9212_v47  ;;  %9370 = vst [vmem:[#allocation228_spill] sm:$0xff] %v6041_v0  ;;  %9371 = vst [vmem:[#allocation229_spill] sm:$0xff] %v6046_v14 }
 0x134   :  { %2144 = vperm.xlu1 %4234, %v4287_v15   ;;  %2248 = vperm.xlu0 %4251, %v4288_v54   ;;  %v5988_v15 = vmul.f32 %v5907_v19, %v5907_v19  ;;  %v1353_v54 = vsub.f32 %v5741_v36, %v5716_v28  ;;  %v6002_v19 = vand.u32 2147483647, %v1352_v41  ;;  %v4289_v36 = vld [vmem:[%s8761_s6 + $0x48] sm:$0xff]  ;;  %v1796_v41 = vmul.f32 0.5, %v1540_v7  ;;  %9373 = vst [vmem:[#allocation231_spill] sm:$0xff] %v6061_v49 }
 0x135   :  { %v6059_v6 = vand.u32 2147483647, %v1354_v35  ;;  %v6072_v0 = vmul.f32 %v1797_v59, %v1541_v20  ;;  %v6087_v20 = vand.u32 2147483647, %v1357_v3  ;;  %v1483_v59 = vsub.f32 1.5, %v6061_v49 }
 0x136   :  { %9362 = vst [vmem:[#allocation220_spill] sm:$0xff] %v5988_v15  ;;  %v5992_v37 = vpop.permute.xlu1 %1192  ;;  %v5994_v62 = vpop.permute.xlu0 %1196  ;;  %9365 = vst [vmem:[#allocation223_spill] sm:$0xff] %v6002_v19  ;;  %v6068_v15 = vand.u32 2147483647, %v1356_v58  ;;  %v6085_v58 = vmul.f32 %v6002_v19, %v6002_v19  ;;  %v1360_v3 = vsub.f32 %v5852_v25, %v5716_v28 }
 0x137   :  { %9376 = vst [vmem:[#allocation234_spill] sm:$0xff] %v6072_v0  ;;  %9378 = vst [vmem:[#allocation236_spill] sm:$0xff] %v6087_v20  ;;  %v6109_v0 = vand.u32 2147483647, %v1359_v63  ;;  %v6117_v57 = vmul.f32 %v6059_v6, %v6059_v6  ;;  %v1485_v25 = vsub.f32 1.5, %v6087_v20  ;;  %vm1610_vm0 = vcmp.lt.f32.partialorder %v6059_v6, 0.5 }
 0x138   :  { %2080 = vperm.xlu1 %4234, %v4289_v36   ;;  %2244 = vperm.xlu0 %4251, %v4290_v29   ;;  %v6018_v36 = vand.u32 2147483647, %v1353_v54  ;;  %v6024_v29 = vmul.f32 %v1793_v31, %v1537_v27  ;;  %v1480_v54 = vsub.f32 1.5, %v6002_v19  ;;  %v1542_v27 = vmax.f32 %v1478_v45, 0.0  ;;  %9375 = vst [vmem:[#allocation233_spill] sm:$0xff] %v6068_v15  ;;  %9377 = vst [vmem:[#allocation235_spill] sm:$0xff] %v6085_v58 }
 0x139   :  { %v1543_v31 = vmax.f32 %v1479_v53, 0.0  ;;  %v1358_v45 = vsub.f32 %v5816_v42, %v5716_v28  ;;  %v6065_v53 = vmul.f32 %v1796_v41, %v1540_v7  ;;  %v6079_v7 = vld [vmem:[%s8761_s6 + $0x140] sm:$0xff]  ;;  %9383 = vst [vmem:[#allocation241_spill] sm:$0xff] %v6109_v0 }
 0x13a   :  { %v6020_v18 = vpop.permute.xlu1 %1200  ;;  %v6022_v48 = vpop.permute.xlu0 %1204  ;;  %9367 = vst [vmem:[#allocation225_spill] sm:$0xff] %v6024_v29  ;;  %v1481_v29 = vsub.f32 1.5, %v6018_v36  ;;  %v1544_v24 = vmax.f32 %v1480_v54, 0.0  ;;  %v1798_v35 = vmul.f32 0.5, %v1542_v27  ;;  %v1482_v54 = vsub.f32 1.5, %v6059_v6 }
 0x13b   :  { %9374 = vst [vmem:[#allocation232_spill] sm:$0xff] %v6065_v53  ;;  %v1799_v30 = vmul.f32 0.5, %v1543_v31  ;;  %v6094_v9 = vand.u32 2147483647, %v1358_v45  ;;  %v6100_v22 = vmul.f32 %v6018_v36, %v6018_v36  ;;  %v1361_v45 = vsub.f32 %v5886_v55, %v5716_v28 }
 0x13c   :  { %2208 = vperm.xlu1 %4234, %v5931_v8   ;;  %2240 = vperm.xlu0 %4251, %v5468_v56   ;;  %v6057_v56 = vmul.f32 %v5978_v52, %v5978_v52  ;;  %v1800_v42 = vmul.f32 0.5, %v1544_v24  ;;  %v6105_v46 = vmul.f32 %v1798_v35, %v1542_v27  ;;  %v1547_v55 = vmax.f32 %v1483_v59, 0.0 }
 0x13d   :  { %9379 = vst [vmem:[#allocation237_spill] sm:$0xff] %v6094_v9  ;;  %9380 = vst [vmem:[#allocation238_spill] sm:$0xff] %v6100_v22  ;;  %v6107_v4 = vmul.f32 %v1799_v30, %v1543_v31  ;;  %v4292_v30 = vld [vmem:[%s8761_s6 + $0xc0] sm:$0xff]  ;;  %v1546_v31 = vmax.f32 %v1482_v54, 0.0  ;;  %v6127_v35 = vmul.f32 %v6061_v49, %v6061_v49  ;;  %v1486_v63 = vsub.f32 1.5, %v6094_v9 }
 0x13e   :  { %v6051_v33 = vpop.permute.xlu1 %1332  ;;  %v6053_v8 = vpop.permute.xlu0 %1268  ;;  %9372 = vst [vmem:[#allocation230_spill] sm:$0xff] %v6057_v56  ;;  %9381 = vst [vmem:[#allocation239_spill] sm:$0xff] %v6105_v46  ;;  %v6132_v46 = vmul.f32 %v1800_v42, %v1544_v24  ;;  %v6135_v56 = vand.u32 2147483647, %v1360_v3  ;;  %v1362_v54 = vsub.f32 %v5888_v32, %v5716_v28  ;;  %v1363_v59 = vsub.f32 %v5920_v2, %v5716_v28  ;;  %v4293_v3 = vld [vmem:[%s8761_s6 + $0x40] sm:$0xff] }
 0x13f   :  { %9382 = vst [vmem:[#allocation240_spill] sm:$0xff] %v6107_v4  ;;  %9384 = vst [vmem:[#allocation242_spill] sm:$0xff] %v6127_v35  ;;  %v6138_v4 = vand.u32 2147483647, %v1361_v45  ;;  %v6149_v42 = vmul.f32 %v6068_v15, %v6068_v15  ;;  %v1802_v32 = vmul.f32 0.5, %v1546_v31  ;;  %v1803_v2 = vmul.f32 0.5, %v1547_v55 }
 0x140   :  { %4235 = vset.pattern.permute.xlu1 %v9205_v23  ;;  %2236 = vperm.xlu0 %4251, %v5510_v50   ;;  %v1545_v50 = vmax.f32 %v1481_v29, 0.0  ;;  %v1484_v29 = vsub.f32 1.5, %v6068_v15  ;;  %9385 = vst [vmem:[#allocation243_spill] sm:$0xff] %v6132_v46  ;;  %9386 = vst [vmem:[#allocation244_spill] sm:$0xff] %v6135_v56  ;;  %v6161_v15 = vmul.f32 %v6087_v20, %v6087_v20  ;;  %v6167_v46 = vand.u32 2147483647, %v1362_v54 }
 0x141   :  { %1240 = vperm.xlu1 %4235, %v6079_v7   ;;  %9387 = vst [vmem:[#allocation245_spill] sm:$0xff] %v6138_v4  ;;  %9389 = vst [vmem:[#allocation247_spill] sm:$0xff] %v6149_v42  ;;  %v1364_v52 = vsub.f32 %v5922_v17, %v5716_v28  ;;  %v1489_v58 = vsub.f32 1.5, %v6138_v4  ;;  %v6169_v10 = vand.u32 2147483647, %v1363_v59  ;;  %v6174_v19 = vmul.f32 %v6094_v9, %v6094_v9 }
 0x142   :  { %v6089_v41 = vpop.permute.xlu0 %1328  ;;  %v1801_v14 = vmul.f32 0.5, %v1545_v50  ;;  %v1548_v44 = vmax.f32 %v1484_v29, 0.0  ;;  %v1549_v29 = vmax.f32 %v1485_v25, 0.0  ;;  %9390 = vst [vmem:[#allocation248_spill] sm:$0xff] %v6161_v15  ;;  %v1488_v25 = vsub.f32 1.5, %v6135_v56  ;;  %9391 = vst [vmem:[#allocation249_spill] sm:$0xff] %v6167_v46 }
 0x143   :  { %v6096_v53 = vpop.permute.xlu1 %2168  ;;  %9392 = vst [vmem:[#allocation250_spill] sm:$0xff] %v6169_v10  ;;  %9393 = vst [vmem:[#allocation251_spill] sm:$0xff] %v6174_v19  ;;  %v1365_v20 = vsub.f32 %v5953_v61, %v5716_v28  ;;  %v6179_v17 = vmul.f32 %v1802_v32, %v1546_v31  ;;  %v6185_v59 = vmul.f32 %v6109_v0, %v6109_v0  ;;  %v6190_v22 = vand.u32 2147483647, %v1364_v52 }
 0x144   :  { %v6144_v49 = vmul.f32 %v1801_v14, %v1545_v50  ;;  %v1550_v14 = vmax.f32 %v1486_v63, 0.0  ;;  %v1804_v24 = vmul.f32 0.5, %v1548_v44  ;;  %v1805_v35 = vmul.f32 0.5, %v1549_v29 }
 0x145   :  { %4236 = vset.pattern.permute.xlu1 %v9212_v47  ;;  %9395 = vst [vmem:[#allocation253_spill] sm:$0xff] %v6185_v59  ;;  %v1552_v9 = vmax.f32 %v1488_v25, 0.0  ;;  %9397 = vst [vmem:[#allocation255_spill] sm:$0xff] %v6190_v22  ;;  %v1553_v31 = vmax.f32 %v1489_v58, 0.0  ;;  %v1491_v32 = vsub.f32 1.5, %v6169_v10  ;;  %v1366_v52 = vsub.f32 %v5955_v12, %v5716_v28 }
 0x146   :  { %2140 = vperm.xlu1 %4236, %v4292_v30   ;;  %v6123_v27 = vpop.permute.xlu0 %1324  ;;  %v1487_v30 = vsub.f32 1.5, %v6109_v0  ;;  %9388 = vst [vmem:[#allocation246_spill] sm:$0xff] %v6144_v49  ;;  %v1806_v54 = vmul.f32 0.5, %v1550_v14  ;;  %v6187_v63 = vmul.f32 %v1804_v24, %v1548_v44  ;;  %v6201_v24 = vand.u32 2147483647, %v1365_v20  ;;  %v6218_v20 = vld [vmem:[%s8761_s6 + $0x138] sm:$0xff] }
 0x147   :  { %v6130_v26 = vpop.permute.xlu1 %2104  ;;  %v6211_v58 = vmul.f32 %v6135_v56, %v6135_v56  ;;  %v1808_v12 = vmul.f32 0.5, %v1552_v9  ;;  %v6234_v15 = vmul.f32 %v6167_v46, %v6167_v46  ;;  %v6237_v19 = vand.u32 2147483647, %v1366_v52  ;;  %v4296_v52 = vld [vmem:[%s8761_s6 + $0x38] sm:$0xff] }
 0x148   :  { %9396 = vst [vmem:[#allocation254_spill] sm:$0xff] %v6187_v63  ;;  %9399 = vst [vmem:[#allocation257_spill] sm:$0xff] %v6201_v24  ;;  %v6206_v25 = vmul.f32 %v1806_v54, %v1550_v14  ;;  %v1492_v14 = vsub.f32 1.5, %v6190_v22  ;;  %v1368_v54 = vsub.f32 %v5994_v62, %v5716_v28  ;;  %v4295_v62 = vld [vmem:[%s8761_s6 + $0xb8] sm:$0xff]  ;;  %vm1609_vm9 = vcmp.lt.f32.partialorder %v6018_v36, 0.5 }
 0x149   :  { %9401 = vst [vmem:[#allocation259_spill] sm:$0xff] %v6211_v58  ;;  %9404 = vst [vmem:[#allocation262_spill] sm:$0xff] %v6234_v15 }
 0x14a   :  { %2076 = vperm.xlu1 %4236, %v4293_v3   ;;  %v6154_v45 = vpop.permute.xlu0 %1320  ;;  %v1551_v3 = vmax.f32 %v1487_v30, 0.0  ;;  %v6181_v30 = vmul.f32 %v1803_v2, %v1547_v55  ;;  %v1490_v55 = vsub.f32 1.5, %v6167_v46  ;;  %v6198_v2 = vmul.f32 %v1805_v35, %v1549_v29  ;;  %9400 = vst [vmem:[#allocation258_spill] sm:$0xff] %v6206_v25  ;;  %9405 = vst [vmem:[#allocation263_spill] sm:$0xff] %v6237_v19 }
 0x14b   :  { %v6157_v50 = vpop.permute.xlu1 %2232  ;;  %v1367_v35 = vsub.f32 %v5992_v37, %v5716_v28  ;;  %v6223_v29 = vmul.f32 %v6138_v4, %v6138_v4  ;;  %v1809_v37 = vmul.f32 0.5, %v1553_v31  ;;  %v1370_v25 = vsub.f32 %v6022_v48, %v5716_v28 }
 0x14c   :  { %9394 = vst [vmem:[#allocation252_spill] sm:$0xff] %v6181_v30  ;;  %9398 = vst [vmem:[#allocation256_spill] sm:$0xff] %v6198_v2  ;;  %v1554_v42 = vmax.f32 %v1490_v55, 0.0  ;;  %v1555_v30 = vmax.f32 %v1491_v32, 0.0  ;;  %v1493_v2 = vsub.f32 1.5, %v6201_v24  ;;  %v1369_v55 = vsub.f32 %v6020_v18, %v5716_v28 }
 0x14d   :  { %9402 = vst [vmem:[#allocation260_spill] sm:$0xff] %v6223_v29  ;;  %v6253_v32 = vmul.f32 %v1808_v12, %v1552_v9  ;;  %v1556_v48 = vmax.f32 %v1492_v14, 0.0  ;;  %v6261_v0 = vmul.f32 %v1809_v37, %v1553_v31  ;;  %v6264_v18 = vsub.s32 2, %v4750_v1 }
 0x14e   :  { %2204 = vperm.xlu1 %4236, %v6079_v7   ;;  %v6192_v49 = vpop.permute.xlu0 %1316  ;;  %v1807_v7 = vmul.f32 0.5, %v1551_v3  ;;  %v1811_v58 = vmul.f32 0.5, %v1555_v30  ;;  %v1557_v12 = vmax.f32 %v1493_v2, 0.0  ;;  %v1494_v14 = vsub.f32 1.5, %v6237_v19 }
 0x14f   :  { %9408 = vst [vmem:[#allocation266_spill] sm:$0xff] %v6253_v32  ;;  %9409 = vst [vmem:[#allocation267_spill] sm:$0xff] %v6261_v0  ;;  %v6275_v31 = vmul.f32 %v6190_v22, %v6190_v22  ;;  %v1812_v1 = vmul.f32 0.5, %v1556_v48  ;;  %v1402_v2 = vsub.f32 %v6051_v33, %v5716_v28  ;;  %v6298_v0 = vmul.f32 %v6201_v24, %v6201_v24 }
 0x150   :  { %v6194_v61 = vpop.permute.xlu1 %1264  ;;  %v6228_v44 = vmul.f32 %v1807_v7, %v1551_v3  ;;  %v6246_v3 = vmul.f32 %v6169_v10, %v6169_v10  ;;  %v6248_v7 = vand.u32 2147483647, %v1367_v35  ;;  %v1810_v35 = vmul.f32 0.5, %v1554_v42  ;;  %9410 = vst [vmem:[#allocation268_spill] sm:$0xff] %v6264_v18 }
 0x151   :  { %9411 = vst [vmem:[#allocation269_spill] sm:$0xff] %v6275_v31  ;;  %9414 = vst [vmem:[#allocation272_spill] sm:$0xff] %v6298_v0  ;;  %v1386_v33 = vsub.f32 %v6053_v8, %v5716_v28  ;;  %v1558_v4 = vmax.f32 %v1494_v14, 0.0  ;;  %v6315_v8 = vmul.f32 %v6237_v19, %v6237_v19  ;;  %v6317_v46 = vand.u32 2147483647, %v1402_v2 }
 0x152   :  { %4237 = vset.pattern.permute.xlu1 %v9205_v23  ;;  %9403 = vst [vmem:[#allocation261_spill] sm:$0xff] %v6228_v44  ;;  %v6241_v59 = vpop.permute.xlu0 %1312  ;;  %9406 = vst [vmem:[#allocation264_spill] sm:$0xff] %v6246_v3  ;;  %v6256_v44 = vand.u32 2147483647, %v1368_v54  ;;  %v6270_v54 = vand.u32 2147483647, %v1370_v25  ;;  %v6285_v25 = vrot.slane %v9312_v40, %v6264_v18  ;;  %v6292_v29 = vmul.f32 %v1810_v35, %v1554_v42 }
 0x153   :  { %1236 = vperm.xlu1 %4237, %v6218_v20   ;;  %9407 = vst [vmem:[#allocation265_spill] sm:$0xff] %v6248_v7  ;;  %v1495_v37 = vsub.f32 1.5, %v6248_v7  ;;  %v1813_v18 = vmul.f32 0.5, %v1557_v12  ;;  %v1401_v35 = vsub.f32 %v6089_v41, %v5716_v28  ;;  %9416 = vst [vmem:[#allocation274_spill] sm:$0xff] %v6315_v8  ;;  %v1814_v42 = vmul.f32 0.5, %v1558_v4 }
 0x154   :  { %v1496_v32 = vsub.f32 1.5, %v6256_v44  ;;  %9412 = vst [vmem:[#allocation270_spill] sm:$0xff] %v6292_v29  ;;  %v1498_v15 = vsub.f32 1.5, %v6270_v54  ;;  %v6311_v29 = vmul.f32 %v1812_v1, %v1556_v48  ;;  %9417 = vst [vmem:[#allocation275_spill] sm:$0xff] %v6317_v46  ;;  %v6327_v41 = vmul.f32 %v6256_v44, %v6256_v44 }
 0x155   :  { %v6230_v63 = vpop.permute.xlu1 %2164  ;;  %v6329_v1 = vand.u32 2147483647, %v1386_v33  ;;  %v6331_v48 = vmul.f32 %v1813_v18, %v1557_v12  ;;  %v6339_v10 = vand.u32 2147483647, %v1401_v35  ;;  %v1400_v31 = vsub.f32 %v6123_v27, %v5716_v28  ;;  %v6358_v35 = vld [vmem:[%s8761_s6 + $0x130] sm:$0xff] }
 0x156   :  { %v6287_v9 = vpop.permute.xlu0 %1308  ;;  %9415 = vst [vmem:[#allocation273_spill] sm:$0xff] %v6311_v29  ;;  %v1560_v14 = vmax.f32 %v1496_v32, 0.0  ;;  %9419 = vst [vmem:[#allocation277_spill] sm:$0xff] %v6327_v41  ;;  %v1562_v32 = vmax.f32 %v1498_v15, 0.0  ;;  %v1530_v15 = vsub.f32 1.5, %v6317_v46  ;;  %v2318_v27 = vsub.f32 %v6130_v26, %v6285_v25 }
 0x157   :  { %4238 = vset.pattern.permute.xlu1 %v9212_v47  ;;  %9420 = vst [vmem:[#allocation278_spill] sm:$0xff] %v6329_v1  ;;  %9421 = vst [vmem:[#allocation279_spill] sm:$0xff] %v6331_v48  ;;  %v6361_v33 = vmul.f32 %v1814_v42, %v1558_v4  ;;  %v1690_v22 = vmul.f32 %v6270_v54, %v6270_v54  ;;  %v1529_v26 = vsub.f32 1.5, %v6339_v10  ;;  %v6369_v24 = vand.u32 2147483647, %v1400_v31 }
 0x158   :  { %2136 = vperm.xlu1 %4238, %v4295_v62   ;;  %v6278_v62 = vand.u32 2147483647, %v1369_v55  ;;  %v6294_v55 = vmul.f32 %v1811_v58, %v1555_v30  ;;  %v1559_v30 = vmax.f32 %v1495_v37, 0.0  ;;  %v6323_v37 = vmul.f32 %v6248_v7, %v6248_v7  ;;  %9422 = vst [vmem:[#allocation280_spill] sm:$0xff] %v6339_v10 }
 0x159   :  { %v6266_v56 = vpop.permute.xlu1 %2100  ;;  %v1816_v29 = vmul.f32 0.5, %v1560_v14  ;;  %9423 = vst [vmem:[#allocation281_spill] sm:$0xff] %v6361_v33  ;;  %v1818_v12 = vmul.f32 0.5, %v1562_v32  ;;  %v6376_v42 = vmax.f32 %v1530_v15, 0.0  ;;  %v6380_v33 = vmul.f32 %v6317_v46, %v6317_v46  ;;  %v4298_v46 = vld [vmem:[%s8761_s6 + $0xb0] sm:$0xff] }
 0x15a   :  { %9413 = vst [vmem:[#allocation271_spill] sm:$0xff] %v6294_v55  ;;  %v1497_v58 = vsub.f32 1.5, %v6278_v62  ;;  %9418 = vst [vmem:[#allocation276_spill] sm:$0xff] %v6323_v37  ;;  %v6335_v3 = vpop.permute.xlu0 %1304  ;;  %v6346_v18 = vmul.f32 %v6278_v62, %v6278_v62  ;;  %v6390_v31 = vmul.f32 %v6339_v10, %v6339_v10  ;;  %v1399_v4 = vsub.f32 %v6154_v45, %v5716_v28 }
 0x15b   :  { %v6373_v19 = vmul.f32 %v1816_v29, %v1560_v14  ;;  %9425 = vst [vmem:[#allocation283_spill] sm:$0xff] %v6376_v42  ;;  %9426 = vst [vmem:[#allocation284_spill] sm:$0xff] %v6380_v33  ;;  %v6392_v29 = vand.u32 2147483647, %v2318_v27  ;;  %v1754_v14 = vsub.f32 0.75, %v1690_v22  ;;  %v6403_v10 = vmax.f32 %v1529_v26, 0.0 }
 0x15c   :  { %2072 = vperm.xlu1 %4238, %v4296_v52   ;;  %v2334_v52 = vsub.f32 %v6096_v53, %v6285_v25  ;;  %v1815_v53 = vmul.f32 0.5, %v1559_v30  ;;  %v1561_v55 = vmax.f32 %v1497_v58, 0.0  ;;  %v1514_v58 = vsub.f32 1.5, %v6329_v1  ;;  %9428 = vst [vmem:[#allocation286_spill] sm:$0xff] %v6390_v31 }
 0x15d   :  { %v6302_v40 = vpop.permute.xlu1 %2228  ;;  %v1528_v27 = vsub.f32 1.5, %v6369_v24  ;;  %vm1626_vm1 = vcmp.lt.f32.partialorder %v6270_v54, 0.5  ;;  %v6411_v45 = vmul.f32 0.5, %v6376_v42  ;;  %v2446_v54 = vsub.f32 1.5, %v6392_v29 }
 0x15e   :  { %v6333_v2 = vand.u32 2147483647, %v2334_v52  ;;  %v6366_v0 = vmul.f32 %v1815_v53, %v1559_v30  ;;  %v1817_v48 = vmul.f32 0.5, %v1561_v55  ;;  %v6382_v37 = vpop.permute.xlu0 %1300  ;;  %v1578_v30 = vmax.f32 %v1514_v58, 0.0 }
 0x15f   :  { %v6386_v53 = vmul.f32 %v6329_v1, %v6329_v1  ;;  %v1882_v58 = vmul.f32 %v1818_v12, %v1562_v32  ;;  %9429 = vst [vmem:[#allocation287_spill] sm:$0xff] %v6411_v45  ;;  %v982_v32 = vmul.f32 %v5310_v43, %v5274_v34  ;;  %v1398_v26 = vsub.f32 %v6192_v49, %v5716_v28  ;;  %v4299_v34 = vld [vmem:[%s8761_s6 + $0x30] sm:$0xff] }
 0x160   :  { %2200 = vperm.xlu1 %4238, %v6218_v20   ;;  %v2462_v52 = vsub.f32 1.5, %v6333_v2  ;;  %9424 = vst [vmem:[#allocation282_spill] sm:$0xff] %v6366_v0  ;;  %v6401_v1 = vmul.f32 %v1817_v48, %v1561_v55  ;;  %v1834_v48 = vmul.f32 0.5, %v1578_v30  ;;  %v1849_v43 = vmul.f32 0.5, %v6403_v10 }
 0x161   :  { %9427 = vst [vmem:[#allocation285_spill] sm:$0xff] %v6386_v53  ;;  %v1946_v22 = vsel %vm1626_vm1, %v1754_v14, %v1882_v58  ;;  %v1592_v55 = vmax.f32 %v1528_v27, 0.0  ;;  %v2350_v49 = vsub.f32 %v6157_v50, %v6285_v25  ;;  %v9430_v14 = vsub.f32 0.75, %v5278_v5 }
 0x162   :  { %v6337_v20 = vpop.permute.xlu1 %1260  ;;  %v2526_v15 = vmax.f32 %v2462_v52, 0.0  ;;  %v6420_v52 = vand.u32 2147483647, %v1399_v4  ;;  %v6424_v45 = vpop.permute.xlu0 %1296  ;;  %v2333_v4 = vsub.f32 %v6230_v63, %v6285_v25  ;;  %v2510_v42 = vmax.f32 %v2446_v54, 0.0 }
 0x163   :  { %v1046_v58 = vsel %vm726_vm2, %v9430_v14, %v982_v32  ;;  %vm2590_vm3 = vcmp.lt.f32.partialorder %v6333_v2, 0.5  ;;  %v6443_v7 = vand.u32 2147483647, %v1398_v26  ;;  %v1385_v63 = vsub.f32 %v6194_v61, %v5716_v28 }
 0x164   :  { %4239 = vset.pattern.permute.xlu1 %v9205_v23  ;;  %v2782_v33 = vmul.f32 0.5, %v2526_v15  ;;  %v6440_v27 = vand.u32 2147483647, %v2333_v4  ;;  %v1527_v16 = vsub.f32 1.5, %v6420_v52  ;;  %v6450_v5 = vmul.f32 %v6369_v24, %v6369_v24 }
 0x165   :  { %1232 = vperm.xlu1 %4239, %v6358_v35   ;;  %9431 = vst [vmem:[#allocation288_spill] sm:$0xff] %v6443_v7  ;;  %v2638_v50 = vmul.f32 %v6392_v29, %v6392_v29  ;;  %v6458_v32 = vand.u32 2147483647, %v2350_v49  ;;  %v6475_v54 = vand.u32 2147483647, %v1385_v63  ;;  %v1396_v11 = vsub.f32 %v6287_v9, %v5716_v28 }
 0x166   :  { %v2846_v53 = vmul.f32 %v2782_v33, %v2526_v15  ;;  %9432 = vst [vmem:[#allocation289_spill] sm:$0xff] %v6450_v5  ;;  %v966_v33 = vmul.f32 %v5087_v38, %v5053_v51  ;;  %v6456_v15 = vmul.f32 %v1834_v48, %v1578_v30  ;;  %v2461_v61 = vsub.f32 1.5, %v6440_v27 }
 0x167   :  { %v6371_v8 = vpop.permute.xlu1 %2160  ;;  %v2766_v51 = vmul.f32 0.5, %v2510_v42  ;;  %v2317_v30 = vsub.f32 %v6266_v56, %v6285_v25  ;;  %v1526_v48 = vsub.f32 1.5, %v6443_v7  ;;  %v6486_v56 = vld [vmem:[%s8761_s6 + $0x128] sm:$0xff]  ;;  %vm2574_vm6 = vcmp.lt.f32.partialorder %v6392_v29, 0.5 }
 0x168   :  { %vm1625_vm7 = vcmp.lt.f32.partialorder %v6278_v62, 0.5  ;;  %v2478_v63 = vsub.f32 1.5, %v6458_v32  ;;  %vm2589_vm10 = vcmp.lt.f32.partialorder %v6440_v27, 0.5  ;;  %v1393_v21 = vsub.f32 %v6424_v45, %v5716_v28 }
 0x169   :  { %4240 = vset.pattern.permute.xlu1 %v9212_v47  ;;  %v2830_v4 = vmul.f32 %v2766_v51, %v2510_v42  ;;  %v6481_v6 = vand.u32 2147483647, %v2317_v30  ;;  %v6527_v51 = vmul.f32 %v6475_v54, %v6475_v54  ;;  %vm1624_vm12 = vcmp.lt.f32.partialorder %v6256_v44, 0.5  ;;  %v9475_v44 = vld [vmem:[#allocation98_spill] sm:$0xff] }
 0x16a   :  { %2132 = vperm.xlu1 %4240, %v4298_v46   ;;  %v2654_v46 = vmul.f32 %v6333_v2, %v6333_v2 }
 0x16b   :  { %v6407_v0 = vpop.permute.xlu1 %2096  ;;  %vm2573_vm11 = vcmp.lt.f32.partialorder %v6481_v6, 0.5 }
 0x16c   :  { %v2718_v31 = vsub.f32 0.75, %v2654_v46  ;;  %v1591_v46 = vmax.f32 %v1527_v16, 0.0  ;;  %v6504_v16 = vmul.f32 %v1849_v43, %v6403_v10  ;;  %v1513_v10 = vsub.f32 1.5, %v6475_v54 }
 0x16e   :  { %2068 = vperm.xlu1 %4240, %v4299_v34   ;;  %v2010_v34 = vmul.f32 %v1946_v22, %v1046_v58  ;;  %v2910_v41 = vsel %vm2590_vm3, %v2718_v31, %v2846_v53  ;;  %v1848_v22 = vmul.f32 0.5, %v1592_v55  ;;  %v6461_v53 = vpop.permute.xlu0 %1292  ;;  %v1397_v31 = vsub.f32 %v6241_v59, %v5716_v28 }
 0x16f   :  { %v6433_v12 = vpop.permute.xlu1 %2224  ;;  %v9434_v59 = vsub.f32 0.75, %v5027_v39  ;;  %v6496_v39 = vmul.f32 %v6420_v52, %v6420_v52  ;;  %v2445_v58 = vsub.f32 1.5, %v6481_v6  ;;  %v1847_v9 = vmul.f32 0.5, %v1591_v46 }
 0x170   :  { %v2974_v2 = vmul.f32 %v2910_v41, %v2010_v34  ;;  %v9433_v41 = vsub.f32 0.75, %v6117_v57  ;;  %v2702_v57 = vsub.f32 0.75, %v2638_v50  ;;  %v6498_v42 = vand.u32 2147483647, %v1397_v31 }
 0x171   :  { %v1030_v26 = vsel %vm710_vm4, %v9434_v59, %v966_v33  ;;  %9435 = vst [vmem:[#allocation290_spill] sm:$0xff] %v6496_v39  ;;  %v6510_v33 = vmul.f32 %v1848_v22, %v1592_v55  ;;  %v6514_v31 = vmul.f32 %v6443_v7, %v6443_v7  ;;  %v4301_v55 = vld [vmem:[%s8761_s6 + $0xa8] sm:$0xff]  ;;  %v1392_v45 = vsub.f32 %v6461_v53, %v5716_v28 }
 0x172   :  { %2196 = vperm.xlu1 %4240, %v6358_v35   ;;  %4139 = vmatprep.subr.mxu0 %v2974_v2  ;;  %v1930_v38 = vsel %vm1610_vm0, %v9433_v41, %v6179_v17  ;;  %v2525_v17 = vmax.f32 %v2461_v61, 0.0  ;;  %9436 = vst [vmem:[#allocation291_spill] sm:$0xff] %v6498_v42  ;;  %v2894_v14 = vsel %vm2574_vm6, %v2702_v57, %v2830_v4  ;;  %v6507_v50 = vpop.permute.xlu0 %1288  ;;  %v1590_v61 = vmax.f32 %v1526_v48, 0.0 }
 0x173   :  { %v1994_v49 = vmul.f32 %v1930_v38, %v1030_v26  ;;  %9437 = vst [vmem:[#allocation292_spill] sm:$0xff] %v6510_v33  ;;  %9438 = vst [vmem:[#allocation293_spill] sm:$0xff] %v6514_v31  ;;  %v6519_v41 = vand.u32 2147483647, %v1396_v11  ;;  %v2509_v38 = vmax.f32 %v2445_v58, 0.0  ;;  %v1525_v30 = vsub.f32 1.5, %v6498_v42 }
 0x174   :  { %v6463_v35 = vpop.permute.xlu1 %1256  ;;  %v2781_v43 = vmul.f32 0.5, %v2525_v17  ;;  %v1395_v48 = vsub.f32 %v6335_v3, %v5716_v28  ;;  %v6535_v26 = vmul.f32 %v1847_v9, %v1591_v46  ;;  %v6537_v57 = vmax.f32 %v2478_v63, 0.0 }
 0x175   :  { %v2958_v29 = vmul.f32 %v2894_v14, %v1994_v49  ;;  %9439 = vst [vmem:[#allocation294_spill] sm:$0xff] %v6519_v41  ;;  %v6541_v4 = vmul.f32 %v6458_v32, %v6458_v32  ;;  %v2653_v11 = vmul.f32 %v6440_v27, %v6440_v27  ;;  %v1846_v14 = vmul.f32 0.5, %v1590_v61  ;;  %v4302_v49 = vld [vmem:[%s8761_s6 + $0x28] sm:$0xff] }
 0x176   :  { %4241 = vset.pattern.permute.xlu1 %v9205_v23  ;;  %9440 = vst [vmem:[#allocation295_spill] sm:$0xff] %v6535_v26  ;;  %v6548_v3 = vmul.f32 %v6498_v42, %v6498_v42  ;;  %v2349_v46 = vsub.f32 %v6302_v40, %v6285_v25  ;;  %v6552_v58 = vmax.f32 %v1513_v10, 0.0  ;;  %v2845_v9 = vmul.f32 %v2781_v43, %v2525_v17 }
 0x177   :  { %1228 = vperm.xlu1 %4241, %v6486_v56   ;;  %4140 = vmatpush3.xpose.msra.mxu0 %v2958_v29  ;;  %v1524_v63 = vsub.f32 1.5, %v6519_v41  ;;  %v2765_v29 = vmul.f32 0.5, %v2509_v38  ;;  %v1589_v2 = vmax.f32 %v1525_v30, 0.0  ;;  %v6561_v31 = vand.u32 2147483647, %v1395_v48 }
 0x178   :  { %9441 = vst [vmem:[#allocation296_spill] sm:$0xff] %v6548_v3  ;;  %v1394_v40 = vsub.f32 %v6382_v37, %v5716_v28  ;;  %v2717_v17 = vsub.f32 0.75, %v2653_v11  ;;  %v2637_v43 = vmul.f32 %v6481_v6, %v6481_v6  ;;  %v1384_v42 = vsub.f32 %v6337_v20, %v5716_v28  ;;  %v9445_v11 = vld [vmem:[#allocation106_spill] sm:$0xff] }
 0x179   :  { %v6501_v34 = vpop.permute.xlu1 %2156  ;;  %9442 = vst [vmem:[#allocation297_spill] sm:$0xff] %v6561_v31  ;;  %v6576_v48 = vmul.f32 %v1846_v14, %v1590_v61  ;;  %v6579_v37 = vand.u32 2147483647, %v2349_v46  ;;  %v9446_v22 = vsub.f32 0.75, %v9445_v11  ;;  %v1588_v26 = vmax.f32 %v1524_v63, 0.0  ;;  %v9448_v14 = vld [vmem:[#allocation73_spill] sm:$0xff] }
 0x17a   :  { %v2829_v20 = vmul.f32 %v2765_v29, %v2509_v38  ;;  %v2909_v5 = vsel %vm2589_vm10, %v2717_v17, %v2845_v9  ;;  %v1523_v62 = vsub.f32 1.5, %v6561_v31  ;;  %v2701_v27 = vsub.f32 0.75, %v2637_v43  ;;  %v9449_v46 = vld [vmem:[#allocation64_spill] sm:$0xff]  ;;  %v9452_v63 = vld [vmem:[#allocation238_spill] sm:$0xff] }
 0x17b   :  { %4242 = vset.pattern.permute.xlu1 %v9212_v47  ;;  %9444 = vst [vmem:[#allocation298_spill] sm:$0xff] %v6576_v48  ;;  %v1045_v39 = vsel %vm725_vm5, %v9446_v22, %v5339_v60  ;;  %v6593_v61 = vand.u32 2147483647, %v1384_v42  ;;  %v9450_v9 = vsub.f32 0.75, %v9449_v46  ;;  %v9451_v42 = vld [vmem:[#allocation246_spill] sm:$0xff]  ;;  %v9453_v29 = vsub.f32 0.75, %v9452_v63 }
 0x17c   :  { %2128 = vperm.xlu1 %4242, %v4301_v55   ;;  %v6555_v55 = vpop.permute.xlu0 %1284  ;;  %v2316_v17 = vsub.f32 %v6407_v0, %v6285_v25  ;;  %v1833_v13 = vmul.f32 0.5, %v6552_v58  ;;  %v1845_v43 = vmul.f32 0.5, %v1589_v2  ;;  %v6634_v0 = vld [vmem:[%s8761_s6 + $0x120] sm:$0xff]  ;;  %v6645_v46 = vmul.f32 %v6561_v31, %v6561_v31 }
 0x17d   :  { %v6532_v59 = vpop.permute.xlu1 %2092  ;;  %v1512_v53 = vsub.f32 1.5, %v6593_v61 }
 0x17e   :  { %9456 = vst [vmem:[#allocation246_spill] sm:$0xff] %v6645_v46 }
 0x180   :  { %2064 = vperm.xlu1 %4242, %v4302_v49   ;;  %v9443_v49 = vsub.f32 0.75, %v6346_v18  ;;  %v2332_v18 = vsub.f32 %v6371_v8, %v6285_v25  ;;  %v1029_v8 = vsel %vm709_vm8, %v9450_v9, %v9448_v14  ;;  %v6647_v9 = vand.u32 2147483647, %v1392_v45 }
 0x181   :  { %v6565_v10 = vpop.permute.xlu1 %2220  ;;  %v1576_v45 = vmax.f32 %v1512_v53, 0.0 }
 0x182   :  { %v1945_v30 = vsel %vm1625_vm7, %v9443_v49, %v6401_v1  ;;  %v6589_v1 = vand.u32 2147483647, %v1394_v40  ;;  %v6602_v22 = vand.u32 2147483647, %v2332_v18  ;;  %v2893_v40 = vsel %vm2573_vm11, %v2701_v27, %v2829_v20  ;;  %9457 = vst [vmem:[#allocation238_spill] sm:$0xff] %v6647_v9 }
 0x183   :  { %v2009_v7 = vmul.f32 %v1945_v30, %v1045_v39  ;;  %v6597_v39 = vpop.permute.xlu0 %1280  ;;  %v6623_v49 = vmul.f32 %v6519_v41, %v6519_v41  ;;  %v6628_v30 = vand.u32 2147483647, %v1393_v21  ;;  %v1844_v20 = vmul.f32 0.5, %v1588_v26 }
 0x184   :  { %2192 = vperm.xlu1 %4242, %v6486_v56   ;;  %9447 = vst [vmem:[#allocation106_spill] sm:$0xff] %v6589_v1  ;;  %v2477_v56 = vsub.f32 1.5, %v6579_v37  ;;  %v1522_v36 = vsub.f32 1.5, %v6589_v1  ;;  %v2460_v6 = vsub.f32 1.5, %v6602_v22  ;;  %v1587_v18 = vmax.f32 %v1523_v62, 0.0 }
 0x185   :  { %v2973_v60 = vmul.f32 %v2909_v5, %v2009_v7  ;;  %v1929_v7 = vsel %vm1609_vm9, %v9453_v29, %v9451_v42  ;;  %9454 = vst [vmem:[#allocation73_spill] sm:$0xff] %v6623_v49  ;;  %9455 = vst [vmem:[#allocation64_spill] sm:$0xff] %v6628_v30  ;;  %v1390_v29 = vsub.f32 %v6555_v55, %v5716_v28  ;;  %v1832_v53 = vmul.f32 0.5, %v1576_v45  ;;  %v4305_v55 = vld [vmem:[%s8761_s6 + $0x20] sm:$0xff] }
 0x186   :  { %v6599_v38 = vpop.permute.xlu1 %1252  ;;  %v1993_v5 = vmul.f32 %v1929_v7, %v1029_v8  ;;  %v2541_v27 = vmax.f32 %v2477_v56, 0.0  ;;  %v6649_v8 = vand.u32 2147483647, %v2316_v17  ;;  %v6654_v56 = vmul.f32 %v1833_v13, %v6552_v58 }
 0x187   :  { %4141 = vmatprep.subr.mxu0 %v2973_v60  ;;  %v1391_v60 = vsub.f32 %v6507_v50, %v5716_v28  ;;  %v6651_v62 = vpop.permute.xlu0 %1276  ;;  %v6656_v50 = vmul.f32 %v1845_v43, %v1589_v2  ;;  %v1586_v42 = vmax.f32 %v1522_v36, 0.0  ;;  %v2524_v63 = vmax.f32 %v2460_v6, 0.0  ;;  %v4304_v2 = vld [vmem:[%s8761_s6 + $0xa0] sm:$0xff]  ;;  %v9462_v36 = vld [vmem:[#allocation87_spill] sm:$0xff] }
 0x188   :  { %4243 = vset.pattern.permute.xlu1 %v9205_v23  ;;  %v2957_v11 = vmul.f32 %v2893_v40, %v1993_v5  ;;  %v6661_v7 = vmul.f32 %v6579_v37, %v6579_v37  ;;  %v1521_v5 = vsub.f32 1.5, %v6628_v30  ;;  %v6665_v40 = vmul.f32 %v1844_v20, %v1588_v26 }
 0x189   :  { %1224 = vperm.xlu1 %4243, %v6634_v0   ;;  %9458 = vst [vmem:[#allocation299_spill] sm:$0xff] %v6656_v50  ;;  %v1843_v17 = vmul.f32 0.5, %v1587_v18  ;;  %v2797_v58 = vmul.f32 0.5, %v2541_v27  ;;  %v6667_v13 = vand.u32 2147483647, %v1391_v60  ;;  %vm724_vm13 = vcmp.lt.f32.partialorder %v9462_v36, 0.5 }
 0x18a   :  { %4142 = vmatpush3.xpose.msra.mxu0 %v2957_v11  ;;  %9459 = vst [vmem:[#allocation300_spill] sm:$0xff] %v6661_v7  ;;  %9460 = vst [vmem:[#allocation301_spill] sm:$0xff] %v6665_v40  ;;  %v6678_v6 = vmul.f32 %v6589_v1, %v6589_v1  ;;  %v1520_v26 = vsub.f32 1.5, %v6647_v9  ;;  %v2444_v11 = vsub.f32 1.5, %v6649_v8  ;;  %v1842_v20 = vmul.f32 0.5, %v1586_v42 }
 0x18b   :  { %v6639_v14 = vpop.permute.xlu1 %2152  ;;  %9461 = vst [vmem:[#allocation302_spill] sm:$0xff] %v6667_v13  ;;  %v6684_v60 = vmul.f32 %v6593_v61, %v6593_v61  ;;  %v1585_v46 = vmax.f32 %v1521_v5, 0.0  ;;  %v6691_v1 = vmul.f32 %v6628_v30, %v6628_v30  ;;  %v6693_v31 = vpop.permute.xlu0 %1272  ;;  %v6695_v49 = vmul.f32 %v1843_v17, %v1587_v18 }
 0x18c   :  { %9463 = vst [vmem:[#allocation87_spill] sm:$0xff] %v6678_v6  ;;  %v6697_v40 = vmul.f32 %v2797_v58, %v2541_v27  ;;  %v2652_v41 = vmul.f32 %v6602_v22, %v6602_v22  ;;  %v1519_v3 = vsub.f32 1.5, %v6667_v13  ;;  %v1584_v30 = vmax.f32 %v1520_v26, 0.0  ;;  %v9466_v27 = vld [vmem:[#allocation223_spill] sm:$0xff] }
 0x18d   :  { %4244 = vset.pattern.permute.xlu1 %v9212_v47  ;;  %9464 = vst [vmem:[#allocation303_spill] sm:$0xff] %v6691_v1  ;;  %9465 = vst [vmem:[#allocation304_spill] sm:$0xff] %v6695_v49  ;;  %v2508_v50 = vmax.f32 %v2444_v11, 0.0  ;;  %v2348_v18 = vsub.f32 %v6433_v12, %v6285_v25  ;;  %vm1608_vm14 = vcmp.lt.f32.partialorder %v9466_v27, 0.5  ;;  %v6711_v17 = vmul.f32 %v1842_v20, %v1586_v42  ;;  %v9469_v11 = vld [vmem:[#allocation43_spill] sm:$0xff] }
 0x18e   :  { %2124 = vperm.xlu1 %4244, %v4304_v2   ;;  %v2780_v2 = vmul.f32 0.5, %v2524_v63  ;;  %v6714_v48 = vand.u32 2147483647, %v1390_v29  ;;  %v6716_v33 = vmul.f32 %v1832_v53, %v1576_v45  ;;  %v1841_v7 = vmul.f32 0.5, %v1585_v46 }
 0x18f   :  { %v6672_v43 = vpop.permute.xlu1 %2088  ;;  %9467 = vst [vmem:[#allocation223_spill] sm:$0xff] %v6711_v17  ;;  %v1389_v26 = vsub.f32 %v6597_v39, %v5716_v28  ;;  %vm708_vm15 = vcmp.lt.f32.partialorder %v9469_v11, 0.5  ;;  %v6724_v12 = vmul.f32 %v6647_v9, %v6647_v9  ;;  %v2716_v42 = vsub.f32 0.75, %v2652_v41 }
 0x190   :  { %v2844_v49 = vmul.f32 %v2780_v2, %v2524_v63  ;;  %9468 = vst [vmem:[#allocation305_spill] sm:$0xff] %v6714_v48  ;;  %v1583_v20 = vmax.f32 %v1519_v3, 0.0  ;;  %v9471_v63 = vld [vmem:[#allocation277_spill] sm:$0xff]  ;;  %v1840_v53 = vmul.f32 0.5, %v1584_v30  ;;  %vm2588_vm0 = vcmp.lt.f32.partialorder %v6602_v22, 0.5 }
 0x191   :  { %9470 = vst [vmem:[#allocation43_spill] sm:$0xff] %v6724_v12  ;;  %v9472_v29 = vsub.f32 0.75, %v9471_v63  ;;  %v2764_v39 = vmul.f32 0.5, %v2508_v50  ;;  %v6733_v2 = vand.u32 2147483647, %v2348_v18  ;;  %v2636_v41 = vmul.f32 %v6649_v8, %v6649_v8  ;;  %v9474_v63 = vld [vmem:[#allocation105_spill] sm:$0xff] }
 0x192   :  { %2060 = vperm.xlu1 %4244, %v4305_v55   ;;  %v6735_v55 = vpop.permute.xlu0 %2296  ;;  %v1518_v3 = vsub.f32 1.5, %v6714_v48  ;;  %v6747_v22 = vand.u32 2147483647, %v1389_v26  ;;  %v1383_v18 = vsub.f32 %v6463_v35, %v5716_v28  ;;  %v2331_v9 = vsub.f32 %v6501_v34, %v6285_v25  ;;  %v6767_v34 = vld [vmem:[%s8761_s6 + $0x118] sm:$0xff] }
 0x193   :  { %v6705_v5 = vpop.permute.xlu1 %2216  ;;  %v1944_v45 = vsel %vm1624_vm12, %v9472_v29, %v6373_v19  ;;  %v9476_v19 = vsub.f32 0.75, %v9475_v44  ;;  %v2908_v29 = vsel %vm2588_vm0, %v2716_v42, %v2844_v49  ;;  %v6753_v1 = vmul.f32 %v1841_v7, %v1585_v46 }
 0x194   :  { %9477 = vst [vmem:[#allocation105_spill] sm:$0xff] %v6747_v22  ;;  %v6758_v44 = vmul.f32 %v6667_v13, %v6667_v13  ;;  %v1839_v36 = vmul.f32 0.5, %v1583_v20  ;;  %v2828_v49 = vmul.f32 %v2764_v39, %v2508_v50  ;;  %v2476_v26 = vsub.f32 1.5, %v6733_v2 }
 0x195   :  { %9478 = vst [vmem:[#allocation98_spill] sm:$0xff] %v6753_v1  ;;  %v6762_v35 = vand.u32 2147483647, %v2331_v9  ;;  %v6770_v46 = vmul.f32 %v1840_v53, %v1584_v30  ;;  %vm2572_vm1 = vcmp.lt.f32.partialorder %v6649_v8, 0.5  ;;  %v1582_v7 = vmax.f32 %v1518_v3, 0.0 }
 0x196   :  { %2188 = vperm.xlu1 %4244, %v6634_v0   ;;  %v1044_v0 = vsel %vm724_vm13, %v9476_v19, %v9474_v63  ;;  %9479 = vst [vmem:[#allocation306_spill] sm:$0xff] %v6758_v44  ;;  %v1388_v50 = vsub.f32 %v6651_v62, %v5716_v28  ;;  %v6779_v9 = vmul.f32 %v6714_v48, %v6714_v48  ;;  %v1517_v39 = vsub.f32 1.5, %v6747_v22  ;;  %v2293_v30 = vpop.permute.xlu0 %2292  ;;  %v9488_v48 = vld [vmem:[#allocation243_spill] sm:$0xff] }
 0x197   :  { %v2008_v58 = vmul.f32 %v1944_v45, %v1044_v0  ;;  %9480 = vst [vmem:[#allocation307_spill] sm:$0xff] %v6770_v46  ;;  %v6782_v63 = vand.u32 2147483647, %v1383_v18  ;;  %v6785_v19 = vmul.f32 %v1839_v36, %v1583_v20  ;;  %v6789_v62 = vmul.f32 %v6733_v2, %v6733_v2  ;;  %v9485_v0 = vld [vmem:[#allocation63_spill] sm:$0xff] }
 0x198   :  { %v6737_v21 = vpop.permute.xlu1 %1248  ;;  %9482 = vst [vmem:[#allocation309_spill] sm:$0xff] %v6779_v9  ;;  %v2540_v3 = vmax.f32 %v2476_v26, 0.0  ;;  %v1838_v53 = vmul.f32 0.5, %v1582_v7  ;;  %v6805_v44 = vand.u32 2147483647, %v1388_v50  ;;  %v1387_v26 = vsub.f32 %v6693_v31, %v5716_v28  ;;  %v9502_v9 = vld [vmem:[#allocation217_spill] sm:$0xff] }
 0x199   :  { %9473 = vst [vmem:[#allocation277_spill] sm:$0xff] %v6737_v21  ;;  %v2972_v42 = vmul.f32 %v2908_v29, %v2008_v58  ;;  %v2700_v58 = vsub.f32 0.75, %v2636_v41  ;;  %9483 = vst [vmem:[#allocation310_spill] sm:$0xff] %v6785_v19  ;;  %v2459_v41 = vsub.f32 1.5, %v6762_v35  ;;  %v9486_v29 = vld [vmem:[#allocation54_spill] sm:$0xff]  ;;  %v1581_v8 = vmax.f32 %v1517_v39, 0.0 }
 0x19a   :  { %4245 = vset.pattern.permute.xlu1 %v9205_v23  ;;  %9484 = vst [vmem:[#allocation311_spill] sm:$0xff] %v6789_v62  ;;  %v9487_v6 = vsub.f32 0.75, %v9486_v29  ;;  %9491 = vst [vmem:[#allocation63_spill] sm:$0xff] %v6805_v44  ;;  %v2315_v27 = vsub.f32 %v6532_v59, %v6285_v25  ;;  %v1382_v39 = vsub.f32 %v6599_v38, %v5716_v28  ;;  %vm1607_vm5 = vcmp.lt.f32.partialorder %v9502_v9, 0.5  ;;  %v9516_v62 = vld [vmem:[#allocation240_spill] sm:$0xff] }
 0x19b   :  { %1220 = vperm.xlu1 %4245, %v6767_v34   ;;  %4143 = vmatprep.subr.mxu0 %v2972_v42  ;;  %v9489_v42 = vld [vmem:[#allocation235_spill] sm:$0xff]  ;;  %v2892_v36 = vsel %vm2572_vm1, %v2700_v58, %v2828_v49  ;;  %v9493_v49 = vld [vmem:[#allocation92_spill] sm:$0xff]  ;;  %v2523_v50 = vmax.f32 %v2459_v41, 0.0  ;;  %v6828_v59 = vmul.f32 %v1838_v53, %v1582_v7  ;;  %v6832_v41 = vmul.f32 %v6747_v22, %v6747_v22 }
 0x19c   :  { %v1028_v18 = vsel %vm708_vm15, %v9487_v6, %v9485_v0  ;;  %v9490_v13 = vsub.f32 0.75, %v9489_v42  ;;  %v4307_v6 = vld [vmem:[%s8761_s6 + $0x98] sm:$0xff]  ;;  %vm723_vm2 = vcmp.lt.f32.partialorder %v9493_v49, 0.5  ;;  %v2347_v0 = vsub.f32 %v6565_v10, %v6285_v25 }
 0x19d   :  { %v6775_v45 = vpop.permute.xlu1 %2148  ;;  %v6822_v42 = vand.u32 2147483647, %v2315_v27  ;;  %9495 = vst [vmem:[#allocation243_spill] sm:$0xff] %v6828_v59  ;;  %9496 = vst [vmem:[#allocation235_spill] sm:$0xff] %v6832_v41  ;;  %v6835_v10 = vand.u32 2147483647, %v1387_v26  ;;  %v6847_v27 = vmul.f32 %v6782_v63, %v6782_v63 }
 0x19e   :  { %9481 = vst [vmem:[#allocation308_spill] sm:$0xff] %v6775_v45  ;;  %v1928_v20 = vsel %vm1608_vm14, %v9490_v13, %v9488_v48  ;;  %v1511_v13 = vsub.f32 1.5, %v6782_v63  ;;  %v9494_v48 = vld [vmem:[#allocation265_spill] sm:$0xff]  ;;  %v1837_v7 = vmul.f32 0.5, %v1581_v8  ;;  %v2779_v31 = vmul.f32 0.5, %v2523_v50 }
 0x19f   :  { %4246 = vset.pattern.permute.xlu1 %v9212_v47  ;;  %v1992_v29 = vmul.f32 %v1928_v20, %v1028_v18  ;;  %v2796_v18 = vmul.f32 0.5, %v2540_v3  ;;  %v2365_v20 = vsub.f32 %v2293_v30, %v6285_v25  ;;  %vm1623_vm3 = vcmp.lt.f32.partialorder %v9494_v48, 0.5  ;;  %9497 = vst [vmem:[#allocation92_spill] sm:$0xff] %v6835_v10  ;;  %v4308_v30 = vld [vmem:[%s8761_s6 + $0x18] sm:$0xff] }
 0x1a0   :  { %2120 = vperm.xlu1 %4246, %v4307_v6   ;;  %v2289_v6 = vpop.permute.xlu0 %2288  ;;  %v6843_v53 = vmax.f32 %v1511_v13, 0.0  ;;  %v2443_v26 = vsub.f32 1.5, %v6822_v42  ;;  %v6854_v22 = vand.u32 2147483647, %v2347_v0  ;;  %v6862_v12 = vand.u32 2147483647, %v1382_v39 }
 0x1a1   :  { %v6812_v11 = vpop.permute.xlu1 %2084  ;;  %v2956_v58 = vmul.f32 %v2892_v36, %v1992_v29  ;;  %v1516_v36 = vsub.f32 1.5, %v6805_v44  ;;  %v9499_v29 = vld [vmem:[#allocation44_spill] sm:$0xff]  ;;  %v6858_v59 = vmul.f32 %v2796_v18, %v2540_v3  ;;  %v6860_v19 = vand.u32 2147483647, %v2365_v20 }
 0x1a2   :  { %9492 = vst [vmem:[#allocation54_spill] sm:$0xff] %v6812_v11  ;;  %vm707_vm4 = vcmp.lt.f32.partialorder %v9499_v29, 0.5  ;;  %9500 = vst [vmem:[#allocation44_spill] sm:$0xff] %v6847_v27  ;;  %v2507_v13 = vmax.f32 %v2443_v26, 0.0  ;;  %v1515_v0 = vsub.f32 1.5, %v6835_v10  ;;  %v1831_v3 = vmul.f32 0.5, %v6843_v53 }
 0x1a3   :  { %4144 = vmatpush3.xpose.msra.mxu0 %v2956_v58  ;;  %v6852_v58 = vmul.f32 %v6805_v44, %v6805_v44  ;;  %9503 = vst [vmem:[#allocation217_spill] sm:$0xff] %v6858_v59  ;;  %v6865_v1 = vmax.f32 %v1516_v36, 0.0  ;;  %v2651_v44 = vmul.f32 %v6762_v35, %v6762_v35  ;;  %v2366_v20 = vsub.f32 %v6735_v55, %v6285_v25  ;;  %v9507_v36 = vld [vmem:[#allocation102_spill] sm:$0xff]  ;;  %v9510_v11 = vld [vmem:[#allocation276_spill] sm:$0xff] }
 0x1a4   :  { %2056 = vperm.xlu1 %4246, %v4308_v30   ;;  %v2364_v30 = vsub.f32 %v2289_v6, %v6285_v25  ;;  %v2763_v18 = vmul.f32 0.5, %v2507_v13  ;;  %v6877_v26 = vmul.f32 %v1837_v7, %v1581_v8  ;;  %v2843_v46 = vmul.f32 %v2779_v31, %v2523_v50  ;;  %v9517_v59 = vld [vmem:[#allocation230_spill] sm:$0xff] }
 0x1a5   :  { %v6840_v38 = vpop.permute.xlu1 %2212  ;;  %9501 = vst [vmem:[#allocation312_spill] sm:$0xff] %v6852_v58  ;;  %v2475_v6 = vsub.f32 1.5, %v6854_v22  ;;  %v2493_v17 = vsub.f32 1.5, %v6860_v19  ;;  %v1836_v55 = vmul.f32 0.5, %v6865_v1  ;;  %vm2587_vm6 = vcmp.lt.f32.partialorder %v6762_v35, 0.5  ;;  %v2285_v35 = vpop.permute.xlu0 %2284 }
 0x1a6   :  { %9498 = vst [vmem:[#allocation265_spill] sm:$0xff] %v6840_v38  ;;  %9505 = vst [vmem:[#allocation314_spill] sm:$0xff] %v6877_v26  ;;  %v6880_v41 = vand.u32 2147483647, %v2364_v30  ;;  %v1510_v38 = vsub.f32 1.5, %v6862_v12  ;;  %v2715_v8 = vsub.f32 0.75, %v2651_v44  ;;  %v2827_v31 = vmul.f32 %v2763_v18, %v2507_v13 }
 0x1a7   :  { %v1579_v7 = vmax.f32 %v1515_v0, 0.0  ;;  %v6890_v50 = vand.u32 2147483647, %v2366_v20  ;;  %v9506_v30 = vld [vmem:[#allocation107_spill] sm:$0xff]  ;;  %v9508_v58 = vsub.f32 0.75, %v9507_v36  ;;  %v9511_v45 = vsub.f32 0.75, %v9510_v11 }
 0x1a8   :  { %2184 = vperm.xlu1 %4246, %v6767_v34   ;;  %v2635_v34 = vmul.f32 %v6822_v42, %v6822_v42  ;;  %v6905_v44 = vld [vmem:[%s8761_s6 + $0x110] sm:$0xff]  ;;  %vm2571_vm7 = vcmp.lt.f32.partialorder %v6822_v42, 0.5  ;;  %v2492_v13 = vsub.f32 1.5, %v6880_v41  ;;  %v2539_v18 = vmax.f32 %v2475_v6, 0.0  ;;  %v9513_v36 = vld [vmem:[#allocation65_spill] sm:$0xff]  ;;  %v9522_v42 = vld [vmem:[#allocation278_spill] sm:$0xff] }
 0x1a9   :  { %v1043_v26 = vsel %vm723_vm2, %v9508_v58, %v9506_v30  ;;  %v2907_v58 = vsel %vm2587_vm6, %v2715_v8, %v2843_v46  ;;  %v2557_v48 = vmax.f32 %v2493_v17, 0.0  ;;  %v9514_v30 = vld [vmem:[#allocation57_spill] sm:$0xff]  ;;  %v6926_v17 = vmul.f32 %v6835_v10, %v6835_v10  ;;  %v9535_v10 = vld [vmem:[#allocation275_spill] sm:$0xff] }
 0x1aa   :  { %v6875_v39 = vpop.permute.xlu1 %1244  ;;  %v2699_v11 = vsub.f32 0.75, %v2635_v34  ;;  %v9515_v21 = vsub.f32 0.75, %v9514_v30  ;;  %v2494_v29 = vsub.f32 1.5, %v6890_v50  ;;  %v2363_v9 = vsub.f32 %v2285_v35, %v6285_v25  ;;  %v2281_v35 = vpop.permute.xlu0 %2280 }
 0x1ab   :  { %9504 = vst [vmem:[#allocation313_spill] sm:$0xff] %v6875_v39  ;;  %v9509_v39 = vld [vmem:[#allocation282_spill] sm:$0xff]  ;;  %9519 = vst [vmem:[#allocation102_spill] sm:$0xff] %v6926_v17  ;;  %vm1642_vm8 = vcmp.lt.f32.partialorder %v9522_v42, 0.5  ;;  %v6945_v34 = vmul.f32 %v6860_v19, %v6860_v19  ;;  %v6949_v8 = vmul.f32 %v6862_v12, %v6862_v12  ;;  %vm2621_vm11 = vcmp.lt.f32.partialorder %v6860_v19, 0.5  ;;  %v9531_v17 = vld [vmem:[#allocation287_spill] sm:$0xff] }
 0x1ac   :  { %4247 = vset.pattern.permute.xlu1 %v9205_v23  ;;  %v1943_v27 = vsel %vm1623_vm3, %v9511_v45, %v9509_v39  ;;  %v1574_v45 = vmax.f32 %v1510_v38, 0.0  ;;  %v2330_v39 = vsub.f32 %v6639_v14, %v6285_v25  ;;  %v1027_v28 = vsel %vm707_vm4, %v9515_v21, %v9513_v36  ;;  %v9530_v36 = vld [vmem:[#allocation283_spill] sm:$0xff] }
 0x1ad   :  { %1216 = vperm.xlu1 %4247, %v6905_v44   ;;  %v2007_v49 = vmul.f32 %v1943_v27, %v1043_v26  ;;  %v9518_v27 = vsub.f32 0.75, %v9517_v59  ;;  %v1835_v38 = vmul.f32 0.5, %v1579_v7  ;;  %v2891_v14 = vsel %vm2571_vm7, %v2699_v11, %v2827_v31  ;;  %9523 = vst [vmem:[#allocation65_spill] sm:$0xff] %v6949_v8  ;;  %v9544_v8 = vld [vmem:[#allocation170_spill] sm:$0xff]  ;;  %v4313_v19 = vld [vmem:[%s8761_s6 + $0x88] sm:$0xff] }
 0x1ae   :  { %v6934_v21 = vmul.f32 %v6854_v22, %v6854_v22  ;;  %v2556_v59 = vmax.f32 %v2492_v13, 0.0  ;;  %v2795_v26 = vmul.f32 0.5, %v2539_v18  ;;  %v6952_v13 = vmul.f32 %v1831_v3, %v6843_v53 }
 0x1af   :  { %v6910_v0 = vpop.permute.xlu1 %2144  ;;  %v2971_v20 = vmul.f32 %v2907_v58, %v2007_v49  ;;  %v1927_v46 = vsel %vm1607_vm5, %v9518_v27, %v9516_v62  ;;  %v4310_v62 = vld [vmem:[%s8761_s6 + $0x90] sm:$0xff]  ;;  %v2813_v49 = vmul.f32 0.5, %v2557_v48  ;;  %v1830_v58 = vmul.f32 0.5, %v1574_v45 }
 0x1b0   :  { %9512 = vst [vmem:[#allocation107_spill] sm:$0xff] %v6910_v0  ;;  %v1991_v6 = vmul.f32 %v1927_v46, %v1027_v28  ;;  %9520 = vst [vmem:[#allocation282_spill] sm:$0xff] %v6934_v21  ;;  %v6954_v11 = vand.u32 2147483647, %v2330_v39  ;;  %v6960_v30 = vmul.f32 %v1835_v38, %v1579_v7  ;;  %v6964_v27 = vmul.f32 %v6880_v41, %v6880_v41  ;;  %v9526_v46 = vld [vmem:[#allocation280_spill] sm:$0xff]  ;;  %v9532_v7 = vld [vmem:[#allocation131_spill] sm:$0xff] }
 0x1b1   :  { %4248 = vset.pattern.permute.xlu1 %v9212_v47  ;;  %4145 = vmatprep.subr.mxu0 %v2971_v20  ;;  %v6957_v20 = vmul.f32 %v1836_v55, %v6865_v1  ;;  %vm1657_vm9 = vcmp.lt.f32.partialorder %v9526_v46, 0.5  ;;  %v2558_v53 = vmax.f32 %v2494_v29, 0.0  ;;  %v2686_v3 = vmul.f32 %v6890_v50, %v6890_v50  ;;  %v4311_v1 = vld [vmem:[%s8761_s6 + $0x10] sm:$0xff]  ;;  %v7001_v29 = vpop.permute.xlu0 %2276  ;;  %v9555_v46 = vld [vmem:[#allocation202_spill] sm:$0xff] }
 0x1b2   :  { %2116 = vperm.xlu1 %4248, %v4310_v62   ;;  %v2955_v31 = vmul.f32 %v2891_v14, %v1991_v6  ;;  %9525 = vst [vmem:[#allocation240_spill] sm:$0xff] %v6960_v30  ;;  %v2812_v39 = vmul.f32 0.5, %v2556_v59  ;;  %v6969_v6 = vand.u32 2147483647, %v2363_v9  ;;  %v6977_v38 = vmul.f32 %v2795_v26, %v2539_v18  ;;  %v9528_v62 = vld [vmem:[#allocation176_spill] sm:$0xff] }
 0x1b3   :  { %v6940_v28 = vpop.permute.xlu1 %2080  ;;  %9524 = vst [vmem:[#allocation57_spill] sm:$0xff] %v6957_v20  ;;  %vm757_vm10 = vcmp.lt.f32.partialorder %v9528_v62, 0.5  ;;  %v6983_v9 = vmul.f32 %v2813_v49, %v2557_v48  ;;  %v1914_v30 = vmul.f32 %v9531_v17, %v9530_v36  ;;  %vm741_vm12 = vcmp.lt.f32.partialorder %v9532_v7, 0.5  ;;  %v9534_v49 = vld [vmem:[#allocation198_spill] sm:$0xff]  ;;  %v9564_v7 = vld [vmem:[#allocation300_spill] sm:$0xff] }
 0x1b4   :  { %9521 = vst [vmem:[#allocation276_spill] sm:$0xff] %v6940_v28  ;;  %4146 = vmatpush3.xpose.msra.mxu0 %v2955_v31  ;;  %v6985_v31 = vmul.f32 %v1830_v58, %v1574_v45  ;;  %vm1641_vm13 = vcmp.lt.f32.partialorder %v6475_v54, 0.5  ;;  %v6995_v26 = vmul.f32 %v6954_v11, %v6954_v11  ;;  %v2314_v48 = vsub.f32 %v6672_v43, %v6285_v25  ;;  %v9533_v45 = vld [vmem:[#allocation194_spill] sm:$0xff]  ;;  %v9536_v43 = vld [vmem:[#allocation284_spill] sm:$0xff] }
 0x1b5   :  { %v1014_v58 = vmul.f32 %v9534_v49, %v9533_v45  ;;  %v7003_v14 = vmul.f32 %v2812_v39, %v2556_v59  ;;  %v2491_v17 = vsub.f32 1.5, %v6969_v6  ;;  %v2362_v36 = vsub.f32 %v2281_v35, %v6285_v25  ;;  %v9540_v59 = vld [vmem:[#allocation142_spill] sm:$0xff] }
 0x1b6   :  { %2052 = vperm.xlu1 %4248, %v4311_v1   ;;  %9529 = vst [vmem:[#allocation278_spill] sm:$0xff] %v6985_v31  ;;  %v2458_v1 = vsub.f32 1.5, %v6954_v11  ;;  %vm1658_vm14 = vcmp.lt.f32.partialorder %v9535_v10, 0.5  ;;  %v7011_v18 = vmul.f32 %v6969_v6, %v6969_v6  ;;  %v9537_v20 = vsub.f32 0.75, %v9536_v43  ;;  %v9541_v35 = vld [vmem:[#allocation150_spill] sm:$0xff] }
 0x1b7   :  { %v6974_v55 = vpop.permute.xlu1 %2208  ;;  %v2750_v45 = vsub.f32 0.75, %v2686_v3  ;;  %v2814_v49 = vmul.f32 0.5, %v2558_v53  ;;  %vm1656_vm15 = vcmp.lt.f32.partialorder %v6369_v24, 0.5  ;;  %vm2605_vm0 = vcmp.lt.f32.partialorder %v6579_v37, 0.5  ;;  %v9542_v3 = vld [vmem:[#allocation191_spill] sm:$0xff]  ;;  %v9561_v62 = vld [vmem:[#allocation146_spill] sm:$0xff] }
 0x1b8   :  { %9527 = vst [vmem:[#allocation230_spill] sm:$0xff] %v6974_v55  ;;  %v1978_v55 = vsel %vm1658_vm14, %v9537_v20, %v1914_v30  ;;  %vm2620_vm1 = vcmp.lt.f32.partialorder %v6880_v41, 0.5  ;;  %v7020_v10 = vmax.f32 %v2458_v1, 0.0  ;;  %vm2622_vm3 = vcmp.lt.f32.partialorder %v6890_v50, 0.5  ;;  %v9574_v24 = vld [vmem:[#allocation216_spill] sm:$0xff] }
 0x1b9   :  { %v998_v39 = vmul.f32 %v9541_v35, %v9540_v59  ;;  %v2714_v20 = vsub.f32 0.75, %v6995_v26  ;;  %v7027_v30 = vand.u32 2147483647, %v2314_v48  ;;  %v9543_v43 = vsub.f32 0.75, %v9542_v3 }
 0x1ba   :  { %2180 = vperm.xlu1 %4248, %v6905_v44   ;;  %v9539_v44 = vld [vmem:[#allocation179_spill] sm:$0xff]  ;;  %v2878_v0 = vmul.f32 %v2814_v49, %v2558_v53  ;;  %vm756_vm4 = vcmp.lt.f32.partialorder %v9544_v8, 0.5  ;;  %v7032_v31 = vand.u32 2147483647, %v2362_v36  ;;  %v2798_v59 = vmul.f32 0.5, %v6537_v57  ;;  %v7045_v36 = vpop.permute.xlu0 %2272 }
 0x1bb   :  { %vm758_vm2 = vcmp.lt.f32.partialorder %v9539_v44, 0.5  ;;  %v9545_v44 = vld [vmem:[#allocation285_spill] sm:$0xff]  ;;  %v7041_v48 = vmax.f32 %v2491_v17, 0.0  ;;  %v2734_v53 = vsub.f32 0.75, %v6541_v4  ;;  %v9550_v4 = vld [vmem:[#allocation124_spill] sm:$0xff]  ;;  %vm1640_vm7 = vcmp.lt.f32.partialorder %v6593_v61, 0.5 }
 0x1bc   :  { %v7015_v28 = vpop.permute.xlu1 %1240  ;;  %v9546_v21 = vsub.f32 0.75, %v9545_v44  ;;  %v2942_v35 = vsel %vm2622_vm3, %v2750_v45, %v2878_v0  ;;  %v2862_v17 = vmul.f32 %v2798_v59, %v6537_v57  ;;  %v2346_v0 = vsub.f32 %v6705_v5, %v6285_v25  ;;  %v9553_v5 = vld [vmem:[#allocation263_spill] sm:$0xff] }
 0x1bd   :  { %9538 = vst [vmem:[#allocation280_spill] sm:$0xff] %v7015_v28  ;;  %v1078_v28 = vsel %vm758_vm2, %v9543_v43, %v1014_v58  ;;  %v9547_v58 = vld [vmem:[#allocation130_spill] sm:$0xff]  ;;  %vm740_vm6 = vcmp.lt.f32.partialorder %v9550_v4, 0.5  ;;  %v2442_v49 = vsub.f32 1.5, %v7027_v30  ;;  %vm2606_vm14 = vcmp.lt.f32.partialorder %v6458_v32, 0.5 }
 0x1be   :  { %v2042_v1 = vmul.f32 %v1978_v55, %v1078_v28  ;;  %v1962_v50 = vsel %vm1642_vm8, %v9546_v21, %v6456_v15  ;;  %4249 = vset.pattern.permute.xlu1 %v9205_v23  ;;  %vm742_vm5 = vcmp.lt.f32.partialorder %v9547_v58, 0.5  ;;  %v7050_v28 = vld [vmem:[%s8761_s6 + $0x108] sm:$0xff]  ;;  %vm2604_vm8 = vcmp.lt.f32.partialorder %v6733_v2, 0.5 }
 0x1bf   :  { %1212 = vperm.xlu1 %4249, %v7050_v28   ;;  %v9548_v21 = vld [vmem:[#allocation143_spill] sm:$0xff]  ;;  %vm1622_vm2 = vcmp.lt.f32.partialorder %v9553_v5, 0.5  ;;  %v2926_v44 = vsel %vm2606_vm14, %v2734_v53, %v2862_v17  ;;  %v2361_v59 = vsub.f32 %v7001_v29, %v6285_v25  ;;  %v9558_v53 = vsub.f32 0.75, %v6945_v34 }
 0x1c0   :  { %v3006_v15 = vmul.f32 %v2942_v35, %v2042_v1  ;;  %v9549_v42 = vsub.f32 0.75, %v9548_v21  ;;  %v2490_v1 = vsub.f32 1.5, %v7032_v31  ;;  %v2778_v35 = vmul.f32 0.5, %v7020_v10 }
 0x1c1   :  { %v7058_v45 = vpop.permute.xlu1 %2140  ;;  %v2941_v29 = vsel %vm2621_vm11, %v9558_v53, %v6983_v9  ;;  %v7094_v54 = vmul.f32 %v7027_v30, %v7027_v30  ;;  %v9562_v17 = vsub.f32 0.75, %v9561_v62  ;;  %vm1655_vm11 = vcmp.lt.f32.partialorder %v6420_v52, 0.5  ;;  %v9566_v53 = vld [vmem:[#allocation125_spill] sm:$0xff] }
 0x1c2   :  { %v1062_v55 = vsel %vm742_vm5, %v9549_v42, %v998_v39  ;;  %v9551_v39 = vld [vmem:[#allocation286_spill] sm:$0xff]  ;;  %4175 = vmatprep.subr.mxu1 %v3006_v15  ;;  %vm739_vm3 = vcmp.lt.f32.partialorder %v9566_v53, 0.5  ;;  %v9571_v62 = vld [vmem:[#allocation289_spill] sm:$0xff]  ;;  %v2360_v8 = vsub.f32 %v7045_v36, %v6285_v25  ;;  %v2842_v41 = vmul.f32 %v2778_v35, %v7020_v10  ;;  %v4314_v36 = vld [vmem:[%s8761_s6 + $0x8] sm:$0xff] }
 0x1c3   :  { %v2026_v3 = vmul.f32 %v1962_v50, %v1062_v55  ;;  %v9552_v43 = vsub.f32 0.75, %v9551_v39  ;;  %v9554_v50 = vsub.f32 0.75, %v6527_v51  ;;  %4250 = vset.pattern.permute.xlu1 %v9212_v47  ;;  %v9559_v51 = vld [vmem:[#allocation82_spill] sm:$0xff]  ;;  %v9560_v55 = vld [vmem:[#allocation155_spill] sm:$0xff]  ;;  %v2506_v39 = vmax.f32 %v2442_v49, 0.0  ;;  %v9579_v35 = vld [vmem:[#allocation217_spill] sm:$0xff] }
 0x1c4   :  { %v1061_v34 = vsel %vm741_vm12, %v9562_v17, %v9560_v55  ;;  %2112 = vperm.xlu1 %4250, %v4313_v19   ;;  %vm2619_vm12 = vcmp.lt.f32.partialorder %v6969_v6, 0.5  ;;  %v9572_v17 = vsub.f32 0.75, %v9571_v62  ;;  %v9578_v10 = vsub.f32 0.75, %v6684_v60  ;;  %v9599_v52 = vld [vmem:[#allocation149_spill] sm:$0xff] }
 0x1c5   :  { %v1977_v57 = vsel %vm1657_vm9, %v9552_v43, %v6504_v16  ;;  %v1961_v32 = vsel %vm1641_vm13, %v9554_v50, %v6654_v56  ;;  %v2990_v58 = vmul.f32 %v2926_v44, %v2026_v3  ;;  %v9556_v16 = vld [vmem:[#allocation192_spill] sm:$0xff]  ;;  %vm722_vm9 = vcmp.lt.f32.partialorder %v9559_v51, 0.5  ;;  %v7106_v9 = vpop.permute.xlu1 %2076  ;;  %v9563_v3 = vld [vmem:[#allocation175_spill] sm:$0xff]  ;;  %v7117_v50 = vpop.permute.xlu0 %2268 }
 0x1c6   :  { %v9557_v21 = vsub.f32 0.75, %v9556_v16  ;;  %v7096_v56 = vand.u32 2147483647, %v2346_v0  ;;  %vm2586_vm13 = vcmp.lt.f32.partialorder %v6954_v11, 0.5  ;;  %v2811_v0 = vmul.f32 0.5, %v7041_v48  ;;  %v9596_v11 = vld [vmem:[#allocation295_spill] sm:$0xff] }
 0x1c7   :  { %4176 = vmatpush3.xpose.msra.mxu1 %v2990_v58  ;;  %v2025_v43 = vmul.f32 %v1961_v32, %v1061_v34  ;;  %v2554_v16 = vmax.f32 %v2490_v1, 0.0  ;;  %v9567_v32 = vld [vmem:[#allocation193_spill] sm:$0xff]  ;;  %v9568_v58 = vld [vmem:[#allocation187_spill] sm:$0xff]  ;;  %v9573_v1 = vsub.f32 0.75, %v6964_v27  ;;  %vm2570_vm14 = vcmp.lt.f32.partialorder %v7027_v30, 0.5 }
 0x1c8   :  { %v1077_v42 = vsel %vm757_vm10, %v9557_v21, %v9555_v46  ;;  %vm755_vm10 = vcmp.lt.f32.partialorder %v9563_v3, 0.5  ;;  %v2747_v46 = vsub.f32 0.75, %v7011_v18  ;;  %v7121_v21 = vand.u32 2147483647, %v2361_v59  ;;  %2048 = vperm.xlu1 %4250, %v4314_v36  }
 0x1c9   :  { %v2041_v15 = vmul.f32 %v1977_v57, %v1077_v42  ;;  %v9565_v57 = vsub.f32 0.75, %v9564_v7  ;;  %v9569_v55 = vsub.f32 0.75, %v9568_v58  ;;  %v2940_v59 = vsel %vm2620_vm1, %v9573_v1, %v7003_v14  ;;  %v7180_v60 = vpop.permute.xlu0 %2264  ;;  %v9584_v1 = vld [vmem:[#allocation17_spill] sm:$0xff] }
 0x1ca   :  { %v2875_v27 = vmul.f32 %v2811_v0, %v7041_v48  ;;  %v2698_v14 = vsub.f32 0.75, %v7094_v54  ;;  %v2762_v7 = vmul.f32 0.5, %v2506_v39  ;;  %v1960_v48 = vsel %vm1640_vm7, %v9578_v10, %v6716_v33  ;;  %v9580_v0 = vld [vmem:[#allocation311_spill] sm:$0xff]  ;;  %v9589_v10 = vld [vmem:[#allocation281_spill] sm:$0xff] }
 0x1cb   :  { %v2925_v44 = vsel %vm2605_vm0, %v9565_v57, %v6697_v40  ;;  %v3005_v42 = vmul.f32 %v2941_v29, %v2041_v15  ;;  %v1076_v37 = vsel %vm756_vm4, %v9569_v55, %v9567_v32  ;;  %v9570_v40 = vld [vmem:[#allocation292_spill] sm:$0xff]  ;;  %v7141_v29 = vmul.f32 %v7032_v31, %v7032_v31 }
 0x1cc   :  { %v2989_v49 = vmul.f32 %v2925_v44, %v2025_v43  ;;  %v1976_v34 = vsel %vm1656_vm15, %v9572_v17, %v9570_v40  ;;  %v2474_v15 = vsub.f32 1.5, %v7096_v56  ;;  %v7146_v43 = vpop.permute.xlu1 %2204  ;;  %vm1606_vm15 = vcmp.lt.f32.partialorder %v9574_v24, 0.5  ;;  %v9575_v44 = vld [vmem:[#allocation147_spill] sm:$0xff]  ;;  %v9583_v40 = vld [vmem:[#allocation288_spill] sm:$0xff]  ;;  %2176 = vperm.xlu1 %4250, %v7050_v28   ;;  %v9616_v24 = vld [vmem:[#allocation298_spill] sm:$0xff] }
 0x1cd   :  { %4177 = vmatprep.subr.mxu1 %v3005_v42  ;;  %v2040_v19 = vmul.f32 %v1976_v34, %v1076_v37  ;;  %vm1639_vm0 = vcmp.lt.f32.partialorder %v6782_v63, 0.5  ;;  %vm2603_vm4 = vcmp.lt.f32.partialorder %v6854_v22, 0.5  ;;  %v9576_v42 = vld [vmem:[#allocation135_spill] sm:$0xff]  ;;  %v9582_v37 = vld [vmem:[#allocation37_spill] sm:$0xff]  ;;  %vm1654_vm5 = vcmp.lt.f32.partialorder %v9583_v40, 0.5 }
 0x1ce   :  { %4178 = vmatpush3.xpose.msra.mxu1 %v2989_v49  ;;  %v9577_v32 = vsub.f32 0.75, %v9576_v42  ;;  %v9581_v49 = vsub.f32 0.75, %v9580_v0  ;;  %vm706_vm1 = vcmp.lt.f32.partialorder %v9582_v37, 0.5  ;;  %v2810_v4 = vmul.f32 0.5, %v2554_v16  ;;  %v9587_v42 = vld [vmem:[#allocation95_spill] sm:$0xff] }
 0x1cf   :  { %v3004_v57 = vmul.f32 %v2940_v59, %v2040_v19  ;;  %v7177_v62 = vmul.f32 %v7096_v56, %v7096_v56  ;;  %v2489_v61 = vsub.f32 1.5, %v7121_v21  ;;  %v2746_v2 = vsub.f32 0.75, %v7141_v29  ;;  %v9585_v59 = vld [vmem:[#allocation277_spill] sm:$0xff]  ;;  %v9608_v22 = vld [vmem:[#allocation167_spill] sm:$0xff]  ;;  %v4316_v29 = vld [vmem:[%s8761_s6 + $0x80] sm:$0xff] }
 0x1d0   :  { %v1060_v58 = vsel %vm740_vm6, %v9577_v32, %v9575_v44  ;;  %v2924_v55 = vsel %vm2604_vm8, %v9581_v49, %v9579_v35  ;;  %vm2618_vm6 = vcmp.lt.f32.partialorder %v7032_v31, 0.5  ;;  %v2538_v17 = vmax.f32 %v2474_v15, 0.0  ;;  %v9586_v44 = vld [vmem:[#allocation101_spill] sm:$0xff]  ;;  %v7199_v15 = vpop.permute.xlu1 %1236  ;;  %4252 = vset.pattern.permute.xlu1 %v9205_v23 }
 0x1d1   :  { %v2024_v33 = vmul.f32 %v1960_v48, %v1060_v58  ;;  %v7184_v34 = vand.u32 2147483647, %v2360_v8  ;;  %4179 = vmatprep.subr.mxu1 %v3004_v57  ;;  %v1381_v19 = vsub.f32 %v9585_v59, %v9584_v1  ;;  %v9588_v32 = vsub.f32 0.75, %v9587_v42  ;;  %v9590_v48 = vld [vmem:[#allocation274_spill] sm:$0xff]  ;;  %v9592_v8 = vld [vmem:[#allocation161_spill] sm:$0xff] }
 0x1d2   :  { %v9591_v35 = vsub.f32 0.75, %v9590_v48  ;;  %vm754_vm7 = vcmp.lt.f32.partialorder %v9592_v8, 0.5  ;;  %v2826_v57 = vmul.f32 %v2762_v7, %v2506_v39  ;;  %v2359_v49 = vsub.f32 %v7117_v50, %v6285_v25  ;;  %v9594_v50 = vld [vmem:[#allocation188_spill] sm:$0xff] }
 0x1d3   :  { %v2988_v36 = vmul.f32 %v2924_v55, %v2024_v33  ;;  %v1042_v58 = vsel %vm722_vm9, %v9588_v32, %v9586_v44  ;;  %v2906_v51 = vsel %vm2586_vm13, %v2714_v20, %v2842_v41  ;;  %v2874_v33 = vmul.f32 %v2810_v4, %v2554_v16  ;;  %v9593_v44 = vld [vmem:[#allocation201_spill] sm:$0xff]  ;;  %v9597_v20 = vld [vmem:[#allocation290_spill] sm:$0xff] }
 0x1d4   :  { %v1942_v0 = vsel %vm1622_vm2, %v9591_v35, %v9589_v10  ;;  %v2730_v5 = vsub.f32 0.75, %v7177_v62  ;;  %v7209_v59 = vmax.f32 %v2489_v61, 0.0  ;;  %v7213_v28 = vmul.f32 %v7121_v21, %v7121_v21  ;;  %v9600_v10 = vld [vmem:[#allocation137_spill] sm:$0xff]  ;;  %v9602_v35 = vld [vmem:[#allocation44_spill] sm:$0xff] }
 0x1d5   :  { %v2006_v55 = vmul.f32 %v1942_v0, %v1042_v58  ;;  %4180 = vmatpush3.xpose.msra.mxu1 %v2988_v36  ;;  %v2794_v39 = vmul.f32 0.5, %v2538_v17  ;;  %v9595_v42 = vsub.f32 0.75, %v9594_v50  ;;  %v9598_v16 = vsub.f32 0.75, %v9597_v20  ;;  %v2261_v58 = vpop.permute.xlu0 %2260  ;;  %v7251_v0 = vpop.permute.xlu1 %2136  ;;  %v9610_v50 = vld [vmem:[#allocation59_spill] sm:$0xff] }
 0x1d6   :  { %v2488_v4 = vsub.f32 1.5, %v7184_v34  ;;  %v7226_v61 = vand.u32 2147483647, %v1381_v19  ;;  %v2939_v36 = vsel %vm2619_vm12, %v2747_v46, %v2875_v27  ;;  %vm1638_vm8 = vcmp.lt.f32.partialorder %v6862_v12, 0.5  ;;  %v9604_v46 = vld [vmem:[#allocation282_spill] sm:$0xff]  ;;  %v9613_v20 = vld [vmem:[#allocation239_spill] sm:$0xff] }
 0x1d7   :  { %v2970_v7 = vmul.f32 %v2906_v51, %v2006_v55  ;;  %v1075_v26 = vsel %vm755_vm10, %v9595_v42, %v9593_v44  ;;  %v1975_v41 = vsel %vm1655_vm11, %v9598_v16, %v9596_v11  ;;  %v7234_v3 = vand.u32 2147483647, %v2359_v49  ;;  %v9606_v49 = vld [vmem:[#allocation118_spill] sm:$0xff]  ;;  %v9611_v42 = vld [vmem:[#allocation51_spill] sm:$0xff]  ;;  %v9614_v16 = vld [vmem:[#allocation229_spill] sm:$0xff] }
 0x1d8   :  { %v2039_v32 = vmul.f32 %v1975_v41, %v1075_v26  ;;  %v9601_v48 = vsub.f32 0.75, %v9600_v10  ;;  %v9603_v18 = vsub.f32 0.75, %v9602_v35  ;;  %v9605_v23 = vsub.f32 0.75, %v9604_v46  ;;  %v9620_v46 = vld [vmem:[#allocation178_spill] sm:$0xff] }
 0x1d9   :  { %4147 = vmatprep.subr.mxu0 %v2970_v7  ;;  %vm738_vm2 = vcmp.lt.f32.partialorder %v9606_v49, 0.5  ;;  %vm2602_vm9 = vcmp.lt.f32.partialorder %v7096_v56, 0.5  ;;  %v2745_v53 = vsub.f32 0.75, %v7213_v28  ;;  %v9607_v7 = vld [vmem:[#allocation308_spill] sm:$0xff]  ;;  %vm753_vm10 = vcmp.lt.f32.partialorder %v9608_v22, 0.5  ;;  %v7292_v54 = vpop.permute.xlu1 %2072  ;;  %v4317_v12 = vld [vmem:[%s8761_s6] sm:$0xff] }
 0x1da   :  { %v1059_v19 = vsel %vm739_vm3, %v9601_v48, %v9599_v52  ;;  %v1959_v6 = vsel %vm1639_vm0, %v9603_v18, %v6952_v13  ;;  %v2923_v27 = vsel %vm2603_vm4, %v9605_v23, %v6977_v38  ;;  %v3003_v55 = vmul.f32 %v2939_v36, %v2039_v32  ;;  %v7261_v13 = vld [vmem:[%s8761_s6 + $0x100] sm:$0xff]  ;;  %v9609_v38 = vld [vmem:[#allocation291_spill] sm:$0xff]  ;;  %v9617_v18 = vld [vmem:[#allocation293_spill] sm:$0xff] }
 0x1db   :  { %v2023_v51 = vmul.f32 %v1959_v6, %v1059_v19  ;;  %v2329_v63 = vsub.f32 %v9607_v7, %v6285_v25  ;;  %1208 = vperm.xlu1 %4252, %v7261_v13   ;;  %vm1653_vm11 = vcmp.lt.f32.partialorder %v9609_v38, 0.5  ;;  %v2358_v44 = vsub.f32 %v7180_v60, %v6285_v25  ;;  %v9629_v49 = vld [vmem:[#allocation85_spill] sm:$0xff] }
 0x1dc   :  { %v9612_v26 = vsub.f32 0.75, %v9611_v42  ;;  %v9615_v41 = vsub.f32 0.75, %v9614_v16  ;;  %v2890_v36 = vsel %vm2570_vm14, %v2698_v14, %v2826_v57  ;;  %vm2617_vm13 = vcmp.lt.f32.partialorder %v7121_v21, 0.5  ;;  %4181 = vmatprep.subr.mxu1 %v3003_v55 }
 0x1dd   :  { %v2552_v60 = vmax.f32 %v2488_v4, 0.0  ;;  %v2987_v52 = vmul.f32 %v2923_v27, %v2023_v51  ;;  %v7283_v10 = vand.u32 2147483647, %v2329_v63  ;;  %v2858_v48 = vmul.f32 %v2794_v39, %v2538_v17  ;;  %v9619_v4 = vld [vmem:[#allocation185_spill] sm:$0xff]  ;;  %v7304_v27 = vpop.permute.xlu0 %2256 }
 0x1de   :  { %v1026_v11 = vsel %vm706_vm1, %v9612_v26, %v9610_v50  ;;  %v1926_v32 = vsel %vm1606_vm15, %v9615_v41, %v9613_v20  ;;  %v1509_v19 = vsub.f32 1.5, %v7226_v61  ;;  %v2487_v35 = vsub.f32 1.5, %v7234_v3  ;;  %v7328_v26 = vpop.permute.xlu1 %2200  ;;  %v9623_v41 = vld [vmem:[#allocation278_spill] sm:$0xff] }
 0x1df   :  { %v1990_v37 = vmul.f32 %v1926_v32, %v1026_v11  ;;  %v9618_v6 = vsub.f32 0.75, %v9617_v18  ;;  %v2809_v14 = vmul.f32 0.5, %v7209_v59  ;;  %4182 = vmatpush3.xpose.msra.mxu1 %v2987_v52  ;;  %v9621_v23 = vsub.f32 0.75, %v9620_v46  ;;  %4253 = vset.pattern.permute.xlu1 %v9212_v47  ;;  %v9622_v47 = vld [vmem:[#allocation54_spill] sm:$0xff]  ;;  %v9624_v32 = vld [vmem:[#allocation65_spill] sm:$0xff] }
 0x1e0   :  { %v2938_v39 = vsel %vm2618_vm6, %v2746_v2, %v2874_v33  ;;  %v7309_v40 = vmul.f32 %v7184_v34, %v7184_v34  ;;  %v2457_v55 = vsub.f32 1.5, %v7283_v10  ;;  %v7312_v51 = vand.u32 2147483647, %v2358_v44  ;;  %2108 = vperm.xlu1 %4253, %v4316_v29   ;;  %v9630_v46 = vld [vmem:[#allocation257_spill] sm:$0xff] }
 0x1e1   :  { %v1974_v30 = vsel %vm1654_vm5, %v9618_v6, %v9616_v24  ;;  %v2954_v57 = vmul.f32 %v2890_v36, %v1990_v37  ;;  %v1074_v17 = vsel %vm754_vm7, %v9621_v23, %v9619_v4  ;;  %v2808_v31 = vmul.f32 0.5, %v2552_v60  ;;  %v2253_v4 = vpop.permute.xlu0 %2252 }
 0x1e2   :  { %v2038_v7 = vmul.f32 %v1974_v30, %v1074_v17  ;;  %v7319_v2 = vmul.f32 %v7226_v61, %v7226_v61  ;;  %v2313_v8 = vsub.f32 %v9622_v47, %v6285_v25  ;;  %v2357_v33 = vsub.f32 %v2261_v58, %v6285_v25  ;;  %v9634_v47 = vld [vmem:[#allocation299_spill] sm:$0xff] }
 0x1e3   :  { %4148 = vmatpush3.xpose.msra.mxu0 %v2954_v57  ;;  %v1573_v63 = vmax.f32 %v1509_v19, 0.0  ;;  %v2551_v44 = vmax.f32 %v2487_v35, 0.0  ;;  %v7326_v50 = vmul.f32 %v7234_v3, %v7234_v3  ;;  %v2873_v11 = vmul.f32 %v2809_v14, %v7209_v59  ;;  %v9626_v19 = vld [vmem:[#allocation140_spill] sm:$0xff]  ;;  %v9627_v35 = vld [vmem:[#allocation129_spill] sm:$0xff] }
 0x1e4   :  { %v3002_v42 = vmul.f32 %v2938_v39, %v2038_v7  ;;  %v7331_v20 = vand.u32 2147483647, %v2313_v8  ;;  %v7333_v16 = vand.u32 2147483647, %v2357_v33  ;;  %v9625_v36 = vsub.f32 0.75, %v9624_v32  ;;  %2044 = vperm.xlu1 %4253, %v4317_v12   ;;  %v9631_v39 = vld [vmem:[#allocation190_spill] sm:$0xff] }
 0x1e5   :  { %v2521_v52 = vmax.f32 %v2457_v55, 0.0  ;;  %v2486_v37 = vsub.f32 1.5, %v7312_v51  ;;  %v9628_v24 = vsub.f32 0.75, %v9627_v35  ;;  %v2922_v18 = vsel %vm2602_vm9, %v2730_v5, %v2858_v48  ;;  %v9632_v55 = vld [vmem:[#allocation182_spill] sm:$0xff]  ;;  %v9635_v8 = vld [vmem:[#allocation296_spill] sm:$0xff]  ;;  %v9638_v35 = vld [vmem:[#allocation313_spill] sm:$0xff]  ;;  %v2249_v12 = vpop.permute.xlu0 %2248 }
 0x1e6   :  { %v1958_v58 = vsel %vm1638_vm8, %v9625_v36, %v9623_v41  ;;  %4183 = vmatprep.subr.mxu1 %v3002_v42  ;;  %v2441_v14 = vsub.f32 1.5, %v7331_v20  ;;  %vm721_vm12 = vcmp.lt.f32.partialorder %v9629_v49, 0.5  ;;  %vm1621_vm3 = vcmp.lt.f32.partialorder %v9630_v46, 0.5  ;;  %v9659_v5 = vld [vmem:[#allocation227_spill] sm:$0xff] }
 0x1e7   :  { %v1058_v59 = vsel %vm738_vm2, %v9628_v24, %v9626_v19  ;;  %v7358_v62 = vmul.f32 %v2808_v31, %v2552_v60  ;;  %v1829_v56 = vmul.f32 0.5, %v1573_v63  ;;  %v2807_v48 = vmul.f32 0.5, %v2551_v44  ;;  %v7372_v31 = vpop.permute.xlu1 %1232 }
 0x1e8   :  { %v2022_v57 = vmul.f32 %v1958_v58, %v1058_v59  ;;  %v2485_v23 = vsub.f32 1.5, %v7333_v16  ;;  %v9633_v7 = vsub.f32 0.75, %v9632_v55  ;;  %v9636_v33 = vsub.f32 0.75, %v9635_v8  ;;  %2172 = vperm.xlu1 %4253, %v7261_v13   ;;  %v9637_v58 = vld [vmem:[#allocation265_spill] sm:$0xff] }
 0x1e9   :  { %v2777_v42 = vmul.f32 0.5, %v2521_v52  ;;  %v2550_v41 = vmax.f32 %v2486_v37, 0.0  ;;  %v2937_v36 = vsel %vm2617_vm13, %v2745_v53, %v2873_v11  ;;  %v2505_v22 = vmax.f32 %v2441_v14, 0.0  ;;  %v9639_v37 = vld [vmem:[#allocation40_spill] sm:$0xff] }
 0x1ea   :  { %v2986_v17 = vmul.f32 %v2922_v18, %v2022_v57  ;;  %v1073_v29 = vsel %vm753_vm10, %v9633_v7, %v9631_v39  ;;  %v1973_v60 = vsel %vm1653_vm11, %v9636_v33, %v9634_v47  ;;  %v2345_v19 = vsub.f32 %v9637_v58, %v6285_v25  ;;  %v9641_v14 = vld [vmem:[#allocation212_spill] sm:$0xff] }
 0x1eb   :  { %v2037_v32 = vmul.f32 %v1973_v60, %v1073_v29  ;;  %v2356_v38 = vsub.f32 %v7304_v27, %v6285_v25  ;;  %v1380_v24 = vsub.f32 %v9638_v35, %v9584_v1  ;;  %vm705_vm15 = vcmp.lt.f32.partialorder %v9639_v37, 0.5  ;;  %v9642_v60 = vld [vmem:[#allocation279_spill] sm:$0xff]  ;;  %v9658_v29 = vld [vmem:[#allocation234_spill] sm:$0xff] }
 0x1ec   :  { %4184 = vmatpush3.xpose.msra.mxu1 %v2986_v17  ;;  %v7386_v59 = vmul.f32 %v1829_v56, %v1573_v63  ;;  %v2649_v21 = vmul.f32 %v7283_v10, %v7283_v10  ;;  %v7392_v28 = vmul.f32 %v7312_v51, %v7312_v51  ;;  %v7394_v13 = vmul.f32 %v2807_v48, %v2551_v44  ;;  %v7409_v44 = vpop.permute.xlu1 %2132 }
 0x1ed   :  { %v3001_v53 = vmul.f32 %v2937_v36, %v2037_v32  ;;  %v2549_v11 = vmax.f32 %v2485_v23, 0.0  ;;  %v7396_v18 = vand.u32 2147483647, %v2345_v19  ;;  %v7398_v27 = vand.u32 2147483647, %v2356_v38  ;;  %v9643_v32 = vld [vmem:[#allocation272_spill] sm:$0xff] }
 0x1ee   :  { %vm1605_vm0 = vcmp.lt.f32.partialorder %v9641_v14, 0.5  ;;  %v2806_v63 = vmul.f32 0.5, %v2550_v41  ;;  %v2633_v57 = vmul.f32 %v7331_v20, %v7331_v20  ;;  %v7405_v56 = vmul.f32 %v7333_v16, %v7333_v16  ;;  %v9662_v14 = vld [vmem:[#allocation276_spill] sm:$0xff] }
 0x1ef   :  { %9640 = vst [vmem:[#allocation176_spill] sm:$0xff] %v7398_v27  ;;  %4185 = vmatprep.subr.mxu1 %v3001_v53  ;;  %v7407_v17 = vand.u32 2147483647, %v1380_v24  ;;  %v2841_v48 = vmul.f32 %v2777_v42, %v2521_v52  ;;  %v2761_v23 = vmul.f32 0.5, %v2505_v22  ;;  %v2473_v39 = vsub.f32 1.5, %v7396_v18  ;;  %v9645_v42 = vld [vmem:[#allocation120_spill] sm:$0xff] }
 0x1f0   :  { %v2355_v55 = vsub.f32 %v2253_v4, %v6285_v25  ;;  %vm2585_vm4 = vcmp.lt.f32.partialorder %v7283_v10, 0.5  ;;  %v2713_v7 = vsub.f32 0.75, %v2649_v21  ;;  %vm2569_vm1 = vcmp.lt.f32.partialorder %v7331_v20, 0.5  ;;  %v7427_v35 = vpop.permute.xlu1 %2068  ;;  %v9647_v53 = vld [vmem:[#allocation12_spill] sm:$0xff]  ;;  %v9667_v20 = vld [vmem:[#allocation134_spill] sm:$0xff] }
 0x1f1   :  { %v2805_v47 = vmul.f32 0.5, %v2549_v11  ;;  %v2537_v8 = vmax.f32 %v2473_v39, 0.0  ;;  %v2484_v33 = vsub.f32 1.5, %v7398_v27  ;;  %v9644_v36 = vsub.f32 0.75, %v9643_v32  ;;  %v9648_v39 = vld [vmem:[#allocation97_spill] sm:$0xff] }
 0x1f2   :  { %vm737_vm5 = vcmp.lt.f32.partialorder %v9645_v42, 0.5  ;;  %v7423_v4 = vmul.f32 %v2806_v63, %v2550_v41  ;;  %v2697_v58 = vsub.f32 0.75, %v2633_v57  ;;  %v1508_v38 = vsub.f32 1.5, %v7407_v17  ;;  %v2245_v63 = vpop.permute.xlu0 %2244 }
 0x1f3   :  { %v1941_v52 = vsel %vm1621_vm3, %v9644_v36, %v9642_v60  ;;  %vm1637_vm14 = vcmp.lt.f32.partialorder %v7226_v61, 0.5  ;;  %v2825_v24 = vmul.f32 %v2761_v23, %v2505_v22  ;;  %v7430_v21 = vand.u32 2147483647, %v2355_v55  ;;  %v9651_v23 = vld [vmem:[#allocation107_spill] sm:$0xff]  ;;  %v9652_v36 = vld [vmem:[#allocation294_spill] sm:$0xff] }
 0x1f4   :  { %v9649_v46 = vsub.f32 0.75, %v9648_v39  ;;  %v2905_v41 = vsel %vm2585_vm4, %v2713_v7, %v2841_v48  ;;  %v2665_v57 = vmul.f32 %v7396_v18, %v7396_v18  ;;  %v7443_v32 = vmul.f32 %v7398_v27, %v7398_v27 }
 0x1f5   :  { %9646 = vst [vmem:[#allocation283_spill] sm:$0xff] %v7430_v21  ;;  %v2328_v55 = vsub.f32 %v9651_v23, %v6285_v25  ;;  %vm1652_vm6 = vcmp.lt.f32.partialorder %v9652_v36, 0.5  ;;  %v7448_v39 = vmul.f32 %v2805_v47, %v2549_v11  ;;  %v2793_v49 = vmul.f32 0.5, %v2537_v8  ;;  %v9653_v23 = vld [vmem:[#allocation159_spill] sm:$0xff] }
 0x1f6   :  { %v1041_v60 = vsel %vm721_vm12, %v9649_v46, %v9647_v53  ;;  %9650 = vst [vmem:[#allocation287_spill] sm:$0xff] %v7443_v32  ;;  %v2548_v53 = vmax.f32 %v2484_v33, 0.0  ;;  %v2354_v10 = vsub.f32 %v2249_v12, %v6285_v25  ;;  %vm2616_vm7 = vcmp.lt.f32.partialorder %v7184_v34, 0.5  ;;  %v9655_v33 = vld [vmem:[#allocation62_spill] sm:$0xff]  ;;  %v9656_v12 = vld [vmem:[#allocation53_spill] sm:$0xff]  ;;  %v9681_v34 = vld [vmem:[#allocation280_spill] sm:$0xff] }
 0x1f7   :  { %v2005_v22 = vmul.f32 %v1941_v52, %v1041_v60  ;;  %v1572_v48 = vmax.f32 %v1508_v38, 0.0  ;;  %v7454_v7 = vmul.f32 %v7407_v17, %v7407_v17  ;;  %v7456_v52 = vand.u32 2147483647, %v2328_v55  ;;  %v7458_v60 = vpop.permute.xlu1 %2196 }
 0x1f8   :  { %vm752_vm8 = vcmp.lt.f32.partialorder %v9653_v23, 0.5  ;;  %v2483_v11 = vsub.f32 1.5, %v7430_v21  ;;  %v7462_v47 = vand.u32 2147483647, %v2354_v10  ;;  %v9657_v19 = vsub.f32 0.75, %v9656_v12 }
 0x1f9   :  { %v2969_v46 = vmul.f32 %v2905_v41, %v2005_v22  ;;  %v9660_v6 = vsub.f32 0.75, %v9659_v5  ;;  %vm2601_vm2 = vcmp.lt.f32.partialorder %v7396_v18, 0.5  ;;  %v2729_v22 = vsub.f32 0.75, %v2665_v57 }
 0x1fa   :  { %9654 = vst [vmem:[#allocation131_spill] sm:$0xff] %v7462_v47  ;;  %v1025_v38 = vsel %vm705_vm15, %v9657_v19, %v9655_v33  ;;  %v2889_v10 = vsel %vm2569_vm1, %v2697_v58, %v2825_v24  ;;  %v2857_v30 = vmul.f32 %v2793_v49, %v2537_v8  ;;  %v2456_v12 = vsub.f32 1.5, %v7456_v52  ;;  %v2241_v33 = vpop.permute.xlu0 %2240 }
 0x1fb   :  { %v1925_v41 = vsel %vm1605_vm0, %v9660_v6, %v9658_v29  ;;  %4149 = vmatprep.subr.mxu0 %v2969_v46  ;;  %v2482_v37 = vsub.f32 1.5, %v7462_v47  ;;  %v2804_v5 = vmul.f32 0.5, %v2548_v53  ;;  %v7482_v6 = vmul.f32 %v7430_v21, %v7430_v21  ;;  %v7488_v49 = vpop.permute.xlu1 %1228  ;;  %v9663_v46 = vld [vmem:[#allocation255_spill] sm:$0xff] }
 0x1fc   :  { %v1989_v19 = vmul.f32 %v1925_v41, %v1025_v38  ;;  %v2312_v29 = vsub.f32 %v9662_v14, %v6285_v25  ;;  %v2353_v57 = vsub.f32 %v2245_v63, %v6285_v25  ;;  %v1828_v58 = vmul.f32 0.5, %v1572_v48 }
 0x1fd   :  { %9661 = vst [vmem:[#allocation194_spill] sm:$0xff] %v7482_v6  ;;  %v2547_v8 = vmax.f32 %v2483_v11, 0.0  ;;  %vm1620_vm9 = vcmp.lt.f32.partialorder %v9663_v46, 0.5  ;;  %v7493_v38 = vmul.f32 %v7456_v52, %v7456_v52  ;;  %v9665_v63 = vsub.f32 0.75, %v7319_v2 }
 0x1fe   :  { %v2953_v24 = vmul.f32 %v2889_v10, %v1989_v19  ;;  %v7495_v41 = vand.u32 2147483647, %v2312_v29  ;;  %v7497_v55 = vand.u32 2147483647, %v2353_v57  ;;  %v2520_v11 = vmax.f32 %v2456_v12, 0.0  ;;  %v9666_v19 = vld [vmem:[#allocation144_spill] sm:$0xff] }
 0x1ff   :  { %v1957_v14 = vsel %vm1637_vm14, %v9665_v63, %v7386_v59  ;;  %v2546_v10 = vmax.f32 %v2482_v37, 0.0  ;;  %v9668_v21 = vsub.f32 0.75, %v9667_v20  ;;  %v2921_v29 = vsel %vm2601_vm2, %v2729_v22, %v2857_v30  ;;  %v9671_v20 = vld [vmem:[#allocation76_spill] sm:$0xff]  ;;  %v9673_v22 = vld [vmem:[#allocation173_spill] sm:$0xff] }
 0x200   :  { %9664 = vst [vmem:[#allocation198_spill] sm:$0xff] %v7497_v55  ;;  %4150 = vmatpush3.xpose.msra.mxu0 %v2953_v24  ;;  %v7511_v57 = vmul.f32 %v2804_v5, %v2548_v53  ;;  %v2440_v2 = vsub.f32 1.5, %v7495_v41  ;;  %v7515_v59 = vmul.f32 %v1828_v58, %v1572_v48  ;;  %v2803_v12 = vmul.f32 0.5, %v2547_v8  ;;  %v9672_v53 = vld [vmem:[#allocation181_spill] sm:$0xff] }
 0x201   :  { %v1057_v32 = vsel %vm737_vm5, %v9668_v21, %v9666_v19  ;;  %v7519_v37 = vmul.f32 %v7462_v47, %v7462_v47  ;;  %v2481_v42 = vsub.f32 1.5, %v7497_v55  ;;  %v2237_v21 = vpop.permute.xlu0 %2236  ;;  %vm720_vm10 = vcmp.lt.f32.partialorder %v9671_v20, 0.5  ;;  %v9675_v48 = vld [vmem:[#allocation301_spill] sm:$0xff] }
 0x202   :  { %9669 = vst [vmem:[#allocation275_spill] sm:$0xff] %v7511_v57  ;;  %v2021_v61 = vmul.f32 %v1957_v14, %v1057_v32  ;;  %v2712_v30 = vsub.f32 0.75, %v7493_v38  ;;  %v9674_v5 = vsub.f32 0.75, %v9673_v22  ;;  %v9676_v58 = vld [vmem:[#allocation73_spill] sm:$0xff]  ;;  %v7534_v14 = vpop.permute.xlu1 %2128  ;;  %vm2584_vm11 = vcmp.lt.f32.partialorder %v7456_v52, 0.5  ;;  %v9701_v52 = vld [vmem:[#allocation34_spill] sm:$0xff] }
 0x203   :  { %9670 = vst [vmem:[#allocation284_spill] sm:$0xff] %v7519_v37  ;;  %v9677_v24 = vsub.f32 0.75, %v9676_v58  ;;  %v2776_v19 = vmul.f32 0.5, %v2520_v11  ;;  %v2802_v27 = vmul.f32 0.5, %v2546_v10  ;;  %v2352_v36 = vsub.f32 %v2241_v33, %v6285_v25 }
 0x204   :  { %v2985_v18 = vmul.f32 %v2921_v29, %v2021_v61  ;;  %v1072_v32 = vsel %vm752_vm8, %v9674_v5, %v9672_v53  ;;  %v9678_v29 = vsub.f32 0.75, %v7309_v40  ;;  %v2504_v61 = vmax.f32 %v2440_v2, 0.0  ;;  %v9679_v53 = vld [vmem:[#allocation230_spill] sm:$0xff] }
 0x205   :  { %v1972_v63 = vsel %vm1652_vm6, %v9677_v24, %v9675_v48  ;;  %v2344_v22 = vsub.f32 %v9679_v53, %v6285_v25  ;;  %v2351_v5 = vsub.f32 %v2237_v21, %v6285_v25  ;;  %v9680_v48 = vld [vmem:[#allocation211_spill] sm:$0xff]  ;;  %v2545_v58 = vmax.f32 %v2481_v42, 0.0 }
 0x206   :  { %v2036_v38 = vmul.f32 %v1972_v63, %v1072_v32  ;;  %v2936_v23 = vsel %vm2616_vm7, %v9678_v29, %v7358_v62  ;;  %4186 = vmatpush3.xpose.msra.mxu1 %v2985_v18  ;;  %vm1604_vm13 = vcmp.lt.f32.partialorder %v9680_v48, 0.5  ;;  %v7549_v32 = vmul.f32 %v7495_v41, %v7495_v41  ;;  %v7561_v21 = vpop.permute.xlu1 %2064  ;;  %v9685_v63 = vld [vmem:[#allocation32_spill] sm:$0xff] }
 0x207   :  { %v1379_v62 = vsub.f32 %v9681_v34, %v9584_v1  ;;  %v7553_v2 = vmul.f32 %v2803_v12, %v2547_v8  ;;  %v7555_v18 = vand.u32 2147483647, %v2344_v22  ;;  %v7557_v24 = vand.u32 2147483647, %v2352_v36  ;;  %v9687_v12 = vld [vmem:[#allocation113_spill] sm:$0xff]  ;;  %v9688_v36 = vld [vmem:[#allocation160_spill] sm:$0xff] }
 0x208   :  { %v3000_v40 = vmul.f32 %v2936_v23, %v2036_v38  ;;  %v7559_v33 = vand.u32 2147483647, %v2351_v5  ;;  %vm704_vm12 = vcmp.lt.f32.partialorder %v9685_v63, 0.5  ;;  %v2840_v29 = vmul.f32 %v2776_v19, %v2520_v11  ;;  %v9691_v34 = vld [vmem:[#allocation269_spill] sm:$0xff]  ;;  %v9709_v63 = vld [vmem:[#allocation123_spill] sm:$0xff] }
 0x209   :  { %9682 = vst [vmem:[#allocation179_spill] sm:$0xff] %v7553_v2  ;;  %9683 = vst [vmem:[#allocation142_spill] sm:$0xff] %v7557_v24  ;;  %v7567_v42 = vmul.f32 %v7497_v55, %v7497_v55  ;;  %v7569_v8 = vand.u32 2147483647, %v1379_v62  ;;  %vm736_vm3 = vcmp.lt.f32.partialorder %v9687_v12, 0.5  ;;  %vm2568_vm15 = vcmp.lt.f32.partialorder %v7495_v41, 0.5 }
 0x20a   :  { %9684 = vst [vmem:[#allocation150_spill] sm:$0xff] %v7559_v33  ;;  %4187 = vmatprep.subr.mxu1 %v3000_v40  ;;  %v2760_v38 = vmul.f32 0.5, %v2504_v61  ;;  %v2472_v23 = vsub.f32 1.5, %v7555_v18  ;;  %v2480_v22 = vsub.f32 1.5, %v7557_v24  ;;  %vm751_vm0 = vcmp.lt.f32.partialorder %v9688_v36, 0.5  ;;  %v9690_v40 = vld [vmem:[#allocation273_spill] sm:$0xff] }
 0x20b   :  { %9686 = vst [vmem:[#allocation191_spill] sm:$0xff] %v7567_v42  ;;  %vm1636_vm4 = vcmp.lt.f32.partialorder %v7407_v17, 0.5  ;;  %v7577_v11 = vmul.f32 %v2802_v27, %v2546_v10  ;;  %v2696_v19 = vsub.f32 0.75, %v7549_v32  ;;  %v2801_v5 = vmul.f32 0.5, %v2545_v58  ;;  %v9693_v55 = vld [vmem:[#allocation297_spill] sm:$0xff]  ;;  %v7594_v32 = vpop.permute.xlu1 %2192 }
 0x20c   :  { %v9692_v62 = vsub.f32 0.75, %v9691_v34  ;;  %vm1651_vm1 = vcmp.lt.f32.partialorder %v9693_v55, 0.5  ;;  %vm2615_vm5 = vcmp.lt.f32.partialorder %v7234_v3, 0.5  ;;  %v2536_v37 = vmax.f32 %v2472_v23, 0.0  ;;  %9695 = vst [vmem:[#allocation130_spill] sm:$0xff] %v7594_v32  ;;  %v9699_v34 = vld [vmem:[#allocation77_spill] sm:$0xff] }
 0x20d   :  { %9689 = vst [vmem:[#allocation170_spill] sm:$0xff] %v7577_v11  ;;  %v2664_v47 = vmul.f32 %v7555_v18, %v7555_v18  ;;  %v7591_v27 = vmul.f32 %v7557_v24, %v7557_v24  ;;  %v2479_v10 = vsub.f32 1.5, %v7559_v33  ;;  %v7597_v46 = vmax.f32 %v2480_v22, 0.0  ;;  %v9697_v11 = vld [vmem:[#allocation89_spill] sm:$0xff] }
 0x20e   :  { %v1940_v53 = vsel %vm1620_vm9, %v9692_v62, %v9690_v40  ;;  %v1507_v40 = vsub.f32 1.5, %v7569_v8  ;;  %v9696_v62 = vld [vmem:[#allocation6_spill] sm:$0xff]  ;;  %v9698_v23 = vsub.f32 0.75, %v9697_v11  ;;  %v2824_v2 = vmul.f32 %v2760_v38, %v2504_v61 }
 0x20f   :  { %9694 = vst [vmem:[#allocation285_spill] sm:$0xff] %v7591_v27  ;;  %v2792_v57 = vmul.f32 0.5, %v2536_v37  ;;  %v7607_v24 = vmul.f32 %v7559_v33, %v7559_v33  ;;  %v2904_v32 = vsel %vm2584_vm11, %v2712_v30, %v2840_v29  ;;  %vm719_vm14 = vcmp.lt.f32.partialorder %v9699_v34, 0.5  ;;  %v9700_v11 = vld [vmem:[#allocation250_spill] sm:$0xff] }
 0x210   :  { %v1040_v6 = vsel %vm720_vm10, %v9698_v23, %v9696_v62  ;;  %v7612_v22 = vmul.f32 %v2801_v5, %v2545_v58  ;;  %vm2600_vm6 = vcmp.lt.f32.partialorder %v7555_v18, 0.5  ;;  %v2327_v20 = vsub.f32 %v7058_v45, %v6285_v25  ;;  %v9703_v45 = vld [vmem:[#allocation46_spill] sm:$0xff] }
 0x211   :  { %v2004_v42 = vmul.f32 %v1940_v53, %v1040_v6  ;;  %vm1619_vm7 = vcmp.lt.f32.partialorder %v9700_v11, 0.5  ;;  %v2728_v61 = vsub.f32 0.75, %v2664_v47  ;;  %v2856_v38 = vmul.f32 %v2792_v57, %v2536_v37  ;;  %v9702_v53 = vld [vmem:[#allocation55_spill] sm:$0xff]  ;;  %v9705_v57 = vld [vmem:[#allocation232_spill] sm:$0xff] }
 0x212   :  { %v7619_v23 = vmax.f32 %v2479_v10, 0.0  ;;  %vm703_vm8 = vcmp.lt.f32.partialorder %v9701_v52, 0.5  ;;  %v7623_v30 = vmul.f32 0.5, %v7597_v46  ;;  %v1571_v58 = vmax.f32 %v1507_v40, 0.0  ;;  %v9706_v37 = vld [vmem:[#allocation224_spill] sm:$0xff]  ;;  %v7638_v40 = vpop.permute.xlu1 %1224 }
 0x213   :  { %v2968_v29 = vmul.f32 %v2904_v32, %v2004_v42  ;;  %v2391_v5 = vand.u32 2147483647, %v2327_v20  ;;  %v2735_v6 = vsub.f32 0.75, %v7607_v24  ;;  %v9704_v33 = vsub.f32 0.75, %v9703_v45  ;;  %v9708_v45 = vld [vmem:[#allocation133_spill] sm:$0xff] }
 0x214   :  { %v9707_v10 = vsub.f32 0.75, %v9706_v37  ;;  %v2311_v27 = vsub.f32 %v7106_v9, %v6285_v25  ;;  %v2888_v20 = vsel %vm2568_vm15, %v2696_v19, %v2824_v2  ;;  %v7657_v41 = vmul.f32 %v7569_v8, %v7569_v8 }
 0x215   :  { %v1024_v47 = vsel %vm704_vm12, %v9704_v33, %v9702_v53  ;;  %4151 = vmatprep.subr.mxu0 %v2968_v29  ;;  %v2455_v42 = vsub.f32 1.5, %v2391_v5  ;;  %v2647_v32 = vmul.f32 %v2391_v5, %v2391_v5  ;;  %v9710_v33 = vsub.f32 0.75, %v9709_v63  ;;  %v9718_v63 = vld [vmem:[#allocation246_spill] sm:$0xff] }
 0x216   :  { %v1924_v62 = vsel %vm1604_vm13, %v9707_v10, %v9705_v57  ;;  %v2375_v48 = vand.u32 2147483647, %v2311_v27  ;;  %v9711_v57 = vsub.f32 0.75, %v7454_v7  ;;  %v2920_v29 = vsel %vm2600_vm6, %v2728_v61, %v2856_v38  ;;  %v9712_v10 = vld [vmem:[#allocation206_spill] sm:$0xff]  ;;  %v9717_v38 = vld [vmem:[#allocation304_spill] sm:$0xff] }
 0x217   :  { %v1056_v53 = vsel %vm736_vm3, %v9710_v33, %v9708_v45  ;;  %v1988_v37 = vmul.f32 %v1924_v62, %v1024_v47  ;;  %vm1603_vm2 = vcmp.lt.f32.partialorder %v9712_v10, 0.5  ;;  %v1827_v2 = vmul.f32 0.5, %v1571_v58  ;;  %v9713_v47 = vld [vmem:[#allocation184_spill] sm:$0xff]  ;;  %v9714_v7 = vld [vmem:[#allocation174_spill] sm:$0xff] }
 0x218   :  { %v1956_v9 = vsel %vm1636_vm4, %v9711_v57, %v7515_v59  ;;  %v2519_v12 = vmax.f32 %v2455_v42, 0.0  ;;  %vm2583_vm9 = vcmp.lt.f32.partialorder %v2391_v5, 0.5  ;;  %v2439_v62 = vsub.f32 1.5, %v2375_v48  ;;  %v9716_v59 = vld [vmem:[#allocation114_spill] sm:$0xff] }
 0x219   :  { %v2020_v19 = vmul.f32 %v1956_v9, %v1056_v53  ;;  %v2952_v27 = vmul.f32 %v2888_v20, %v1988_v37  ;;  %v9715_v45 = vsub.f32 0.75, %v9714_v7  ;;  %vm735_vm10 = vcmp.lt.f32.partialorder %v9716_v59, 0.5 }
 0x21a   :  { %v2775_v18 = vmul.f32 0.5, %v2519_v12  ;;  %v9719_v33 = vsub.f32 0.75, %v9718_v63  ;;  %v9720_v20 = vsub.f32 0.75, %v7326_v50  ;;  %v2711_v37 = vsub.f32 0.75, %v2647_v32  ;;  %v9722_v50 = vld [vmem:[#allocation271_spill] sm:$0xff]  ;;  %v9728_v63 = vld [vmem:[#allocation153_spill] sm:$0xff] }
 0x21b   :  { %v1071_v17 = vsel %vm751_vm0, %v9715_v45, %v9713_v47  ;;  %v2984_v61 = vmul.f32 %v2920_v29, %v2020_v19  ;;  %4152 = vmatpush3.xpose.msra.mxu0 %v2952_v27  ;;  %v2503_v36 = vmax.f32 %v2439_v62, 0.0  ;;  %v2343_v9 = vsub.f32 %v7146_v43, %v6285_v25  ;;  %v7677_v29 = vpop.permute.xlu1 %2124  ;;  %v9721_v19 = vld [vmem:[#allocation106_spill] sm:$0xff] }
 0x21c   :  { %v1971_v42 = vsel %vm1651_vm1, %v9719_v33, %v9717_v38  ;;  %v2935_v53 = vsel %vm2615_vm5, %v9720_v20, %v7394_v13  ;;  %vm1650_vm11 = vcmp.lt.f32.partialorder %v9721_v19, 0.5  ;;  %vm1635_vm13 = vcmp.lt.f32.partialorder %v7569_v8, 0.5  ;;  %v9723_v13 = vld [vmem:[#allocation264_spill] sm:$0xff]  ;;  %v9725_v45 = vld [vmem:[#allocation14_spill] sm:$0xff]  ;;  %v9729_v33 = vld [vmem:[#allocation249_spill] sm:$0xff] }
 0x21d   :  { %v2035_v57 = vmul.f32 %v1971_v42, %v1071_v17  ;;  %v2839_v55 = vmul.f32 %v2775_v18, %v2519_v12  ;;  %v2631_v47 = vmul.f32 %v2375_v48, %v2375_v48  ;;  %4188 = vmatpush3.xpose.msra.mxu1 %v2984_v61  ;;  %v1378_v3 = vsub.f32 %v7199_v15, %v9584_v1  ;;  %v9726_v17 = vld [vmem:[#allocation90_spill] sm:$0xff] }
 0x21e   :  { %v9724_v32 = vsub.f32 0.75, %v9723_v13  ;;  %vm2614_vm12 = vcmp.lt.f32.partialorder %v7312_v51, 0.5  ;;  %v2759_v43 = vmul.f32 0.5, %v2503_v36  ;;  %v2407_v7 = vand.u32 2147483647, %v2343_v9  ;;  %v9731_v9 = vld [vmem:[#allocation47_spill] sm:$0xff] }
 0x21f   :  { %v2999_v62 = vmul.f32 %v2935_v53, %v2035_v57  ;;  %v9727_v38 = vsub.f32 0.75, %v9726_v17  ;;  %v7694_v18 = vand.u32 2147483647, %v1378_v3  ;;  %v2903_v61 = vsel %vm2583_vm9, %v2711_v37, %v2839_v55  ;;  %v9730_v57 = vld [vmem:[#allocation56_spill] sm:$0xff]  ;;  %v9752_v51 = vld [vmem:[#allocation109_spill] sm:$0xff] }
 0x220   :  { %v1939_v27 = vsel %vm1619_vm7, %v9724_v32, %v9722_v50  ;;  %v2326_v11 = vsub.f32 %v7251_v0, %v6285_v25  ;;  %vm750_vm3 = vcmp.lt.f32.partialorder %v9728_v63, 0.5  ;;  %vm1618_vm15 = vcmp.lt.f32.partialorder %v9729_v33, 0.5  ;;  %v9733_v32 = vld [vmem:[#allocation228_spill] sm:$0xff]  ;;  %v9749_v63 = vld [vmem:[#allocation270_spill] sm:$0xff] }
 0x221   :  { %v1039_v12 = vsel %vm719_vm14, %v9727_v38, %v9725_v45  ;;  %v1891_v42 = vmul.f32 %v1827_v2, %v1571_v58  ;;  %v2823_v20 = vmul.f32 %v2759_v43, %v2503_v36  ;;  %4189 = vmatprep.subr.mxu1 %v2999_v62  ;;  %v2471_v53 = vsub.f32 1.5, %v2407_v7  ;;  %v7712_v36 = vpop.permute.xlu1 %2060  ;;  %v9736_v43 = vld [vmem:[#allocation71_spill] sm:$0xff] }
 0x222   :  { %v2003_v15 = vmul.f32 %v1939_v27, %v1039_v12  ;;  %v9732_v34 = vsub.f32 0.75, %v9731_v9  ;;  %v2695_v50 = vsub.f32 0.75, %v2631_v47  ;;  %v2663_v5 = vmul.f32 %v2407_v7, %v2407_v7  ;;  %v9734_v27 = vld [vmem:[#allocation220_spill] sm:$0xff]  ;;  %v9739_v9 = vld [vmem:[#allocation126_spill] sm:$0xff] }
 0x223   :  { %v1506_v37 = vsub.f32 1.5, %v7694_v18  ;;  %vm2567_vm0 = vcmp.lt.f32.partialorder %v2375_v48, 0.5  ;;  %v2535_v0 = vmax.f32 %v2471_v53, 0.0  ;;  %v2390_v13 = vand.u32 2147483647, %v2326_v11  ;;  %v9737_v11 = vld [vmem:[#allocation204_spill] sm:$0xff] }
 0x224   :  { %v1023_v3 = vsel %vm703_vm8, %v9732_v34, %v9730_v57  ;;  %v2967_v55 = vmul.f32 %v2903_v61, %v2003_v15  ;;  %v9735_v58 = vsub.f32 0.75, %v9734_v27  ;;  %vm718_vm4 = vcmp.lt.f32.partialorder %v9736_v43, 0.5  ;;  %v9738_v57 = vld [vmem:[#allocation136_spill] sm:$0xff]  ;;  %v9742_v27 = vld [vmem:[#allocation223_spill] sm:$0xff] }
 0x225   :  { %v7716_v52 = vmul.f32 0.5, %v7619_v23  ;;  %v1763_v47 = vsub.f32 0.75, %v7657_v41  ;;  %v2887_v48 = vsel %vm2567_vm0, %v2695_v50, %v2823_v20  ;;  %vm2599_vm1 = vcmp.lt.f32.partialorder %v2407_v7, 0.5 }
 0x226   :  { %v1923_v2 = vsel %vm1603_vm2, %v9735_v58, %v9733_v32  ;;  %4153 = vmatprep.subr.mxu0 %v2967_v55  ;;  %v2791_v45 = vmul.f32 0.5, %v2535_v0  ;;  %v1570_v17 = vmax.f32 %v1506_v37, 0.0  ;;  %v2454_v38 = vsub.f32 1.5, %v2390_v13  ;;  %v9741_v55 = vld [vmem:[#allocation27_spill] sm:$0xff] }
 0x227   :  { %v1987_v62 = vmul.f32 %v1923_v2, %v1023_v3  ;;  %v2727_v12 = vsub.f32 0.75, %v2663_v5  ;;  %v7721_v10 = vmul.f32 %v7694_v18, %v7694_v18  ;;  %v2310_v61 = vsub.f32 %v7292_v54, %v6285_v25  ;;  %v9743_v58 = vld [vmem:[#allocation87_spill] sm:$0xff] }
 0x228   :  { %vm1602_vm5 = vcmp.lt.f32.partialorder %v9737_v11, 0.5  ;;  %v2855_v53 = vmul.f32 %v2791_v45, %v2535_v0  ;;  %v2518_v41 = vmax.f32 %v2454_v38, 0.0  ;;  %v9740_v20 = vsub.f32 0.75, %v9739_v9 }
 0x229   :  { %v2951_v15 = vmul.f32 %v2887_v48, %v1987_v62  ;;  %v1955_v3 = vsel %vm1635_vm13, %v1763_v47, %v1891_v42  ;;  %vm2582_vm14 = vcmp.lt.f32.partialorder %v2390_v13, 0.5  ;;  %v2646_v50 = vmul.f32 %v2390_v13, %v2390_v13  ;;  %v7740_v62 = vpop.permute.xlu1 %2188  ;;  %v9745_v47 = vld [vmem:[#allocation177_spill] sm:$0xff]  ;;  %v9746_v48 = vld [vmem:[#allocation168_spill] sm:$0xff] }
 0x22a   :  { %v1055_v34 = vsel %vm735_vm10, %v9740_v20, %v9738_v57  ;;  %v2374_v5 = vand.u32 2147483647, %v2310_v61  ;;  %vm702_vm6 = vcmp.lt.f32.partialorder %v9741_v55, 0.5  ;;  %v1826_v54 = vmul.f32 0.5, %v1570_v17  ;;  %v9767_v55 = vld [vmem:[#allocation203_spill] sm:$0xff] }
 0x22b   :  { %4154 = vmatpush3.xpose.msra.mxu0 %v2951_v15  ;;  %v2019_v37 = vmul.f32 %v1955_v3, %v1055_v34  ;;  %v2774_v32 = vmul.f32 0.5, %v2518_v41  ;;  %v2919_v0 = vsel %vm2599_vm1, %v2727_v12, %v2855_v53  ;;  %v9744_v2 = vsub.f32 0.75, %v9743_v58  ;;  %v9750_v34 = vld [vmem:[#allocation262_spill] sm:$0xff] }
 0x22c   :  { %v2438_v8 = vsub.f32 1.5, %v2374_v5  ;;  %v9747_v45 = vsub.f32 0.75, %v9746_v48  ;;  %v9748_v7 = vsub.f32 0.75, %v7392_v28  ;;  %v2342_v19 = vsub.f32 %v7328_v26, %v6285_v25 }
 0x22d   :  { %v1970_v59 = vsel %vm1650_vm11, %v9744_v2, %v9742_v27  ;;  %v2983_v42 = vmul.f32 %v2919_v0, %v2019_v37  ;;  %v2838_v15 = vmul.f32 %v2774_v32, %v2518_v41  ;;  %v1377_v53 = vsub.f32 %v7372_v31, %v9584_v1  ;;  %v9754_v41 = vld [vmem:[#allocation64_spill] sm:$0xff]  ;;  %v9755_v37 = vld [vmem:[#allocation93_spill] sm:$0xff]  ;;  %v7778_v48 = vpop.permute.xlu1 %1220 }
 0x22e   :  { %v1070_v38 = vsel %vm750_vm3, %v9747_v45, %v9745_v47  ;;  %v2934_v12 = vsel %vm2614_vm12, %v9748_v7, %v7423_v4  ;;  %v2710_v57 = vsub.f32 0.75, %v2646_v50  ;;  %v2502_v9 = vmax.f32 %v2438_v8, 0.0  ;;  %v9753_v4 = vld [vmem:[#allocation158_spill] sm:$0xff]  ;;  %v9756_v32 = vld [vmem:[#allocation81_spill] sm:$0xff] }
 0x22f   :  { %v2034_v61 = vmul.f32 %v1970_v59, %v1070_v38  ;;  %v2630_v20 = vmul.f32 %v2374_v5, %v2374_v5  ;;  %4190 = vmatpush3.xpose.msra.mxu1 %v2983_v42  ;;  %v9751_v3 = vsub.f32 0.75, %v9750_v34  ;;  %vm734_vm7 = vcmp.lt.f32.partialorder %v9752_v51, 0.5 }
 0x230   :  { %vm749_vm8 = vcmp.lt.f32.partialorder %v9753_v4, 0.5  ;;  %vm1649_vm2 = vcmp.lt.f32.partialorder %v9754_v41, 0.5  ;;  %vm2613_vm9 = vcmp.lt.f32.partialorder %v7333_v16, 0.5  ;;  %v2406_v31 = vand.u32 2147483647, %v2342_v19  ;;  %v9760_v19 = vld [vmem:[#allocation245_spill] sm:$0xff] }
 0x231   :  { %v1938_v28 = vsel %vm1618_vm15, %v9751_v3, %v9749_v63  ;;  %v2998_v26 = vmul.f32 %v2934_v12, %v2034_v61  ;;  %v7765_v50 = vand.u32 2147483647, %v1377_v53  ;;  %v9757_v0 = vsub.f32 0.75, %v9756_v32  ;;  %v9758_v12 = vld [vmem:[#allocation72_spill] sm:$0xff]  ;;  %v9761_v53 = vld [vmem:[#allocation49_spill] sm:$0xff] }
 0x232   :  { %v2758_v33 = vmul.f32 0.5, %v2502_v9  ;;  %v2902_v2 = vsel %vm2582_vm14, %v2710_v57, %v2838_v15  ;;  %v2325_v59 = vsub.f32 %v7409_v44, %v6285_v25  ;;  %vm1634_vm10 = vcmp.lt.f32.partialorder %v7694_v18, 0.5 }
 0x233   :  { %v1038_v27 = vsel %vm718_vm4, %v9757_v0, %v9755_v37  ;;  %v1762_v8 = vsub.f32 0.75, %v7721_v10  ;;  %4191 = vmatprep.subr.mxu1 %v2998_v26  ;;  %v2470_v42 = vsub.f32 1.5, %v2406_v31  ;;  %v1505_v47 = vsub.f32 1.5, %v7765_v50  ;;  %v9759_v10 = vld [vmem:[#allocation28_spill] sm:$0xff] }
 0x234   :  { %v2002_v58 = vmul.f32 %v1938_v28, %v1038_v27  ;;  %v1890_v45 = vmul.f32 %v1826_v54, %v1570_v17  ;;  %v2822_v43 = vmul.f32 %v2758_v33, %v2502_v9  ;;  %v2662_v38 = vmul.f32 %v2406_v31, %v2406_v31  ;;  %v9762_v17 = vld [vmem:[#allocation36_spill] sm:$0xff]  ;;  %v9764_v9 = vld [vmem:[#allocation226_spill] sm:$0xff] }
 0x235   :  { %vm717_vm11 = vcmp.lt.f32.partialorder %v9758_v12, 0.5  ;;  %v2694_v13 = vsub.f32 0.75, %v2630_v20  ;;  %v2534_v15 = vmax.f32 %v2470_v42, 0.0  ;;  %v7783_v44 = vmul.f32 %v7765_v50, %v7765_v50  ;;  %v9765_v20 = vld [vmem:[#allocation219_spill] sm:$0xff]  ;;  %v9792_v12 = vld [vmem:[#allocation225_spill] sm:$0xff] }
 0x236   :  { %v2966_v7 = vmul.f32 %v2902_v2, %v2002_v58  ;;  %v2389_v61 = vand.u32 2147483647, %v2325_v59  ;;  %vm701_vm13 = vcmp.lt.f32.partialorder %v9759_v10, 0.5  ;;  %vm1617_vm12 = vcmp.lt.f32.partialorder %v9760_v19, 0.5  ;;  %v7805_v59 = vpop.permute.xlu1 %2120 }
 0x237   :  { %vm2566_vm3 = vcmp.lt.f32.partialorder %v2374_v5, 0.5  ;;  %v9763_v54 = vsub.f32 0.75, %v9762_v17  ;;  %v9766_v63 = vsub.f32 0.75, %v9765_v20  ;;  %v2309_v3 = vsub.f32 %v7427_v35, %v6285_v25  ;;  %v9774_v20 = vld [vmem:[#allocation98_spill] sm:$0xff] }
 0x238   :  { %4155 = vmatprep.subr.mxu0 %v2966_v7  ;;  %v2790_v28 = vmul.f32 0.5, %v2534_v15  ;;  %v1569_v26 = vmax.f32 %v1505_v47, 0.0  ;;  %v2453_v37 = vsub.f32 1.5, %v2389_v61  ;;  %v2886_v5 = vsel %vm2566_vm3, %v2694_v13, %v2822_v43  ;;  %v9768_v43 = vld [vmem:[#allocation127_spill] sm:$0xff] }
 0x239   :  { %v1022_v57 = vsel %vm702_vm6, %v9763_v54, %v9761_v53  ;;  %v1922_v34 = vsel %vm1602_vm5, %v9766_v63, %v9764_v9  ;;  %vm2598_vm15 = vcmp.lt.f32.partialorder %v2406_v31, 0.5  ;;  %v2726_v32 = vsub.f32 0.75, %v2662_v38  ;;  %v9769_v38 = vld [vmem:[#allocation121_spill] sm:$0xff]  ;;  %v9775_v63 = vld [vmem:[#allocation303_spill] sm:$0xff] }
 0x23a   :  { %v1986_v0 = vmul.f32 %v1922_v34, %v1022_v57  ;;  %v7799_v27 = vand.u32 2147483647, %v2309_v3  ;;  %vm1601_vm0 = vcmp.lt.f32.partialorder %v9767_v55, 0.5  ;;  %v2854_v33 = vmul.f32 %v2790_v28, %v2534_v15 }
 0x23b   :  { %v1761_v58 = vsub.f32 0.75, %v7783_v44  ;;  %v2517_v2 = vmax.f32 %v2453_v37, 0.0  ;;  %v1954_v11 = vsel %vm1634_vm10, %v1762_v8, %v1890_v45  ;;  %v2645_v35 = vmul.f32 %v2389_v61, %v2389_v61  ;;  %v9771_v8 = vld [vmem:[#allocation180_spill] sm:$0xff]  ;;  %v9772_v45 = vld [vmem:[#allocation171_spill] sm:$0xff] }
 0x23c   :  { %v2950_v42 = vmul.f32 %v2886_v5, %v1986_v0  ;;  %v2437_v47 = vsub.f32 1.5, %v7799_v27  ;;  %v9770_v7 = vsub.f32 0.75, %v9769_v38  ;;  %v1825_v53 = vmul.f32 0.5, %v1569_v26 }
 0x23d   :  { %v2773_v15 = vmul.f32 0.5, %v2517_v2  ;;  %v2918_v54 = vsel %vm2598_vm15, %v2726_v32, %v2854_v33  ;;  %v9773_v57 = vsub.f32 0.75, %v9772_v45  ;;  %v9776_v34 = vsub.f32 0.75, %v9775_v63  ;;  %v9778_v32 = vld [vmem:[#allocation110_spill] sm:$0xff] }
 0x23e   :  { %v1054_v13 = vsel %vm734_vm7, %v9770_v7, %v9768_v43  ;;  %4156 = vmatpush3.xpose.msra.mxu0 %v2950_v42  ;;  %v2501_v18 = vmax.f32 %v2437_v47, 0.0  ;;  %v9777_v3 = vsub.f32 0.75, %v7405_v56  ;;  %vm2581_vm4 = vcmp.lt.f32.partialorder %v2389_v61, 0.5  ;;  %v9783_v43 = vld [vmem:[#allocation145_spill] sm:$0xff] }
 0x23f   :  { %v2018_v17 = vmul.f32 %v1954_v11, %v1054_v13  ;;  %v1069_v9 = vsel %vm749_vm8, %v9773_v57, %v9771_v8  ;;  %v1969_v51 = vsel %vm1649_vm2, %v9776_v34, %v9774_v20  ;;  %v2837_v28 = vmul.f32 %v2773_v15, %v2517_v2  ;;  %v9779_v11 = vld [vmem:[#allocation238_spill] sm:$0xff]  ;;  %v9781_v2 = vld [vmem:[#allocation260_spill] sm:$0xff] }
 0x240   :  { %v2933_v31 = vsel %vm2613_vm9, %v9777_v3, %v7448_v39  ;;  %v2033_v5 = vmul.f32 %v1969_v51, %v1069_v9  ;;  %vm733_vm1 = vcmp.lt.f32.partialorder %v9778_v32, 0.5  ;;  %v2709_v4 = vsub.f32 0.75, %v2645_v35  ;;  %v9780_v39 = vld [vmem:[#allocation267_spill] sm:$0xff]  ;;  %v9785_v13 = vld [vmem:[#allocation94_spill] sm:$0xff]  ;;  %v9791_v34 = vld [vmem:[#allocation244_spill] sm:$0xff] }
 0x241   :  { %v2982_v37 = vmul.f32 %v2918_v54, %v2018_v17  ;;  %v2757_v0 = vmul.f32 0.5, %v2501_v18  ;;  %v2341_v33 = vsub.f32 %v7458_v60, %v6285_v25  ;;  %v1376_v41 = vsub.f32 %v7488_v49, %v9584_v1  ;;  %v7844_v60 = vpop.permute.xlu1 %2056  ;;  %v9784_v49 = vld [vmem:[#allocation176_spill] sm:$0xff]  ;;  %v9786_v15 = vld [vmem:[#allocation86_spill] sm:$0xff] }
 0x242   :  { %vm1648_vm5 = vcmp.lt.f32.partialorder %v9779_v11, 0.5  ;;  %v2629_v16 = vmul.f32 %v7799_v27, %v7799_v27  ;;  %v2997_v56 = vmul.f32 %v2933_v31, %v2033_v5  ;;  %v9782_v42 = vsub.f32 0.75, %v9781_v2  ;;  %v9788_v57 = vld [vmem:[#allocation50_spill] sm:$0xff]  ;;  %v9793_v31 = vld [vmem:[#allocation215_spill] sm:$0xff] }
 0x243   :  { %4192 = vmatpush3.xpose.msra.mxu1 %v2982_v37  ;;  %v2324_v47 = vsub.f32 %v7534_v14, %v6285_v25  ;;  %vm748_vm14 = vcmp.lt.f32.partialorder %v9783_v43, 0.5  ;;  %vm2612_vm6 = vcmp.lt.f32.partialorder %v9784_v49, 0.5  ;;  %vm1633_vm7 = vcmp.lt.f32.partialorder %v7765_v50, 0.5  ;;  %v9789_v9 = vld [vmem:[#allocation42_spill] sm:$0xff] }
 0x244   :  { %v1937_v35 = vsel %vm1617_vm12, %v9782_v42, %v9780_v39  ;;  %v2405_v38 = vand.u32 2147483647, %v2341_v33  ;;  %v7849_v7 = vand.u32 2147483647, %v1376_v41  ;;  %v9787_v17 = vsub.f32 0.75, %v9786_v15  ;;  %4193 = vmatprep.subr.mxu1 %v2997_v56  ;;  %v9795_v37 = vld [vmem:[#allocation66_spill] sm:$0xff] }
 0x245   :  { %v2901_v54 = vsel %vm2581_vm4, %v2709_v4, %v2837_v28  ;;  %v2821_v14 = vmul.f32 %v2757_v0, %v2501_v18  ;;  %v7857_v45 = vand.u32 2147483647, %v2324_v47  ;;  %v9790_v20 = vsub.f32 0.75, %v9789_v9  ;;  %v9796_v42 = vld [vmem:[#allocation197_spill] sm:$0xff]  ;;  %v9797_v15 = vld [vmem:[#allocation22_spill] sm:$0xff]  ;;  %v9798_v9 = vld [vmem:[#allocation128_spill] sm:$0xff] }
 0x246   :  { %v1037_v19 = vsel %vm717_vm11, %v9787_v17, %v9785_v13  ;;  %vm1616_vm8 = vcmp.lt.f32.partialorder %v9791_v34, 0.5  ;;  %v2469_v51 = vsub.f32 1.5, %v2405_v38  ;;  %v1504_v3 = vsub.f32 1.5, %v7849_v7 }
 0x247   :  { %v2001_v8 = vmul.f32 %v1937_v35, %v1037_v19  ;;  %v1021_v63 = vsel %vm701_vm13, %v9790_v20, %v9788_v57  ;;  %v9794_v61 = vsub.f32 0.75, %v9793_v31  ;;  %v2308_v28 = vsub.f32 %v7561_v21, %v6285_v25  ;;  %v7878_v21 = vpop.permute.xlu1 %2184  ;;  %v9799_v20 = vld [vmem:[#allocation122_spill] sm:$0xff] }
 0x248   :  { %vm716_vm2 = vcmp.lt.f32.partialorder %v9795_v37, 0.5  ;;  %v1889_v5 = vmul.f32 %v1825_v53, %v1569_v26  ;;  %v2661_v4 = vmul.f32 %v2405_v38, %v2405_v38  ;;  %v2452_v0 = vsub.f32 1.5, %v7857_v45 }
 0x249   :  { %v1921_v18 = vsel %vm1601_vm0, %v9794_v61, %v9792_v12  ;;  %v2965_v10 = vmul.f32 %v2901_v54, %v2001_v8  ;;  %vm2565_vm9 = vcmp.lt.f32.partialorder %v7799_v27, 0.5  ;;  %v2693_v33 = vsub.f32 0.75, %v2629_v16  ;;  %v9802_v12 = vld [vmem:[#allocation162_spill] sm:$0xff] }
 0x24a   :  { %v2533_v41 = vmax.f32 %v2469_v51, 0.0  ;;  %v1568_v56 = vmax.f32 %v1504_v3, 0.0  ;;  %vm2597_vm10 = vcmp.lt.f32.partialorder %v2405_v38, 0.5  ;;  %v2516_v39 = vmax.f32 %v2452_v0, 0.0  ;;  %v9801_v3 = vld [vmem:[#allocation169_spill] sm:$0xff]  ;;  %v9805_v0 = vld [vmem:[#allocation43_spill] sm:$0xff] }
 0x24b   :  { %4157 = vmatprep.subr.mxu0 %v2965_v10  ;;  %v2644_v55 = vmul.f32 %v7857_v45, %v7857_v45  ;;  %v1985_v2 = vmul.f32 %v1921_v18, %v1021_v63  ;;  %vm1600_vm11 = vcmp.lt.f32.partialorder %v9796_v42, 0.5  ;;  %v7883_v53 = vmul.f32 %v7849_v7, %v7849_v7  ;;  %v9804_v10 = vld [vmem:[#allocation307_spill] sm:$0xff] }
 0x24c   :  { %v2789_v26 = vmul.f32 0.5, %v2533_v41  ;;  %v2885_v27 = vsel %vm2565_vm9, %v2693_v33, %v2821_v14  ;;  %v7885_v16 = vand.u32 2147483647, %v2308_v28  ;;  %v2725_v35 = vsub.f32 0.75, %v2661_v4 }
 0x24d   :  { %vm2580_vm13 = vcmp.lt.f32.partialorder %v7857_v45, 0.5  ;;  %v2772_v47 = vmul.f32 0.5, %v2516_v39  ;;  %v2949_v13 = vmul.f32 %v2885_v27, %v1985_v2  ;;  %vm700_vm12 = vcmp.lt.f32.partialorder %v9797_v15, 0.5  ;;  %v9811_v2 = vld [vmem:[#allocation104_spill] sm:$0xff] }
 0x24e   :  { %v2853_v17 = vmul.f32 %v2789_v26, %v2533_v41  ;;  %v1824_v19 = vmul.f32 0.5, %v1568_v56  ;;  %v2708_v54 = vsub.f32 0.75, %v2644_v55  ;;  %v2436_v8 = vsub.f32 1.5, %v7885_v16  ;;  %v7919_v55 = vpop.permute.xlu1 %1216  ;;  %v9812_v26 = vld [vmem:[#allocation302_spill] sm:$0xff] }
 0x24f   :  { %v2836_v57 = vmul.f32 %v2772_v47, %v2516_v39  ;;  %4158 = vmatpush3.xpose.msra.mxu0 %v2949_v13  ;;  %v9800_v63 = vsub.f32 0.75, %v9799_v20  ;;  %v1953_v51 = vsel %vm1633_vm7, %v1761_v58, %v1889_v5  ;;  %v9803_v31 = vsub.f32 0.75, %v9802_v12  ;;  %v9807_v58 = vld [vmem:[#allocation275_spill] sm:$0xff]  ;;  %v9810_v39 = vld [vmem:[#allocation130_spill] sm:$0xff]  ;;  %v9813_v47 = vld [vmem:[#allocation88_spill] sm:$0xff] }
 0x250   :  { %v2500_v18 = vmax.f32 %v2436_v8, 0.0  ;;  %v2917_v4 = vsel %vm2597_vm10, %v2725_v35, %v2853_v17  ;;  %v9806_v33 = vsub.f32 0.75, %v9805_v0  ;;  %v2628_v50 = vmul.f32 %v7885_v16, %v7885_v16  ;;  %v9808_v5 = vld [vmem:[#allocation287_spill] sm:$0xff]  ;;  %v9814_v13 = vld [vmem:[#allocation78_spill] sm:$0xff]  ;;  %v9821_v0 = vld [vmem:[#allocation68_spill] sm:$0xff] }
 0x251   :  { %v1053_v14 = vsel %vm733_vm1, %v9800_v63, %v9798_v9  ;;  %v1068_v61 = vsel %vm748_vm14, %v9803_v31, %v9801_v3  ;;  %v9809_v41 = vsub.f32 0.75, %v9808_v5  ;;  %v2340_v38 = vsub.f32 %v9810_v39, %v6285_v25  ;;  %v9816_v8 = vld [vmem:[#allocation151_spill] sm:$0xff] }
 0x252   :  { %v2017_v28 = vmul.f32 %v1953_v51, %v1053_v14  ;;  %v1968_v32 = vsel %vm1648_vm5, %v9806_v33, %v9804_v10  ;;  %vm732_vm3 = vcmp.lt.f32.partialorder %v9811_v2, 0.5  ;;  %vm1647_vm15 = vcmp.lt.f32.partialorder %v9812_v26, 0.5  ;;  %v9817_v9 = vld [vmem:[#allocation283_spill] sm:$0xff]  ;;  %v9818_v14 = vld [vmem:[#allocation266_spill] sm:$0xff]  ;;  %v9822_v33 = vld [vmem:[#allocation241_spill] sm:$0xff] }
 0x253   :  { %v2032_v44 = vmul.f32 %v1968_v32, %v1068_v61  ;;  %v2932_v43 = vsel %vm2612_vm6, %v9809_v41, %v9807_v58  ;;  %v2756_v11 = vmul.f32 0.5, %v2500_v18  ;;  %v1375_v35 = vsub.f32 %v7638_v40, %v9584_v1  ;;  %v9819_v51 = vld [vmem:[#allocation259_spill] sm:$0xff]  ;;  %v9824_v58 = vld [vmem:[#allocation33_spill] sm:$0xff]  ;;  %v7961_v41 = vpop.permute.xlu1 %2116 }
 0x254   :  { %v2981_v27 = vmul.f32 %v2917_v4, %v2017_v28  ;;  %v9815_v17 = vsub.f32 0.75, %v9814_v13  ;;  %vm747_vm0 = vcmp.lt.f32.partialorder %v9816_v8, 0.5  ;;  %vm2611_vm4 = vcmp.lt.f32.partialorder %v9817_v9, 0.5 }
 0x255   :  { %v2996_v20 = vmul.f32 %v2932_v43, %v2032_v44  ;;  %v2404_v63 = vand.u32 2147483647, %v2340_v38  ;;  %v9820_v3 = vsub.f32 0.75, %v9819_v51  ;;  %v2900_v40 = vsel %vm2580_vm13, %v2708_v54, %v2836_v57  ;;  %v9823_v44 = vld [vmem:[#allocation41_spill] sm:$0xff] }
 0x256   :  { %v1036_v49 = vsel %vm716_vm2, %v9815_v17, %v9813_v47  ;;  %v2820_v31 = vmul.f32 %v2756_v11, %v2500_v18  ;;  %4194 = vmatpush3.xpose.msra.mxu1 %v2981_v27  ;;  %v7939_v61 = vand.u32 2147483647, %v1375_v35  ;;  %v2323_v28 = vsub.f32 %v7677_v29, %v6285_v25  ;;  %v9829_v35 = vld [vmem:[#allocation23_spill] sm:$0xff] }
 0x257   :  { %v1936_v12 = vsel %vm1616_vm8, %v9820_v3, %v9818_v14  ;;  %v7945_v4 = vmul.f32 %v7623_v30, %v7597_v46  ;;  %v1888_v10 = vmul.f32 %v1824_v19, %v1568_v56  ;;  %vm2564_vm1 = vcmp.lt.f32.partialorder %v7885_v16, 0.5  ;;  %4195 = vmatprep.subr.mxu1 %v2996_v20  ;;  %v9826_v56 = vld [vmem:[#allocation222_spill] sm:$0xff]  ;;  %v9830_v20 = vld [vmem:[#allocation119_spill] sm:$0xff] }
 0x258   :  { %v2000_v37 = vmul.f32 %v1936_v12, %v1036_v49  ;;  %v2468_v34 = vsub.f32 1.5, %v2404_v63  ;;  %vm715_vm5 = vcmp.lt.f32.partialorder %v9821_v0, 0.5  ;;  %v2692_v45 = vsub.f32 0.75, %v2628_v50  ;;  %v9827_v19 = vld [vmem:[#allocation214_spill] sm:$0xff]  ;;  %v9831_v16 = vld [vmem:[#allocation11_spill] sm:$0xff]  ;;  %v9853_v0 = vld [vmem:[#allocation237_spill] sm:$0xff] }
 0x259   :  { %v2660_v54 = vmul.f32 %v2404_v63, %v2404_v63  ;;  %v1503_v57 = vsub.f32 1.5, %v7939_v61  ;;  %vm1615_vm14 = vcmp.lt.f32.partialorder %v9822_v33, 0.5  ;;  %v2387_v29 = vand.u32 2147483647, %v2323_v28 }
 0x25a   :  { %v2964_v18 = vmul.f32 %v2900_v40, %v2000_v37  ;;  %v2532_v32 = vmax.f32 %v2468_v34, 0.0  ;;  %v9825_v46 = vsub.f32 0.75, %v9824_v58  ;;  %v9828_v5 = vsub.f32 0.75, %v9827_v19  ;;  %v9833_v37 = vld [vmem:[#allocation196_spill] sm:$0xff] }
 0x25b   :  { %vm1632_vm6 = vcmp.lt.f32.partialorder %v7849_v7, 0.5  ;;  %v1760_v43 = vsub.f32 0.75, %v7883_v53  ;;  %v2884_v38 = vsel %vm2564_vm1, %v2692_v45, %v2820_v31  ;;  %vm2596_vm7 = vcmp.lt.f32.partialorder %v2404_v63, 0.5  ;;  %v9834_v45 = vld [vmem:[#allocation310_spill] sm:$0xff] }
 0x25c   :  { %v1020_v30 = vsel %vm700_vm12, %v9825_v46, %v9823_v44  ;;  %v1920_v50 = vsel %vm1600_vm11, %v9828_v5, %v9826_v56  ;;  %4159 = vmatprep.subr.mxu0 %v2964_v18  ;;  %v2788_v15 = vmul.f32 0.5, %v2532_v32  ;;  %v1567_v11 = vmax.f32 %v1503_v57, 0.0  ;;  %v7988_v18 = vpop.permute.xlu1 %2052  ;;  %v9838_v44 = vld [vmem:[#allocation163_spill] sm:$0xff]  ;;  %v9841_v56 = vld [vmem:[#allocation194_spill] sm:$0xff] }
 0x25d   :  { %v1984_v39 = vmul.f32 %v1920_v50, %v1020_v30  ;;  %v2451_v27 = vsub.f32 1.5, %v2387_v29  ;;  %vm699_vm8 = vcmp.lt.f32.partialorder %v9829_v35, 0.5  ;;  %v2724_v47 = vsub.f32 0.75, %v2660_v54  ;;  %v9835_v54 = vld [vmem:[#allocation306_spill] sm:$0xff]  ;;  %v9840_v30 = vld [vmem:[#allocation179_spill] sm:$0xff] }
 0x25e   :  { %v7970_v42 = vmul.f32 %v7939_v61, %v7939_v61  ;;  %v2307_v53 = vsub.f32 %v7712_v36, %v6285_v25  ;;  %v2852_v17 = vmul.f32 %v2788_v15, %v2532_v32  ;;  %v9832_v14 = vsub.f32 0.75, %v9831_v16  ;;  %v9837_v32 = vld [vmem:[#allocation172_spill] sm:$0xff]  ;;  %v9843_v5 = vld [vmem:[#allocation7_spill] sm:$0xff] }
 0x25f   :  { %v2948_v13 = vmul.f32 %v2884_v38, %v1984_v39  ;;  %v2515_v49 = vmax.f32 %v2451_v27, 0.0  ;;  %v1952_v3 = vsel %vm1632_vm6, %v1760_v43, %v1888_v10  ;;  %vm2579_vm2 = vcmp.lt.f32.partialorder %v2387_v29, 0.5  ;;  %v9844_v27 = vld [vmem:[#allocation261_spill] sm:$0xff]  ;;  %v9849_v16 = vld [vmem:[#allocation91_spill] sm:$0xff] }
 0x260   :  { %v1052_v51 = vsel %vm732_vm3, %v9832_v14, %v9830_v20  ;;  %v2643_v12 = vmul.f32 %v2387_v29, %v2387_v29  ;;  %v2371_v40 = vand.u32 2147483647, %v2307_v53  ;;  %vm1599_vm9 = vcmp.lt.f32.partialorder %v9833_v37, 0.5  ;;  %v9847_v53 = vld [vmem:[#allocation305_spill] sm:$0xff] }
 0x261   :  { %4160 = vmatpush3.xpose.msra.mxu0 %v2948_v13  ;;  %v2016_v31 = vmul.f32 %v1952_v3, %v1052_v51  ;;  %v1823_v28 = vmul.f32 0.5, %v1567_v11  ;;  %v2771_v36 = vmul.f32 0.5, %v2515_v49  ;;  %v2916_v34 = vsel %vm2596_vm7, %v2724_v47, %v2852_v17  ;;  %v9845_v47 = vld [vmem:[#allocation253_spill] sm:$0xff]  ;;  %v9848_v17 = vld [vmem:[#allocation131_spill] sm:$0xff] }
 0x262   :  { %v9836_v57 = vsub.f32 0.75, %v9835_v54  ;;  %v2435_v7 = vsub.f32 1.5, %v2371_v40  ;;  %v9839_v58 = vsub.f32 0.75, %v9838_v44  ;;  %v9842_v63 = vsub.f32 0.75, %v9841_v56  ;;  %v9857_v56 = vld [vmem:[#allocation221_spill] sm:$0xff] }
 0x263   :  { %v2980_v10 = vmul.f32 %v2916_v34, %v2016_v31  ;;  %vm731_vm10 = vcmp.lt.f32.partialorder %v9843_v5, 0.5  ;;  %v2835_v26 = vmul.f32 %v2771_v36, %v2515_v49  ;;  %v2339_v43 = vsub.f32 %v7740_v62, %v6285_v25  ;;  %v9852_v36 = vld [vmem:[#allocation139_spill] sm:$0xff] }
 0x264   :  { %v1967_v2 = vsel %vm1647_vm15, %v9836_v57, %v9834_v45  ;;  %v1067_v46 = vsel %vm747_vm0, %v9839_v58, %v9837_v32  ;;  %v2931_v19 = vsel %vm2611_vm4, %v9842_v63, %v9840_v30  ;;  %v1374_v39 = vsub.f32 %v7778_v48, %v9584_v1  ;;  %v9850_v48 = vld [vmem:[#allocation79_spill] sm:$0xff]  ;;  %v8025_v57 = vpop.permute.xlu1 %2180  ;;  %v9854_v58 = vld [vmem:[#allocation45_spill] sm:$0xff]  ;;  %v9858_v63 = vld [vmem:[#allocation208_spill] sm:$0xff] }
 0x265   :  { %v2031_v50 = vmul.f32 %v1967_v2, %v1067_v46  ;;  %v2707_v38 = vsub.f32 0.75, %v2643_v12  ;;  %v2499_v15 = vmax.f32 %v2435_v7, 0.0  ;;  %v2627_v8 = vmul.f32 %v2371_v40, %v2371_v40  ;;  %4196 = vmatpush3.xpose.msra.mxu1 %v2980_v10 }
 0x266   :  { %v9846_v13 = vsub.f32 0.75, %v9845_v47  ;;  %vm1646_vm11 = vcmp.lt.f32.partialorder %v9847_v53, 0.5  ;;  %vm2610_vm13 = vcmp.lt.f32.partialorder %v9848_v17, 0.5  ;;  %v2403_v20 = vand.u32 2147483647, %v2339_v43  ;;  %v9860_v43 = vld [vmem:[#allocation60_spill] sm:$0xff] }
 0x267   :  { %v2995_v49 = vmul.f32 %v2931_v19, %v2031_v50  ;;  %v8012_v62 = vand.u32 2147483647, %v1374_v39  ;;  %v9851_v14 = vsub.f32 0.75, %v9850_v48  ;;  %v2755_v3 = vmul.f32 0.5, %v2499_v15  ;;  %v9861_v39 = vld [vmem:[#allocation195_spill] sm:$0xff] }
 0x268   :  { %v1935_v9 = vsel %vm1615_vm14, %v9846_v13, %v9844_v27  ;;  %v2899_v31 = vsel %vm2579_vm2, %v2707_v38, %v2835_v26  ;;  %v2322_v33 = vsub.f32 %v7805_v59, %v6285_v25  ;;  %vm746_vm12 = vcmp.lt.f32.partialorder %v9852_v36, 0.5 }
 0x269   :  { %v1035_v51 = vsel %vm715_vm5, %v9851_v14, %v9849_v16  ;;  %vm1631_vm3 = vcmp.lt.f32.partialorder %v7939_v61, 0.5  ;;  %v1887_v34 = vmul.f32 %v1823_v28, %v1567_v11  ;;  %4197 = vmatprep.subr.mxu1 %v2995_v49  ;;  %v2467_v45 = vsub.f32 1.5, %v2403_v20  ;;  %v9855_v11 = vld [vmem:[#allocation35_spill] sm:$0xff]  ;;  %v9862_v14 = vld [vmem:[#allocation9_spill] sm:$0xff] }
 0x26a   :  { %v1999_v12 = vmul.f32 %v1935_v9, %v1035_v51  ;;  %v1502_v54 = vsub.f32 1.5, %v8012_v62  ;;  %vm1614_vm15 = vcmp.lt.f32.partialorder %v9853_v0, 0.5  ;;  %v2691_v2 = vsub.f32 0.75, %v2627_v8  ;;  %v8052_v9 = vpop.permute.xlu1 %1212  ;;  %v9863_v51 = vld [vmem:[#allocation115_spill] sm:$0xff] }
 0x26b   :  { %v2819_v7 = vmul.f32 %v2755_v3, %v2499_v15  ;;  %v2659_v29 = vmul.f32 %v2403_v20, %v2403_v20  ;;  %v2531_v32 = vmax.f32 %v2467_v45, 0.0  ;;  %v8030_v59 = vmul.f32 %v8012_v62, %v8012_v62 }
 0x26c   :  { %v2963_v10 = vmul.f32 %v2899_v31, %v1999_v12  ;;  %v2386_v44 = vand.u32 2147483647, %v2322_v33  ;;  %v9856_v28 = vsub.f32 0.75, %v9855_v11  ;;  %v1759_v30 = vsub.f32 0.75, %v7970_v42  ;;  %v9865_v31 = vld [vmem:[#allocation20_spill] sm:$0xff] }
 0x26d   :  { %vm2563_vm0 = vcmp.lt.f32.partialorder %v2371_v40, 0.5  ;;  %v9859_v19 = vsub.f32 0.75, %v9858_v63  ;;  %v2306_v50 = vsub.f32 %v7844_v60, %v6285_v25  ;;  %vm714_vm4 = vcmp.lt.f32.partialorder %v9860_v43, 0.5 }
 0x26e   :  { %v1019_v46 = vsel %vm699_vm8, %v9856_v28, %v9854_v58  ;;  %4161 = vmatprep.subr.mxu0 %v2963_v10  ;;  %vm1598_vm1 = vcmp.lt.f32.partialorder %v9861_v39, 0.5  ;;  %v2787_v38 = vmul.f32 0.5, %v2531_v32  ;;  %v1566_v35 = vmax.f32 %v1502_v54, 0.0  ;;  %v9870_v58 = vld [vmem:[#allocation309_spill] sm:$0xff]  ;;  %v9872_v28 = vld [vmem:[#allocation170_spill] sm:$0xff] }
 0x26f   :  { %v1919_v26 = vsel %vm1599_vm9, %v9859_v19, %v9857_v56  ;;  %v2450_v15 = vsub.f32 1.5, %v2386_v44  ;;  %v2883_v8 = vsel %vm2563_vm0, %v2691_v2, %v2819_v7  ;;  %vm2595_vm5 = vcmp.lt.f32.partialorder %v2403_v20, 0.5  ;;  %v9866_v2 = vld [vmem:[#allocation165_spill] sm:$0xff]  ;;  %v9867_v7 = vld [vmem:[#allocation154_spill] sm:$0xff] }
 0x270   :  { %v2723_v42 = vsub.f32 0.75, %v2659_v29  ;;  %v1983_v40 = vmul.f32 %v1919_v26, %v1019_v46  ;;  %v8047_v27 = vand.u32 2147483647, %v2306_v50  ;;  %v2851_v47 = vmul.f32 %v2787_v38, %v2531_v32  ;;  %v9869_v32 = vld [vmem:[#allocation243_spill] sm:$0xff]  ;;  %v9873_v46 = vld [vmem:[#allocation284_spill] sm:$0xff]  ;;  %v9875_v26 = vld [vmem:[#allocation141_spill] sm:$0xff] }
 0x271   :  { %v1758_v37 = vsub.f32 0.75, %v8030_v59  ;;  %v2514_v13 = vmax.f32 %v2450_v15, 0.0  ;;  %v1951_v60 = vsel %vm1631_vm3, %v1759_v30, %v1887_v34  ;;  %v2642_v49 = vmul.f32 %v2386_v44, %v2386_v44  ;;  %v9876_v15 = vld [vmem:[#allocation105_spill] sm:$0xff] }
 0x272   :  { %v2947_v16 = vmul.f32 %v2883_v8, %v1983_v40  ;;  %v2434_v48 = vsub.f32 1.5, %v8047_v27  ;;  %v9864_v3 = vsub.f32 0.75, %v9863_v51  ;;  %vm698_vm14 = vcmp.lt.f32.partialorder %v9865_v31, 0.5  ;;  %v9878_v40 = vld [vmem:[#allocation251_spill] sm:$0xff]  ;;  %v9883_v51 = vld [vmem:[#allocation70_spill] sm:$0xff] }
 0x273   :  { %v1822_v33 = vmul.f32 0.5, %v1566_v35  ;;  %v2770_v45 = vmul.f32 0.5, %v2514_v13  ;;  %v2915_v61 = vsel %vm2595_vm5, %v2723_v42, %v2851_v47  ;;  %v9868_v29 = vsub.f32 0.75, %v9867_v7  ;;  %v9877_v42 = vld [vmem:[#allocation258_spill] sm:$0xff] }
 0x274   :  { %v1051_v12 = vsel %vm731_vm10, %v9864_v3, %v9862_v14  ;;  %4162 = vmatpush3.xpose.msra.mxu0 %v2947_v16  ;;  %v2498_v34 = vmax.f32 %v2434_v48, 0.0  ;;  %v9871_v11 = vsub.f32 0.75, %v9870_v58  ;;  %v9874_v30 = vsub.f32 0.75, %v9873_v46  ;;  %v9882_v14 = vld [vmem:[#allocation83_spill] sm:$0xff] }
 0x275   :  { %v2015_v54 = vmul.f32 %v1951_v60, %v1051_v12  ;;  %v1066_v10 = vsel %vm746_vm12, %v9868_v29, %v9866_v2  ;;  %vm2578_vm6 = vcmp.lt.f32.partialorder %v2386_v44, 0.5  ;;  %v2834_v56 = vmul.f32 %v2770_v45, %v2514_v13 }
 0x276   :  { %v1966_v5 = vsel %vm1646_vm11, %v9871_v11, %v9869_v32  ;;  %v2930_v20 = vsel %vm2610_vm13, %v9874_v30, %v9872_v28  ;;  %vm745_vm7 = vcmp.lt.f32.partialorder %v9875_v26, 0.5  ;;  %v2706_v36 = vsub.f32 0.75, %v2642_v49  ;;  %v9880_v49 = vld [vmem:[#allocation100_spill] sm:$0xff]  ;;  %v9887_v32 = vld [vmem:[#allocation207_spill] sm:$0xff]  ;;  %v9890_v30 = vld [vmem:[#allocation38_spill] sm:$0xff] }
 0x277   :  { %v2979_v63 = vmul.f32 %v2915_v61, %v2015_v54  ;;  %v2030_v19 = vmul.f32 %v1966_v5, %v1066_v10  ;;  %v2754_v50 = vmul.f32 0.5, %v2498_v34  ;;  %v2338_v38 = vsub.f32 %v7878_v21, %v6285_v25  ;;  %v8092_v21 = vpop.permute.xlu1 %2112  ;;  %v9886_v10 = vld [vmem:[#allocation218_spill] sm:$0xff] }
 0x278   :  { %v1373_v53 = vsub.f32 %v7919_v55, %v9584_v1  ;;  %vm1645_vm8 = vcmp.lt.f32.partialorder %v9876_v15, 0.5  ;;  %v2626_v17 = vmul.f32 %v8047_v27, %v8047_v27  ;;  %v9879_v47 = vsub.f32 0.75, %v9878_v40  ;;  %v9881_v55 = vld [vmem:[#allocation198_spill] sm:$0xff] }
 0x279   :  { %4198 = vmatpush3.xpose.msra.mxu1 %v2979_v63  ;;  %v2994_v8 = vmul.f32 %v2930_v20, %v2030_v19  ;;  %v2321_v60 = vsub.f32 %v7961_v41, %v6285_v25  ;;  %vm730_vm2 = vcmp.lt.f32.partialorder %v9880_v49, 0.5  ;;  %vm2609_vm9 = vcmp.lt.f32.partialorder %v9881_v55, 0.5  ;;  %v9885_v41 = vld [vmem:[#allocation61_spill] sm:$0xff]  ;;  %v9891_v20 = vld [vmem:[#allocation26_spill] sm:$0xff]  ;;  %v9903_v49 = vld [vmem:[#allocation235_spill] sm:$0xff] }
 0x27a   :  { %v1934_v13 = vsel %vm1614_vm15, %v9879_v47, %v9877_v42  ;;  %vm1630_vm10 = vcmp.lt.f32.partialorder %v8012_v62, 0.5  ;;  %v2402_v16 = vand.u32 2147483647, %v2338_v38  ;;  %v8097_v48 = vand.u32 2147483647, %v1373_v53  ;;  %v9893_v40 = vld [vmem:[#allocation18_spill] sm:$0xff] }
 0x27b   :  { %v9884_v3 = vsub.f32 0.75, %v9883_v51  ;;  %v2898_v12 = vsel %vm2578_vm6, %v2706_v36, %v2834_v56  ;;  %vm713_vm11 = vcmp.lt.f32.partialorder %v9885_v41, 0.5  ;;  %v1886_v45 = vmul.f32 %v1822_v33, %v1566_v35  ;;  %4199 = vmatprep.subr.mxu1 %v2994_v8  ;;  %v8121_v36 = vpop.permute.xlu1 %2048  ;;  %v9894_v47 = vld [vmem:[#allocation189_spill] sm:$0xff]  ;;  %v9911_v55 = vld [vmem:[#allocation142_spill] sm:$0xff] }
 0x27c   :  { %v2818_v54 = vmul.f32 %v2754_v50, %v2498_v34  ;;  %v2385_v2 = vand.u32 2147483647, %v2321_v60  ;;  %v2466_v7 = vsub.f32 1.5, %v2402_v16  ;;  %v1501_v29 = vsub.f32 1.5, %v8097_v48  ;;  %v9889_v34 = vld [vmem:[#allocation236_spill] sm:$0xff] }
 0x27d   :  { %v1034_v0 = vsel %vm714_vm4, %v9884_v3, %v9882_v14  ;;  %v9888_v58 = vsub.f32 0.75, %v9887_v32  ;;  %v2305_v44 = vsub.f32 %v7988_v18, %v6285_v25  ;;  %vm2562_vm13 = vcmp.lt.f32.partialorder %v8047_v27, 0.5  ;;  %v9896_v27 = vld [vmem:[#allocation10_spill] sm:$0xff] }
 0x27e   :  { %v1998_v61 = vmul.f32 %v1934_v13, %v1034_v0  ;;  %v2658_v43 = vmul.f32 %v2402_v16, %v2402_v16  ;;  %v2449_v33 = vsub.f32 1.5, %v2385_v2  ;;  %vm1613_vm12 = vcmp.lt.f32.partialorder %v9889_v34, 0.5  ;;  %v9895_v0 = vld [vmem:[#allocation117_spill] sm:$0xff] }
 0x27f   :  { %v1918_v11 = vsel %vm1598_vm1, %v9888_v58, %v9886_v10  ;;  %v2690_v5 = vsub.f32 0.75, %v2626_v17  ;;  %v2530_v28 = vmax.f32 %v2466_v7, 0.0  ;;  %v1565_v46 = vmax.f32 %v1501_v29, 0.0  ;;  %v9898_v7 = vld [vmem:[#allocation166_spill] sm:$0xff]  ;;  %v9899_v29 = vld [vmem:[#allocation157_spill] sm:$0xff]  ;;  %v9901_v58 = vld [vmem:[#allocation103_spill] sm:$0xff] }
 0x280   :  { %v2962_v35 = vmul.f32 %v2898_v12, %v1998_v61  ;;  %v9892_v56 = vsub.f32 0.75, %v9891_v20  ;;  %vm2594_vm3 = vcmp.lt.f32.partialorder %v2402_v16, 0.5  ;;  %v2513_v63 = vmax.f32 %v2449_v33, 0.0 }
 0x281   :  { %v2641_v18 = vmul.f32 %v2385_v2, %v2385_v2  ;;  %v2786_v50 = vmul.f32 0.5, %v2530_v28  ;;  %v8125_v38 = vmul.f32 %v8097_v48, %v8097_v48  ;;  %v2882_v53 = vsel %vm2562_vm13, %v2690_v5, %v2818_v54 }
 0x282   :  { %v1018_v39 = vsel %vm698_vm14, %v9892_v56, %v9890_v30  ;;  %4163 = vmatprep.subr.mxu0 %v2962_v35  ;;  %v8129_v17 = vand.u32 2147483647, %v2305_v44  ;;  %v2722_v8 = vsub.f32 0.75, %v2658_v43  ;;  %vm2577_vm15 = vcmp.lt.f32.partialorder %v2385_v2, 0.5  ;;  %v9902_v35 = vld [vmem:[#allocation314_spill] sm:$0xff]  ;;  %v9907_v30 = vld [vmem:[#allocation63_spill] sm:$0xff] }
 0x283   :  { %v1982_v19 = vmul.f32 %v1918_v11, %v1018_v39  ;;  %v2769_v31 = vmul.f32 0.5, %v2513_v63  ;;  %vm697_vm0 = vcmp.lt.f32.partialorder %v9893_v40, 0.5  ;;  %vm1597_vm4 = vcmp.lt.f32.partialorder %v9894_v47, 0.5  ;;  %v9908_v39 = vld [vmem:[#allocation84_spill] sm:$0xff] }
 0x284   :  { %v2850_v13 = vmul.f32 %v2786_v50, %v2530_v28  ;;  %v1821_v60 = vmul.f32 0.5, %v1565_v46  ;;  %v2705_v14 = vsub.f32 0.75, %v2641_v18  ;;  %v2433_v51 = vsub.f32 1.5, %v8129_v17  ;;  %v8164_v28 = vpop.permute.xlu1 %2176 }
 0x285   :  { %v2946_v42 = vmul.f32 %v2882_v53, %v1982_v19  ;;  %v2833_v3 = vmul.f32 %v2769_v31, %v2513_v63  ;;  %v9897_v12 = vsub.f32 0.75, %v9896_v27  ;;  %v1950_v61 = vsel %vm1630_vm10, %v1758_v37, %v1886_v45  ;;  %v9905_v45 = vld [vmem:[#allocation191_spill] sm:$0xff]  ;;  %v9913_v53 = vld [vmem:[#allocation248_spill] sm:$0xff]  ;;  %v9916_v27 = vld [vmem:[#allocation233_spill] sm:$0xff] }
 0x286   :  { %v9900_v10 = vsub.f32 0.75, %v9899_v29  ;;  %vm729_vm1 = vcmp.lt.f32.partialorder %v9901_v58, 0.5  ;;  %v2497_v11 = vmax.f32 %v2433_v51, 0.0  ;;  %v2914_v43 = vsel %vm2594_vm3, %v2722_v8, %v2850_v13  ;;  %v9909_v63 = vld [vmem:[#allocation75_spill] sm:$0xff]  ;;  %v9917_v29 = vld [vmem:[#allocation29_spill] sm:$0xff] }
 0x287   :  { %4164 = vmatpush3.xpose.msra.mxu0 %v2946_v42  ;;  %v1050_v54 = vsel %vm730_vm2, %v9897_v12, %v9895_v0  ;;  %v9904_v33 = vsub.f32 0.75, %v9903_v49  ;;  %v2625_v62 = vmul.f32 %v8129_v17, %v8129_v17  ;;  %v9906_v26 = vsub.f32 0.75, %v9905_v45  ;;  %v9915_v0 = vld [vmem:[#allocation132_spill] sm:$0xff] }
 0x288   :  { %v1065_v32 = vsel %vm745_vm7, %v9900_v10, %v9898_v7  ;;  %v2014_v44 = vmul.f32 %v1950_v61, %v1050_v54  ;;  %v2337_v16 = vsub.f32 %v8025_v57, %v6285_v25  ;;  %vm1644_vm5 = vcmp.lt.f32.partialorder %v9907_v30, 0.5  ;;  %v9912_v57 = vld [vmem:[#allocation256_spill] sm:$0xff] }
 0x289   :  { %v1965_v59 = vsel %vm1645_vm8, %v9904_v33, %v9902_v35  ;;  %v2929_v5 = vsel %vm2609_vm9, %v9906_v26, %v7612_v22  ;;  %v2753_v20 = vmul.f32 0.5, %v2497_v11  ;;  %v1372_v56 = vsub.f32 %v8052_v9, %v9584_v1  ;;  %v9918_v10 = vld [vmem:[#allocation24_spill] sm:$0xff] }
 0x28a   :  { %v2029_v37 = vmul.f32 %v1965_v59, %v1065_v32  ;;  %v2978_v15 = vmul.f32 %v2914_v43, %v2014_v44  ;;  %v9910_v18 = vsub.f32 0.75, %v9909_v63  ;;  %vm2608_vm14 = vcmp.lt.f32.partialorder %v9911_v55, 0.5  ;;  %v1209_v44 = vpop.permute.xlu1 %1208  ;;  %v9923_v43 = vld [vmem:[#allocation52_spill] sm:$0xff] }
 0x28b   :  { %v2401_v50 = vand.u32 2147483647, %v2337_v16  ;;  %v9914_v8 = vsub.f32 0.75, %v9913_v53  ;;  %v2897_v42 = vsel %vm2577_vm15, %v2705_v14, %v2833_v3  ;;  %v2817_v13 = vmul.f32 %v2753_v20, %v2497_v11  ;;  %v9925_v20 = vld [vmem:[#allocation8_spill] sm:$0xff] }
 0x28c   :  { %v1033_v19 = vsel %vm713_vm11, %v9910_v18, %v9908_v39  ;;  %v2993_v22 = vmul.f32 %v2929_v5, %v2029_v37  ;;  %4200 = vmatpush3.xpose.msra.mxu1 %v2978_v15  ;;  %v8181_v9 = vand.u32 2147483647, %v1372_v56  ;;  %v2320_v41 = vsub.f32 %v8092_v21, %v6285_v25  ;;  %v9924_v37 = vld [vmem:[#allocation21_spill] sm:$0xff] }
 0x28d   :  { %v1933_v31 = vsel %vm1613_vm12, %v9914_v8, %v9912_v57  ;;  %vm744_vm6 = vcmp.lt.f32.partialorder %v9915_v0, 0.5  ;;  %vm1612_vm7 = vcmp.lt.f32.partialorder %v9916_v27, 0.5  ;;  %v8189_v12 = vmul.f32 %v7716_v52, %v7619_v23  ;;  %v9920_v23 = vld [vmem:[#allocation213_spill] sm:$0xff]  ;;  %v9937_v0 = vld [vmem:[#allocation254_spill] sm:$0xff] }
 0x28e   :  { %v1997_v51 = vmul.f32 %v1933_v31, %v1033_v19  ;;  %v1885_v34 = vmul.f32 %v1821_v60, %v1565_v46  ;;  %vm2561_vm8 = vcmp.lt.f32.partialorder %v8129_v17, 0.5  ;;  %4201 = vmatprep.subr.mxu1 %v2993_v22  ;;  %v2465_v2 = vsub.f32 1.5, %v2401_v50  ;;  %v9921_v52 = vld [vmem:[#allocation205_spill] sm:$0xff]  ;;  %v9926_v17 = vld [vmem:[#allocation112_spill] sm:$0xff]  ;;  %v9928_v22 = vld [vmem:[#allocation183_spill] sm:$0xff] }
 0x28f   :  { %v2689_v14 = vsub.f32 0.75, %v2625_v62  ;;  %v2657_v3 = vmul.f32 %v2401_v50, %v2401_v50  ;;  %v1500_v54 = vsub.f32 1.5, %v8181_v9  ;;  %v2384_v21 = vand.u32 2147483647, %v2320_v41  ;;  %v9929_v8 = vld [vmem:[#allocation57_spill] sm:$0xff]  ;;  %v9930_v31 = vld [vmem:[#allocation312_spill] sm:$0xff] }
 0x290   :  { %v2961_v61 = vmul.f32 %v2897_v42, %v1997_v51  ;;  %v2529_v7 = vmax.f32 %v2465_v2, 0.0  ;;  %v9919_v32 = vsub.f32 0.75, %v9918_v10  ;;  %v9922_v46 = vsub.f32 0.75, %v9921_v52  ;;  %v9932_v41 = vld [vmem:[#allocation156_spill] sm:$0xff] }
 0x291   :  { %vm712_vm2 = vcmp.lt.f32.partialorder %v9923_v43, 0.5  ;;  %vm1629_vm9 = vcmp.lt.f32.partialorder %v8097_v48, 0.5  ;;  %v1757_v35 = vsub.f32 0.75, %v8125_v38  ;;  %v2881_v33 = vsel %vm2561_vm8, %v2689_v14, %v2817_v13  ;;  %v2109_v13 = vpop.permute.xlu1 %2108 }
 0x292   :  { %v1017_v11 = vsel %vm697_vm0, %v9919_v32, %v9917_v29  ;;  %v1917_v60 = vsel %vm1597_vm4, %v9922_v46, %v9920_v23  ;;  %4165 = vmatprep.subr.mxu0 %v2961_v61  ;;  %vm2593_vm10 = vcmp.lt.f32.partialorder %v2401_v50, 0.5  ;;  %v2785_v40 = vmul.f32 0.5, %v2529_v7  ;;  %v9938_v23 = vld [vmem:[#allocation247_spill] sm:$0xff]  ;;  %v9941_v46 = vld [vmem:[#allocation138_spill] sm:$0xff] }
 0x293   :  { %v1981_v49 = vmul.f32 %v1917_v60, %v1017_v11  ;;  %v1564_v59 = vmax.f32 %v1500_v54, 0.0  ;;  %v2448_v62 = vsub.f32 1.5, %v2384_v21  ;;  %vm696_vm11 = vcmp.lt.f32.partialorder %v9924_v37, 0.5  ;;  %v9942_v60 = vld [vmem:[#allocation92_spill] sm:$0xff] }
 0x294   :  { %v2721_v47 = vsub.f32 0.75, %v2657_v3  ;;  %v8211_v45 = vmul.f32 %v8181_v9, %v8181_v9  ;;  %v2304_v38 = vsub.f32 %v8121_v36, %v6285_v25  ;;  %v2849_v5 = vmul.f32 %v2785_v40, %v2529_v7  ;;  %v9935_v3 = vld [vmem:[#allocation285_spill] sm:$0xff] }
 0x295   :  { %v2945_v26 = vmul.f32 %v2881_v33, %v1981_v49  ;;  %v2512_v16 = vmax.f32 %v2448_v62, 0.0  ;;  %v9927_v15 = vsub.f32 0.75, %v9926_v17  ;;  %v1949_v39 = vsel %vm1629_vm9, %v1757_v35, %v1885_v34  ;;  %v9933_v34 = vld [vmem:[#allocation148_spill] sm:$0xff]  ;;  %v9944_v49 = vld [vmem:[#allocation74_spill] sm:$0xff]  ;;  %v9945_v33 = vld [vmem:[#allocation67_spill] sm:$0xff] }
 0x296   :  { %vm2576_vm13 = vcmp.lt.f32.partialorder %v2384_v21, 0.5  ;;  %v2640_v63 = vmul.f32 %v2384_v21, %v2384_v21  ;;  %v2368_v18 = vand.u32 2147483647, %v2304_v38  ;;  %vm1596_vm12 = vcmp.lt.f32.partialorder %v9928_v22, 0.5  ;;  %v9949_v21 = vld [vmem:[#allocation186_spill] sm:$0xff] }
 0x297   :  { %v1049_v56 = vsel %vm729_vm1, %v9927_v15, %v9925_v20  ;;  %4166 = vmatpush3.xpose.msra.mxu0 %v2945_v26  ;;  %v1820_v57 = vmul.f32 0.5, %v1564_v59  ;;  %v2768_v36 = vmul.f32 0.5, %v2512_v16  ;;  %v2913_v53 = vsel %vm2593_vm10, %v2721_v47, %v2849_v5  ;;  %v9947_v5 = vld [vmem:[#allocation58_spill] sm:$0xff] }
 0x298   :  { %v2013_v19 = vmul.f32 %v1949_v39, %v1049_v56  ;;  %v9931_v42 = vsub.f32 0.75, %v9930_v31  ;;  %v2432_v48 = vsub.f32 1.5, %v2368_v18  ;;  %v9934_v2 = vsub.f32 0.75, %v9933_v34  ;;  %v2045_v56 = vpop.permute.xlu1 %2044  ;;  %v9948_v39 = vld [vmem:[#allocation19_spill] sm:$0xff] }
 0x299   :  { %v9936_v54 = vsub.f32 0.75, %v9935_v3  ;;  %v2832_v61 = vmul.f32 %v2768_v36, %v2512_v16  ;;  %v2336_v30 = vsub.f32 %v8164_v28, %v6285_v25  ;;  %v1371_v29 = vsub.f32 %v1209_v44, %v9584_v1  ;;  %v9943_v28 = vld [vmem:[#allocation150_spill] sm:$0xff] }
 0x29a   :  { %v1964_v58 = vsel %vm1644_vm5, %v9931_v42, %v9929_v8  ;;  %v2977_v51 = vmul.f32 %v2913_v53, %v2013_v19  ;;  %v1064_v14 = vsel %vm744_vm6, %v9934_v2, %v9932_v41  ;;  %vm1628_vm3 = vcmp.lt.f32.partialorder %v8181_v9, 0.5  ;;  %v9950_v53 = vld [vmem:[#allocation231_spill] sm:$0xff]  ;;  %v9961_v9 = vld [vmem:[#allocation152_spill] sm:$0xff] }
 0x29b   :  { %v2928_v50 = vsel %vm2608_vm14, %v9936_v54, %v7945_v4  ;;  %v2028_v7 = vmul.f32 %v1964_v58, %v1064_v14  ;;  %v2704_v10 = vsub.f32 0.75, %v2640_v63  ;;  %v2496_v32 = vmax.f32 %v2432_v48, 0.0  ;;  %v9940_v4 = vld [vmem:[#allocation96_spill] sm:$0xff]  ;;  %v9952_v58 = vld [vmem:[#allocation30_spill] sm:$0xff] }
 0x29c   :  { %v2624_v11 = vmul.f32 %v2368_v18, %v2368_v18  ;;  %4202 = vmatpush3.xpose.msra.mxu1 %v2977_v51  ;;  %v9939_v52 = vsub.f32 0.75, %v9938_v23  ;;  %vm728_vm15 = vcmp.lt.f32.partialorder %v9940_v4, 0.5  ;;  %vm743_vm0 = vcmp.lt.f32.partialorder %v9941_v46, 0.5  ;;  %v48_v46 = vld [vmem:[%s8759_s4] sm:$0x1] }
 0x29d   :  { %vm1643_vm4 = vcmp.lt.f32.partialorder %v9942_v60, 0.5  ;;  %vm2607_vm1 = vcmp.lt.f32.partialorder %v9943_v28, 0.5  ;;  %v2992_v1 = vmul.f32 %v2928_v50, %v2028_v7  ;;  %v2400_v44 = vand.u32 2147483647, %v2336_v30 }
 0x29e   :  { %v1932_v55 = vsel %vm1612_vm7, %v9939_v52, %v9937_v0  ;;  %v8252_v35 = vand.u32 2147483647, %v1371_v29  ;;  %v9946_v40 = vsub.f32 0.75, %v9945_v33  ;;  %v2752_v27 = vmul.f32 0.5, %v2496_v32  ;;  %v9958_v0 = vld [vmem:[#allocation13_spill] sm:$0xff] }
 0x29f   :  { %v2896_v26 = vsel %vm2576_vm13, %v2704_v10, %v2832_v61  ;;  %v2319_v38 = vsub.f32 %v2109_v13, %v6285_v25  ;;  %vm711_vm5 = vcmp.lt.f32.partialorder %v9947_v5, 0.5  ;;  %v1756_v16 = vsub.f32 0.75, %v8211_v45  ;;  %4203 = vmatprep.subr.mxu1 %v2992_v1  ;;  %v9951_v45 = vld [vmem:[#allocation39_spill] sm:$0xff] }
 0x2a0   :  { %v1032_v62 = vsel %vm712_vm2, %v9946_v40, %v9944_v49  ;;  %v2464_v20 = vsub.f32 1.5, %v2400_v44  ;;  %v2656_v17 = vmul.f32 %v2400_v44, %v2400_v44  ;;  %v1499_v15 = vsub.f32 1.5, %v8252_v35  ;;  %v2173_v40 = vpop.permute.xlu1 %2172 }
 0x2a1   :  { %v1996_v47 = vmul.f32 %v1932_v55, %v1032_v62  ;;  %vm695_vm14 = vcmp.lt.f32.partialorder %v9948_v39, 0.5  ;;  %v1884_v43 = vmul.f32 %v1820_v57, %v1564_v59  ;;  %v2688_v63 = vsub.f32 0.75, %v2624_v11  ;;  %v9954_v59 = vld [vmem:[#allocation209_spill] sm:$0xff]  ;;  %v9955_v57 = vld [vmem:[#allocation199_spill] sm:$0xff] }
 0x2a2   :  { %v2816_v19 = vmul.f32 %v2752_v27, %v2496_v32  ;;  %vm1595_vm6 = vcmp.lt.f32.partialorder %v9949_v21, 0.5  ;;  %vm1611_vm7 = vcmp.lt.f32.partialorder %v9950_v53, 0.5  ;;  %v2528_v8 = vmax.f32 %v2464_v20, 0.0  ;;  %v9957_v11 = vld [vmem:[#allocation111_spill] sm:$0xff]  ;;  %v9960_v27 = vld [vmem:[#allocation164_spill] sm:$0xff]  ;;  %v44_v53 = vld [vmem:[%s8757_s2] sm:$0xff] }
 0x2a3   :  { %v2960_v36 = vmul.f32 %v2896_v26, %v1996_v47  ;;  %v1563_v31 = vmax.f32 %v1499_v15, 0.0  ;;  %v2383_v42 = vand.u32 2147483647, %v2319_v38  ;;  %v9953_v13 = vsub.f32 0.75, %v9952_v58  ;;  %v9963_v38 = vld [vmem:[#allocation240_spill] sm:$0xff] }
 0x2a4   :  { %vm2560_vm8 = vcmp.lt.f32.partialorder %v2368_v18, 0.5  ;;  %vm2592_vm2 = vcmp.lt.f32.partialorder %v2400_v44, 0.5  ;;  %v9956_v51 = vsub.f32 0.75, %v9955_v57  ;;  %v2303_v34 = vsub.f32 %v2045_v56, %v6285_v25  ;;  %v9973_v57 = vld [vmem:[#allocation31_spill] sm:$0xff] }
 0x2a5   :  { %v1016_v48 = vsel %vm696_vm11, %v9953_v13, %v9951_v45  ;;  %4167 = vmatprep.subr.mxu0 %v2960_v36  ;;  %v2720_v2 = vsub.f32 0.75, %v2656_v17  ;;  %v2784_v14 = vmul.f32 0.5, %v2528_v8  ;;  %v2447_v3 = vsub.f32 1.5, %v2383_v42  ;;  %v9966_v17 = vld [vmem:[#allocation99_spill] sm:$0xff]  ;;  %v9967_v36 = vld [vmem:[#allocation80_spill] sm:$0xff] }
 0x2a6   :  { %v1916_v41 = vsel %vm1596_vm12, %v9956_v51, %v9954_v59  ;;  %v2880_v54 = vsel %vm2560_vm8, %v2688_v63, %v2816_v19  ;;  %v1819_v50 = vmul.f32 0.5, %v1563_v31  ;;  %v2639_v61 = vmul.f32 %v2383_v42, %v2383_v42  ;;  %v8319_v13 = vld [vmem:[%s8760_s5] sm:$0x1]  ;;  %v9974_v51 = vld [vmem:[#allocation25_spill] sm:$0xff] }
 0x2a7   :  { %v1980_v7 = vmul.f32 %v1916_v41, %v1016_v48  ;;  %v2367_v37 = vand.u32 2147483647, %v2303_v34  ;;  %v2848_v30 = vmul.f32 %v2784_v14, %v2528_v8  ;;  %v2511_v18 = vmax.f32 %v2447_v3, 0.0  ;;  %v9968_v8 = vld [vmem:[#allocation69_spill] sm:$0xff]  ;;  %v9976_v14 = vld [vmem:[#allocation210_spill] sm:$0xff]  ;;  %v9977_v3 = vld [vmem:[#allocation200_spill] sm:$0xff] }
 0x2a8   :  { %vm2575_vm9 = vcmp.lt.f32.partialorder %v2383_v42, 0.5  ;;  %v1948_v29 = vsel %vm1628_vm3, %v1756_v16, %v1884_v43  ;;  %v2703_v10 = vsub.f32 0.75, %v2639_v61  ;;  %v9959_v23 = vsub.f32 0.75, %v9958_v0  ;;  %v9964_v16 = vld [vmem:[#allocation102_spill] sm:$0xff]  ;;  %v45_v42 = vld [vmem:[%s8757_s2 + $0x8] sm:$0x1] }
 0x2a9   :  { %v2944_v32 = vmul.f32 %v2880_v54, %v1980_v7  ;;  %v2431_v22 = vsub.f32 1.5, %v2367_v37  ;;  %v2767_v55 = vmul.f32 0.5, %v2511_v18  ;;  %v2623_v1 = vmul.f32 %v2367_v37, %v2367_v37 }
 0x2aa   :  { %v1048_v52 = vsel %vm728_vm15, %v9959_v23, %v9957_v11  ;;  %v2912_v33 = vsel %vm2592_vm2, %v2720_v2, %v2848_v30  ;;  %v9962_v47 = vsub.f32 0.75, %v9961_v9  ;;  %v9965_v20 = vsub.f32 0.75, %v9964_v16  ;;  %v46_v11 = vld [vmem:[%s8758_s3] sm:$0xff] }
 0x2ab   :  { %v2012_v49 = vmul.f32 %v1948_v29, %v1048_v52  ;;  %4168 = vmatpush3.xpose.msra.mxu0 %v2944_v32  ;;  %v2495_v62 = vmax.f32 %v2431_v22, 0.0  ;;  %v2927_v44 = vsel %vm2607_vm1, %v2735_v6, %v8189_v12  ;;  %vm727_vm10 = vcmp.lt.f32.partialorder %v9966_v17, 0.5  ;;  %v9970_v6 = vld [vmem:[#allocation252_spill] sm:$0xff]  ;;  %v9971_v12 = vld [vmem:[#allocation242_spill] sm:$0xff] }
 0x2ac   :  { %v1063_v26 = vsel %vm743_vm0, %v9962_v47, %v9960_v27  ;;  %v1963_v4 = vsel %vm1643_vm4, %v9965_v20, %v9963_v38  ;;  %v2831_v15 = vmul.f32 %v2767_v55, %v2511_v18  ;;  %v2687_v56 = vsub.f32 0.75, %v2623_v1  ;;  %v9979_v18 = vld [vmem:[#allocation16_spill] sm:$0xff] }
 0x2ad   :  { %v2976_v43 = vmul.f32 %v2912_v33, %v2012_v49  ;;  %v2027_v63 = vmul.f32 %v1963_v4, %v1063_v26  ;;  %v2751_v19 = vmul.f32 0.5, %v2495_v62  ;;  %v2335_v60 = vsub.f32 %v2173_v40, %v6285_v25 }
 0x2ae   :  { %v9969_v45 = vsub.f32 0.75, %v9968_v8  ;;  %v9972_v28 = vsub.f32 0.75, %v9971_v12  ;;  %v2895_v59 = vsel %vm2575_vm9, %v2703_v10, %v2831_v15  ;;  %v9975_v5 = vsub.f32 0.75, %v9974_v51  ;;  %v9980_v15 = vld [vmem:[#allocation116_spill] sm:$0xff] }
 0x2af   :  { %4204 = vmatpush3.xpose.msra.mxu1 %v2976_v43  ;;  %v2991_v48 = vmul.f32 %v2927_v44, %v2027_v63  ;;  %v2815_v34 = vmul.f32 %v2751_v19, %v2495_v62  ;;  %v2399_v2 = vand.u32 2147483647, %v2335_v60  ;;  %v9978_v54 = vsub.f32 0.75, %v9977_v3  ;;  %v43_v19 = vld [vmem:[%s8756_s1] sm:$0x7] }
 0x2b0   :  { %v1031_v24 = vsel %vm711_vm5, %v9969_v45, %v9967_v36  ;;  %v1931_v58 = vsel %vm1611_vm7, %v9972_v28, %v9970_v6  ;;  %v1015_v41 = vsel %vm695_vm14, %v9975_v5, %v9973_v57  ;;  %v3007_v7 = vmul.f32 -0.0512, %v48_v46  ;;  %v9983_v36 = vld [vmem:[#allocation15_spill] sm:$0xff] }
 0x2b1   :  { %v1995_v25 = vmul.f32 %v1931_v58, %v1031_v24  ;;  %v1915_v61 = vsel %vm1595_vm6, %v9978_v54, %v9976_v14  ;;  %vm2559_vm11 = vcmp.lt.f32.partialorder %v2367_v37, 0.5  ;;  %4205 = vmatprep.subr.mxu1 %v2991_v48  ;;  %v8340_v29 = vrot.slane %v8319_v13, %v9979_v18  ;;  %v47_v37 = vld [vmem:[%s8758_s3 + $0x8] sm:$0x1] }
 0x2b2   :  { %v1979_v30 = vmul.f32 %v1915_v61, %v1015_v41  ;;  %v1691_v10 = vmul.f32 %v8252_v35, %v8252_v35  ;;  %v1883_v32 = vmul.f32 %v1819_v50, %v1563_v31  ;;  %v2463_v22 = vsub.f32 1.5, %v2399_v2  ;;  %v4318_v50 = vld [vmem:[%s8755_s0] sm:$0x7] }
 0x2b3   :  { %v2959_v39 = vmul.f32 %v2895_v59, %v1995_v25  ;;  %v2879_v21 = vsel %vm2559_vm11, %v2687_v56, %v2815_v34  ;;  %v3012_v23 = vrot.slane %v3007_v7, %v9979_v18  ;;  %v3022_v52 = vmul.f32 %v8340_v29, %v44_v53  ;;  %v9981_v56 = vld [vmem:[#allocation108_spill] sm:$0xff] }
 0x2b4   :  { %v2943_v0 = vmul.f32 %v2879_v21, %v1979_v30  ;;  %v3023_v55 = vmul.f32 %v8340_v29, %v45_v42  ;;  %v2527_v1 = vmax.f32 %v2463_v22, 0.0  ;;  %v2655_v31 = vmul.f32 %v2399_v2, %v2399_v2 }
 0x2b5   :  { %4169 = vmatprep.subr.mxu0 %v2959_v39  ;;  %v3037_v49 = vrot.slane %v4318_v50, 5  ;;  %v3014_v33 = vmul.f32 %v3012_v23, %v46_v11  ;;  %v3015_v40 = vmul.f32 %v3012_v23, %v47_v37  ;;  %v4344_v62 = vmov 1966171168  }
 0x2b6   :  { %4170 = vmatpush3.xpose.msra.mxu0 %v2943_v0  ;;  %v3049_v27 = vunpack.c.l.s4 %v4344_v62  ;;  %v3091_v9 = vrot.slane %v4318_v50, 2  ;;  %vm1627_vm13 = vcmp.lt.f32.partialorder %v8252_v35, 0.5  ;;  %v1755_v47 = vsub.f32 0.75, %v1691_v10 }
 0x2b7   :  { %v2783_v26 = vmul.f32 0.5, %v2527_v1  ;;  %vm2591_vm12 = vcmp.lt.f32.partialorder %v2399_v2, 0.5  ;;  %v3024_v38 = vadd.f32 %v3022_v52, %v3014_v33  ;;  %v3025_v16 = vadd.f32 %v3023_v55, %v3015_v40 }
 0x2b8   :  { %v3050_v20 = vunpack.c.0.s8 %v3049_v27  ;;  %v2719_v4 = vsub.f32 0.75, %v2655_v31  ;;  %v9982_v43 = vsub.f32 0.75, %v9981_v56  ;;  %v1947_v46 = vsel %vm1627_vm13, %v1755_v47, %v1883_v32  ;;  %v8384_v47 = vld [vmem:[%s8762_s7] sm:$0x77]  ;;  %v9984_v56 = vld [vmem:[#allocation48_spill] sm:$0xff] }
 0x2b9   :  { %v2847_v44 = vmul.f32 %v2783_v26, %v2527_v1  ;;  %v3026_v35 = vmul.f32 %v4318_v50, %v3024_v38  ;;  %v3039_v60 = vmul.f32 %v3037_v49, %v3024_v38  ;;  %v3093_v45 = vmul.f32 %v3091_v9, %v3024_v38 }
 0x2ba   :  { %v1047_v63 = vsel %vm727_vm10, %v9982_v43, %v9980_v15  ;;  %v3053_v8 = vsub.s32 %v3050_v20, %v9983_v36  ;;  %v3098_v24 = vmul.f32 %v3091_v9, %v3025_v16  ;;  %v3034_v32 = vmul.f32 %v8319_v13, %v43_v19 }
 0x2bb   :  { %v2011_v6 = vmul.f32 %v1947_v46, %v1047_v63  ;;  %v2911_v12 = vsel %vm2591_vm12, %v2719_v4, %v2847_v44  ;;  %v3041_v28 = vrot.slane %v3039_v60, 1  ;;  %v3044_v58 = vrot.slane %v3039_v60, 2  ;;  %v9985_v46 = vld [vmem:[#allocation268_spill] sm:$0xff] }
 0x2bc   :  { %v3054_v48 = vrot.slane %v43_v19, %v3053_v8  ;;  %v3095_v25 = vrot.slane %v3093_v45, 1  ;;  %v3100_v59 = vrot.slane %v3098_v24, 2  ;;  %v3028_v57 = vrot.slane %v3026_v35, 1 }
 0x2bd   :  { %v2975_v17 = vmul.f32 %v2911_v12, %v2011_v6  ;;  %v3043_v51 = vadd.f32 %v3041_v28, %v3039_v60  ;;  %v3031_v3 = vrot.slane %v3026_v35, 2  ;;  %v3141_v52 = vrot.slane %v3025_v16, 5 }
 0x2be   :  { %v3055_v5 = vcombine.high %v3054_v48, %v3054_v48  ;;  %v3062_v41 = vrot.slane %v3054_v48, %v3053_v8  ;;  %v3097_v53 = vadd.f32 %v3095_v25, %v3093_v45  ;;  %v3030_v14 = vadd.f32 %v3028_v57, %v3026_v35 }
 0x2bf   :  { %4206 = vmatpush3.xpose.msra.mxu1 %v2975_v17  ;;  %v3046_v34 = vadd.f32 %v3044_v58, %v3043_v51  ;;  %v3140_v50 = vrot.slane %v3024_v38, 5  ;;  %vm3145_vm3 = vcmask 1040384   ;;  %vm3139_vm15 = vcmask 1042432  }
 0x2c0   :  { %v3102_v2 = vadd.f32 %v3100_v59, %v3097_v53  ;;  %v3069_v54 = vrot.slane %v3055_v5, %v3053_v8  ;;  %v3103_v42 = vcombine.high %v3062_v41, %v3062_v41  ;;  %v3033_v10 = vadd.f32 %v3031_v3, %v3030_v14 }
 0x2c1   :  { %v3079_v61 = vrot.slane %v3046_v34, %v3053_v8  ;;  %vm3147_vm0 = vcmask 1041408   ;;  %v3142_v40 = vsel %vm3139_vm15, %v3140_v50, %v3141_v52  ;;  %vm3150_vm4 = vcmask 1043456  }
 0x2c2   :  { %v3107_v7 = vcombine.high %v3102_v2, %v3102_v2  ;;  %v3071_v22 = vmul.f32 %v3069_v54, %v8319_v13  ;;  %v3105_v11 = vmul.f32 %v3103_v42, %v8319_v13  ;;  %v3035_v55 = vsub.f32 %v3034_v32, %v3033_v10 }
 0x2c3   :  { %v3080_v39 = vcombine.high %v3079_v61, %v3079_v61  ;;  %v3151_v9 = vsel %vm3150_vm4, %v3142_v40, %v8340_v29  ;;  %vm3152_vm1 = vcmask 1044480   ;;  %v8389_v29 = vld [vmem:[%s8762_s7 + $0x8] sm:$0x77]  ;;  %v8392_v26 = vmul.f32 0.125, %v8384_v47  ;;  %s4345_s7 = smov [#allocation3]  }
 0x2c4   :  { %v3114_v30 = vrot.slane %v3107_v7, %v3053_v8  ;;  %v8395_v38 = vsub.s32 4, %v9983_v36  ;;  %v8398_v16 = vmul.f32 0.125, %v8389_v29  ;;  %v8401_v20 = vsub.s32 5, %v9983_v36  ;;  %s4126_s18 = sshll.u32 %s4345_s7, 4  ;;  %s4127_s18 = int_to_ptr.vmem [resolvable:$true] %s4126_s18 }
 0x2c5   :  { %v3087_v21 = vrot.slane %v3080_v39, %v3053_v8  ;;  %v8404_v4 = vsub.s32 6, %v9983_v36  ;;  %v3773_v44 = vrot.slane %v8392_v26, 5  ;;  %v3368_v15 = vrot.slane %v8392_v26, %v9979_v18  ;;  %s4319_s19 = scalar_lea.vmem %s4127_s18, 1024  ;;  %p4324_p1 = scmp.lt.s32.totalorder %s4127_s18, %s4127_s18 }
 0x2c6   :  { %v3121_v37 = vrot.slane %v3114_v30, %v3053_v8  ;;  %v3408_v43 = vrot.slane %v8392_v26, %v9984_v56  ;;  %v3781_v63 = vrot.slane %v8392_v26, 6  ;;  %v3448_v19 = vrot.slane %v8392_v26, %v9985_v46  ;;  %p4320_p0 = scmp.ne.s32.totalorder %s4127_s18, %s4319_s19  ;;  %p4325_p2 = scmp.lt.s32.totalorder %s4319_s19, %s4319_s19 }
 0x2c7   :  { %v3088_v0 = vcombine.high %v3087_v21, %v3087_v21  ;;  %v3372_v35 = vrot.slane %v8392_v26, %v8395_v38  ;;  %v8418_v60 = vrot.slane %v8398_v16, %v9979_v18  ;;  %v8422_v36 = vrot.slane %v8398_v16, %v9984_v56 }
 0x2c8   :  { %v3122_v23 = vcombine.high %v3121_v37, %v3121_v37  ;;  %v3412_v24 = vrot.slane %v8392_v26, %v8401_v20  ;;  %v3452_v6 = vrot.slane %v8392_v26, %v8404_v4  ;;  %v8430_v12 = vrot.slane %v3773_v44, 4  ;;  %p4326_p3 = por %p4325_p2, %p4324_p1 }
 0x2c9   :  { %v3090_v1 = vsub.f32 %v3071_v22, %v3088_v0  ;;  %v3789_v28 = vrot.slane %v8392_v26, 7  ;;  %v8435_v25 = vrot.slane %v3781_v63, 4  ;;  %v8439_v59 = vrot.slane %v8398_v16, %v9985_v46 }
 0x2ca   :  { %v3124_v31 = vsub.f32 %v3105_v11, %v3122_v23  ;;  %v8443_v51 = vrot.slane %v8398_v16, %v8395_v38  ;;  %v8447_v5 = vrot.slane %v8398_v16, %v8401_v20  ;;  %v8451_v41 = vrot.slane %v8398_v16, %v8404_v4  ;;  %p4327_p4 = pnand %p4326_p3, %p4320_p0 }
 0x2cb   :  { %v3129_v49 = vrot.slane %v3090_v1, %v9979_v18  ;;  %vm3521_vm8 = vcmp.lt.f32.partialorder %v8384_v47, 1.5  ;;  %vm3523_vm2 = vcmp.gt.f32.partialorder %v8384_v47, 6.5 }
 0x2cc   :  { %v3135_v33 = vrot.slane %v3124_v31, %v9979_v18 }
 0x2cd   :  { %v3146_v13 = vsel %vm3145_vm3, %v3035_v55, %v3129_v49 }
 0x2ce   :  { %v3148_v62 = vsel %vm3147_vm0, %v3146_v13, %v3135_v33 }
 0x2cf   :  { %v3149_v27 = vsel %vm3139_vm15, %v3148_v62, %v3140_v50 }
 0x2d0   :  { %4171 = vmatprep.mubr.f32.mxu0 %v3149_v27  ;;  %4207 = vmatprep.mubr.f32.mxu1 %v3149_v27 }
 0x2d1   :  { %4172 = vmatmul.mubr.f32.vlgmr.msra.gmra.mxu0 %v3149_v27  ;;  %4208 = vmatmul.mubr.f32.vlgmr.msra.gmra.mxu1 %v3149_v27 }
 0x2d2   :  { %4173 = vmatprep.mubr.msk.f32.mxu0 %vm3152_vm1, %v3151_v9  ;;  %4209 = vmatprep.mubr.msk.f32.mxu1 %vm3152_vm1, %v3151_v9 }
 0x2d5   :  { %4174 = vmatmul.mubr.msk.f32.gmra.mxu0 %vm3152_vm1, %v3151_v9  ;;  %4210 = vmatmul.mubr.msk.f32.gmra.mxu1 %vm3152_vm1, %v3151_v9 }
 0x391   :  { %v3228_v8 = vpop.f32.mrf.mxu0  ;;  %v8424_v45 = vpop.f32.mrf.mxu1 }
 0x392   :  { %v3385_v58 = vmul.f32 %v3368_v15, %v3228_v8  ;;  %v3425_v48 = vmul.f32 %v3408_v43, %v3228_v8  ;;  %v3465_v57 = vmul.f32 %v3448_v19, %v3228_v8  ;;  %v8455_v2 = vmul.f32 %v8418_v60, %v8424_v45 }
 0x393   :  { %v3230_v17 = vpop.f32.mrf.mxu0  ;;  %v8459_v14 = vmul.f32 %v8422_v36, %v8424_v45  ;;  %v8465_v32 = vpop.f32.mrf.mxu1  ;;  %v8475_v0 = vmul.f32 %v8439_v59, %v8424_v45 }
 0x394   :  { %v3393_v53 = vrot.slane %v3385_v58, 3  ;;  %v3555_v34 = vrot.slane %v3385_v58, 5  ;;  %v3433_v54 = vrot.slane %v3425_v48, 4  ;;  %v3567_v61 = vrot.slane %v3425_v48, 6 }
 0x395   :  { %v8461_v3 = vpop.f32.mrf.mxu0  ;;  %v3386_v42 = vmul.f32 %v3372_v35, %v3230_v17  ;;  %v3426_v7 = vmul.f32 %v3412_v24, %v3230_v17  ;;  %v3473_v23 = vrot.slane %v3465_v57, 5  ;;  %v3466_v55 = vmul.f32 %v3452_v6, %v3230_v17  ;;  %v8482_v62 = vpop.f32.mrf.mxu1 }
 0x396   :  { %vm3347_vm5 = vcmp.gt.f32.partialorder %v8461_v3, 0.0  ;;  %v3401_v39 = vadd.f32 %v3393_v53, %v3228_v8  ;;  %v3563_v30 = vadd.f32 %v3555_v34, %v3228_v8  ;;  %v3579_v10 = vmul.f32 %v3448_v19, %v8461_v3 }
 0x397   :  { %v3351_v22 = vsel %vm3347_vm5, %v8461_v3, 1.0  ;;  %v3665_v21 = vmul.f32 %v3368_v15, %v8461_v3  ;;  %v8471_v11 = vpop.f32.mrf.mxu0  ;;  %v3394_v37 = vrot.slane %v3386_v42, 3  ;;  %v3685_v52 = vmul.f32 %v3408_v43, %v8461_v3 }
 0x398   :  { %4254 = vrcp.f32 %v3351_v22  ;;  %v3441_v1 = vadd.f32 %v3433_v54, %v3401_v39  ;;  %vm3348_vm14 = vcmp.gt.f32.partialorder %v8471_v11, 0.0  ;;  %v3575_v49 = vadd.f32 %v3567_v61, %v3563_v30  ;;  %v8492_v22 = vpop.f32.mrf.mxu1 }
 0x399   :  { %v3673_v31 = vrot.slane %v3665_v21, 7  ;;  %v3402_v50 = vadd.f32 %v3394_v37, %v3230_v17  ;;  %v3587_v33 = vrot.slane %v3579_v10, 7  ;;  %v3352_v40 = vsel %vm3348_vm14, %v8471_v11, 1.0 }
 0x39a   :  { %v3434_v13 = vrot.slane %v3426_v7, 4  ;;  %v3693_v9 = vrot.slane %v3579_v10, 1  ;;  %4256 = vrcp.f32 %v3352_v40  ;;  %v3556_v44 = vrot.slane %v3386_v42, 5 }
 0x39b   :  { %v3681_v27 = vadd.f32 %v3673_v31, %v3228_v8  ;;  %v3568_v43 = vrot.slane %v3426_v7, 6  ;;  %v3580_v19 = vmul.f32 %v3452_v6, %v8471_v11  ;;  %v3666_v58 = vmul.f32 %v3372_v35, %v8471_v11 }
 0x39c   :  { %v3442_v15 = vadd.f32 %v3434_v13, %v3402_v50  ;;  %v3474_v57 = vrot.slane %v3466_v55, 5  ;;  %v3564_v53 = vadd.f32 %v3556_v44, %v3230_v17  ;;  %vm3349_vm6 = vcmp.gt.f32.partialorder %v8482_v62, 0.0 }
 0x39d   :  { %v3689_v48 = vadd.f32 %v3685_v52, %v3681_v27  ;;  %v3481_v34 = vadd.f32 %v3473_v23, %v3441_v1  ;;  %v3595_v54 = vadd.f32 %v3587_v33, %v3575_v49  ;;  %v3674_v61 = vrot.slane %v3666_v58, 7 }
 0x39e   :  { %v3686_v39 = vmul.f32 %v3412_v24, %v8471_v11  ;;  %v3482_v8 = vadd.f32 %v3474_v57, %v3442_v15  ;;  %v3588_v30 = vrot.slane %v3580_v19, 7  ;;  %v3353_v42 = vsel %vm3349_vm6, %v8482_v62, 1.0 }
 0x39f   :  { %v3395_v6 = vrot.slane %v8455_v2, 3  ;;  %v3576_v7 = vadd.f32 %v3568_v43, %v3564_v53  ;;  %v3682_v35 = vadd.f32 %v3674_v61, %v3230_v17  ;;  %v3694_v10 = vrot.slane %v3580_v19, 1 }
 0x3a0   :  { %4258 = vrcp.f32 %v3353_v42  ;;  %v3701_v21 = vadd.f32 %v3693_v9, %v3689_v48  ;;  %v3435_v23 = vrot.slane %v8459_v14, 4  ;;  %v3557_v24 = vrot.slane %v8455_v2, 5 }
 0x3a1   :  { %v3403_v37 = vadd.f32 %v3395_v6, %v8424_v45  ;;  %v3690_v52 = vadd.f32 %v3686_v39, %v3682_v35  ;;  %v3475_v55 = vrot.slane %v8475_v0, 5  ;;  %v8500_v1 = vmul.f32 %v8439_v59, %v8482_v62 }
 0x3a2   :  { %v3667_v17 = vmul.f32 %v8418_v60, %v8482_v62  ;;  %v3565_v31 = vadd.f32 %v3557_v24, %v8424_v45  ;;  %v3569_v50 = vrot.slane %v8459_v14, 6  ;;  %vm3350_vm7 = vcmp.gt.f32.partialorder %v8492_v22, 0.0 }
 0x3a3   :  { %v8509_v49 = vmul.f32 %v8443_v51, %v8465_v32  ;;  %v3596_v2 = vadd.f32 %v3588_v30, %v3576_v7  ;;  %v3443_v33 = vadd.f32 %v3435_v23, %v3403_v37  ;;  %v3589_v0 = vrot.slane %v8500_v1, 7 }
 0x3a4   :  { %v3675_v40 = vrot.slane %v3667_v17, 7  ;;  %v3577_v13 = vadd.f32 %v3569_v50, %v3565_v31  ;;  %v3687_v60 = vmul.f32 %v8422_v36, %v8482_v62  ;;  %v3354_v14 = vsel %vm3350_vm7, %v8492_v22, 1.0 }
 0x3a5   :  { %v4255_v59 = vpop.eup %4254  ;;  %v3396_v27 = vrot.slane %v8509_v49, 3  ;;  %v3702_v44 = vadd.f32 %v3694_v10, %v3690_v52  ;;  %4260 = vrcp.f32 %v3354_v14  ;;  %v8522_v15 = vmul.f32 %v8447_v5, %v8465_v32 }
 0x3a6   :  { %v3359_v9 = vsel %vm3347_vm5, %v4255_v59, 0.0  ;;  %v3695_v36 = vrot.slane %v8500_v1, 1  ;;  %v8525_v57 = vadd.f32 %v3475_v55, %v3443_v33  ;;  %v3597_v53 = vadd.f32 %v3589_v0, %v3577_v13 }
 0x3a7   :  { %v3489_v43 = vrot.slane %v3359_v9, 4  ;;  %v3599_v19 = vrot.slane %v3359_v9, 3  ;;  %v3705_v58 = vrot.slane %v3359_v9, 2  ;;  %v4257_v48 = vpop.eup %4256  ;;  %v3683_v61 = vadd.f32 %v3675_v40, %v8424_v45 }
 0x3a8   :  { %v3404_v39 = vadd.f32 %v3396_v27, %v8465_v32  ;;  %v3360_v6 = vsel %vm3348_vm14, %v4257_v48, 0.0  ;;  %v3436_v23 = vrot.slane %v8522_v15, 4  ;;  %v3468_v45 = vmul.f32 %v8451_v41, %v8465_v32 }
 0x3a9   :  { %v3607_v30 = vmul.f32 %v3599_v19, %v3595_v54  ;;  %v3713_v42 = vmul.f32 %v3705_v58, %v3701_v21  ;;  %v3497_v7 = vmul.f32 %v3489_v43, %v3481_v34  ;;  %v3490_v35 = vrot.slane %v3360_v6, 4 }
 0x3aa   :  { %v3600_v10 = vrot.slane %v3360_v6, 3  ;;  %v3706_v37 = vrot.slane %v3360_v6, 2  ;;  %v8535_v31 = vadd.f32 %v3687_v60, %v3683_v61  ;;  %v3444_v40 = vadd.f32 %v3436_v23, %v3404_v39 }
 0x3ab   :  { %v3611_v24 = vadd.f32 -0.00196, %v3607_v30  ;;  %v3725_v52 = vrot.slane %v3713_v42, 6  ;;  %v3509_v55 = vrot.slane %v3497_v7, 4  ;;  %v3498_v17 = vmul.f32 %v3490_v35, %v3482_v8 }
 0x3ac   :  { %v3608_v54 = vmul.f32 %v3600_v10, %v3596_v2  ;;  %v3714_v21 = vmul.f32 %v3706_v37, %v3702_v44  ;;  %v9986_v8 = vmov 0   ;;  %v3476_v27 = vrot.slane %v3468_v45, 5 }
 0x3ad   :  { %v4259_v50 = vpop.eup %4258  ;;  %v3619_v34 = vrot.slane %v3611_v24, 5  ;;  %v3517_v33 = vsel %vm3347_vm5, %v3509_v55, 0.0  ;;  %v3733_v0 = vsel %vm3347_vm5, %v3725_v52, 0.0  ;;  %v3510_v59 = vrot.slane %v3498_v17, 4 }
 0x3ae   :  { %vm3525_vm9 = vcmp.lt.f32.partialorder %v3517_v33, 0.0  ;;  %v3612_v13 = vadd.f32 -0.00196, %v3608_v54  ;;  %v3726_v14 = vrot.slane %v3714_v21, 6  ;;  %vm3737_vm10 = vcmp.lt.f32.partialorder %v3733_v0, 0.0 }
 0x3af   :  { %v3529_v2 = vsel %vm3525_vm9, 1, %v9986_v8  ;;  %v3627_v60 = vsel %vm3347_vm5, %v3619_v34, 0.0  ;;  %v3518_v9 = vsel %vm3348_vm14, %v3510_v59, 0.0  ;;  %v8551_v19 = vsel %vm3349_vm6, %v4259_v50, 0.0 }
 0x3b0   :  { %v3620_v44 = vrot.slane %v3612_v13, 5  ;;  %v3734_v43 = vsel %vm3348_vm14, %v3726_v14, 0.0  ;;  %vm3526_vm11 = vcmp.lt.f32.partialorder %v3518_v9, 0.0  ;;  %v3543_v58 = vcombine.high %v3517_v33, %v3518_v9 }
 0x3b1   :  { %vm3631_vm13 = vcmp.lt.f32.partialorder %v3627_v60, 0.0  ;;  %vm3738_vm12 = vcmp.lt.f32.partialorder %v3734_v43, 0.0  ;;  %v3530_v3 = vsel %vm3526_vm11, 1, %v9986_v8  ;;  %v3741_v61 = vsel %vm3737_vm10, 1, %v9986_v8 }
 0x3b2   :  { %v3628_v48 = vsel %vm3348_vm14, %v3620_v44, 0.0  ;;  %v3742_v39 = vsel %vm3738_vm12, 1, %v9986_v8  ;;  %v4261_v30 = vpop.eup %4260  ;;  %v3533_v42 = vcombine.high %v3529_v2, %v3530_v3  ;;  %v3635_v35 = vsel %vm3631_vm13, 1, %v9986_v8 }
 0x3b3   :  { %vm3632_vm5 = vcmp.lt.f32.partialorder %v3628_v48, 0.0  ;;  %v3651_v6 = vcombine.high %v3627_v60, %v3628_v48  ;;  %v3745_v7 = vcombine.high %v3741_v61, %v3742_v39  ;;  %v3757_v37 = vcombine.high %v3733_v0, %v3734_v43 }
 0x3b4   :  { %v3636_v10 = vsel %vm3632_vm5, 1, %v9986_v8  ;;  %v3601_v23 = vrot.slane %v8551_v19, 3  ;;  %vm3535_vm9 = vcmp.ne.s32.totalorder %v3533_v42, 0  ;;  %v3491_v52 = vrot.slane %v8551_v19, 4 }
 0x3b5   :  { %v3639_v24 = vcombine.high %v3635_v35, %v3636_v10  ;;  %v3747_v11 = vrot.slane %v3745_v7, 6  ;;  %vm3537_vm14 = vmand %vm3521_vm8, %vm3535_vm9  ;;  %v3653_v55 = vrot.slane %v3651_v6, 7  ;;  %v8566_v17 = vsel %vm3350_vm7, %v4261_v30, 0.0 }
 0x3b6   :  { %v3609_v45 = vmul.f32 %v3601_v23, %v3597_v53  ;;  %v3558_v54 = vrot.slane %v8509_v49, 5  ;;  %v3547_v21 = vsel %vm3537_vm14, 0.0, %v3543_v58  ;;  %v3759_v34 = vrot.slane %v3757_v37, 6 }
 0x3b7   :  { %v3641_v50 = vrot.slane %v3639_v24, 7  ;;  %vm3749_vm10 = vcmp.ne.s32.totalorder %v3747_v11, 0  ;;  %vm3549_vm11 = vcmp.gt.f32.partialorder %v3547_v21, 0.0  ;;  %v3707_v0 = vrot.slane %v8551_v19, 2 }
 0x3b8   :  { %vm3751_vm13 = vmand %vm3521_vm8, %vm3749_vm10  ;;  %v8571_v33 = vadd.f32 -0.00196, %v3609_v45  ;;  %v8574_v59 = vadd.f32 %v3476_v27, %v3444_v40  ;;  %v3492_v49 = vrot.slane %v8566_v17, 4  ;;  %v8580_v13 = vmul.f32 %v3491_v52, %v8525_v57 }
 0x3b9   :  { %vm3551_vm12 = vmand %vm3523_vm2, %vm3549_vm11  ;;  %vm3643_vm5 = vcmp.ne.s32.totalorder %v3641_v50, 0  ;;  %v3763_v53 = vsel %vm3751_vm13, 0.0, %v3759_v34  ;;  %v8586_v40 = vadd.f32 %v3558_v54, %v8465_v32  ;;  %vm4091_vm13 = vcmask 1045504  }
 0x3ba   :  { %v3553_v14 = vsel %vm3551_vm12, 0.0, %v3547_v21  ;;  %vm3645_vm9 = vmand %vm3521_vm8, %vm3643_vm5  ;;  %vm3765_vm14 = vcmp.gt.f32.partialorder %v3763_v53, 0.0  ;;  %v3621_v2 = vrot.slane %v8571_v33, 5  ;;  %v3688_v19 = vmul.f32 %v8447_v5, %v8492_v22 }
 0x3bb   :  { %v3657_v60 = vsel %vm3645_vm9, 0.0, %v3653_v55  ;;  %vm3767_vm10 = vmand %vm3523_vm2, %vm3765_vm14  ;;  %v3771_v27 = vmul.f32 %v3553_v14, %v8392_v26  ;;  %v3779_v9 = vmul.f32 %v8430_v12, %v3553_v14  ;;  %v3787_v57 = vmul.f32 %v8435_v25, %v3553_v14 }
 0x3bc   :  { %vm3659_vm11 = vcmp.gt.f32.partialorder %v3657_v60, 0.0  ;;  %v3769_v44 = vsel %vm3767_vm10, 0.0, %v3763_v53  ;;  %v3812_v43 = vrot.slane %v3553_v14, %v9979_v18  ;;  %v3816_v58 = vrot.slane %v3553_v14, %v8395_v38 }
 0x3bd   :  { %vm3661_vm8 = vmand %vm3523_vm2, %vm3659_vm11  ;;  %v3801_v3 = vmul.f32 %v3781_v63, %v3769_v44  ;;  %v3803_v48 = vmul.f32 %v3789_v28, %v3769_v44  ;;  %v3805_v61 = vmul.f32 %v3769_v44, %v8392_v26  ;;  %v3856_v39 = vrot.slane %v3769_v44, %v9985_v46 }
 0x3be   :  { %v3663_v25 = vsel %vm3661_vm8, 0.0, %v3657_v60  ;;  %v3860_v30 = vrot.slane %v3769_v44, %v8404_v4  ;;  %v3878_v42 = vrot.slane %v3771_v27, %v9979_v18  ;;  %v3882_v6 = vrot.slane %v3771_v27, %v8395_v38 }
 0x3bf   :  { %v3793_v47 = vmul.f32 %v3789_v28, %v3663_v25  ;;  %v3795_v63 = vmul.f32 %v3663_v25, %v8392_v26  ;;  %v3797_v7 = vmul.f32 %v8430_v12, %v3663_v25  ;;  %v3834_v35 = vrot.slane %v3663_v25, %v9984_v56 }
 0x3c0   :  { %vm4096_vm2 = vcmask 1046528   ;;  %v3838_v10 = vrot.slane %v3663_v25, %v8401_v20  ;;  %v3900_v37 = vrot.slane %v3779_v9, %v9979_v18  ;;  %v3904_v23 = vrot.slane %v3779_v9, %v8395_v38 }
 0x3c1   :  { %v3922_v24 = vrot.slane %v3787_v57, %v9979_v18  ;;  %v3926_v11 = vrot.slane %v3787_v57, %v8395_v38  ;;  %v3944_v52 = vrot.slane %v3793_v47, %v9984_v56  ;;  %v3948_v28 = vrot.slane %v3793_v47, %v8401_v20 }
 0x3c2   :  { %v3966_v26 = vrot.slane %v3795_v63, %v9984_v56  ;;  %v3970_v12 = vrot.slane %v3795_v63, %v8401_v20  ;;  %v3988_v55 = vrot.slane %v3797_v7, %v9984_v56  ;;  %v3992_v45 = vrot.slane %v3797_v7, %v8401_v20 }
 0x3c3   :  { %v4010_v54 = vrot.slane %v3801_v3, %v9985_v46  ;;  %v4014_v21 = vrot.slane %v3801_v3, %v8404_v4  ;;  %v4032_v50 = vrot.slane %v3803_v48, %v9985_v46  ;;  %v4036_v34 = vrot.slane %v3803_v48, %v8404_v4 }
 0x3c4   :  { %v4054_v53 = vrot.slane %v3805_v61, %v9985_v46  ;;  %v4058_v14 = vrot.slane %v3805_v61, %v8404_v4  ;;  %v4071_v60 = vsel %vm3145_vm3, %v3812_v43, %v3834_v35  ;;  %v4072_v27 = vsel %vm3145_vm3, %v3816_v58, %v3838_v10 }
 0x3c5   :  { %v4101_v9 = vsel %vm3145_vm3, %v3988_v55, %v4010_v54  ;;  %v4075_v57 = vsel %vm3147_vm0, %v4071_v60, %v3856_v39  ;;  %v4076_v44 = vsel %vm3147_vm0, %v4072_v27, %v3860_v30  ;;  %v4102_v3 = vsel %vm3145_vm3, %v3992_v45, %v4014_v21 }
 0x3c6   :  { %v4105_v25 = vsel %vm3147_vm0, %v4101_v9, %v4032_v50  ;;  %v4079_v48 = vsel %vm3139_vm15, %v4075_v57, %v3878_v42  ;;  %v4080_v47 = vsel %vm3139_vm15, %v4076_v44, %v3882_v6  ;;  %v4106_v61 = vsel %vm3147_vm0, %v4102_v3, %v4036_v34 }
 0x3c7   :  { %v4109_v43 = vsel %vm3139_vm15, %v4105_v25, %v4054_v53  ;;  %v4083_v58 = vsel %vm3150_vm4, %v4079_v48, %v3900_v37  ;;  %v4084_v63 = vsel %vm3150_vm4, %v4080_v47, %v3904_v23  ;;  %v4110_v39 = vsel %vm3139_vm15, %v4106_v61, %v4058_v14 }
 0x3c8   :  { %4117 = vst [vmem:[#allocation3 + $0x20] sm:$0xf] %v4109_v43  ;;  %v3500_v30 = vmul.f32 %v3492_v49, %v8574_v59  ;;  %v4087_v7 = vsel %vm3152_vm1, %v4083_v58, %v3922_v24  ;;  %v4088_v42 = vsel %vm3152_vm1, %v4084_v63, %v3926_v11  ;;  %4118 = vst [vmem:[#allocation3 + $0x28] sm:$0xf] %v4110_v39  ;;  %v3511_v6 = vrot.slane %v8580_v13, 4 }
 0x3c9   :  { %v3570_v35 = vrot.slane %v8522_v15, 6  ;;  %v4092_v10 = vsel %vm4091_vm13, %v4087_v7, %v3944_v52  ;;  %v4093_v37 = vsel %vm4091_vm13, %v4088_v42, %v3948_v28  ;;  %v3582_v55 = vmul.f32 %v8451_v41, %v8492_v22 }
 0x3ca   :  { %v3512_v23 = vrot.slane %v3500_v30, 4  ;;  %v4097_v45 = vsel %vm4096_vm2, %v4092_v10, %v3966_v26  ;;  %v4098_v59 = vsel %vm4096_vm2, %v4093_v37, %v3970_v12  ;;  %v3519_v49 = vsel %vm3349_vm6, %v3511_v6, 0.0 }
 0x3cb   :  { %v3578_v24 = vadd.f32 %v3570_v35, %v8586_v40  ;;  %4113 = vst [vmem:[#allocation3] sm:$0xff] %v4097_v45  ;;  %4114 = vst [vmem:[#allocation3 + $0x8] sm:$0xff] %v4098_v59  ;;  %vm3527_vm12 = vcmp.lt.f32.partialorder %v3519_v49, 0.0  ;;  %v3590_v13 = vrot.slane %v3582_v55, 7  ;;  %v3602_v11 = vrot.slane %v8566_v17, 3 }
 0x3cc   :  { %v3520_v15 = vsel %vm3350_vm7, %v3512_v23, 0.0  ;;  %v3703_v41 = vadd.f32 %v3695_v36, %v8535_v31  ;;  %v3531_v52 = vsel %vm3527_vm12, 1, %v9986_v8  ;;  %v3668_v40 = vmul.f32 %v8443_v51, %v8492_v22 }
 0x3cd   :  { %vm3528_vm5 = vcmp.lt.f32.partialorder %v3520_v15, 0.0  ;;  %v3598_v26 = vadd.f32 %v3590_v13, %v3578_v24  ;;  %vm3522_vm9 = vcmp.lt.f32.partialorder %v8389_v29, 1.5  ;;  %v3629_v1 = vsel %vm3349_vm6, %v3621_v2, 0.0 }
 0x3ce   :  { %v3532_v28 = vsel %vm3528_vm5, 1, %v9986_v8  ;;  %v3715_v12 = vmul.f32 %v3707_v0, %v3703_v41  ;;  %v3676_v36 = vrot.slane %v3668_v40, 7  ;;  %v3544_v50 = vcombine.high %v3519_v49, %v3520_v15 }
 0x3cf   :  { %v3534_v54 = vcombine.high %v3531_v52, %v3532_v28  ;;  %v3610_v21 = vmul.f32 %v3602_v11, %v3598_v26  ;;  %vm3633_vm11 = vcmp.lt.f32.partialorder %v3629_v1, 0.0  ;;  %v3696_v33 = vrot.slane %v3582_v55, 1 }
 0x3d0   :  { %v3684_v51 = vadd.f32 %v3676_v36, %v8465_v32  ;;  %v3727_v0 = vrot.slane %v3715_v12, 6  ;;  %v3708_v14 = vrot.slane %v8566_v17, 2  ;;  %vm3524_vm8 = vcmp.gt.f32.partialorder %v8389_v29, 6.5 }
 0x3d1   :  { %vm3536_vm14 = vcmp.ne.s32.totalorder %v3534_v54, 0  ;;  %v3614_v31 = vadd.f32 -0.00196, %v3610_v21  ;;  %v3637_v32 = vsel %vm3633_vm11, 1, %v9986_v8  ;;  %v3775_v25 = vrot.slane %v8398_v16, 5 }
 0x3d2   :  { %vm3538_vm10 = vmand %vm3522_vm9, %vm3536_vm14  ;;  %v3692_v53 = vadd.f32 %v3688_v19, %v3684_v51  ;;  %v3735_v57 = vsel %vm3349_vm6, %v3727_v0, 0.0  ;;  %v3783_v47 = vrot.slane %v8398_v16, 6  ;;  %v3790_v10 = vrot.slane %v8398_v16, 7 }
 0x3d3   :  { %v3622_v34 = vrot.slane %v3614_v31, 5  ;;  %v3548_v2 = vsel %vm3538_vm10, 0.0, %v3544_v50  ;;  %vm3739_vm10 = vcmp.lt.f32.partialorder %v3735_v57, 0.0  ;;  %v3776_v39 = vrot.slane %v3775_v25, 4 }
 0x3d4   :  { %v3704_v27 = vadd.f32 %v3696_v33, %v3692_v53  ;;  %vm3550_vm5 = vcmp.gt.f32.partialorder %v3548_v2, 0.0  ;;  %v3743_v58 = vsel %vm3739_vm10, 1, %v9986_v8  ;;  %v3784_v6 = vrot.slane %v3783_v47, 4 }
 0x3d5   :  { %v3630_v60 = vsel %vm3350_vm7, %v3622_v34, 0.0  ;;  %vm3552_vm14 = vmand %vm3524_vm8, %vm3550_vm5 }
 0x3d6   :  { %vm3634_vm12 = vcmp.lt.f32.partialorder %v3630_v60, 0.0  ;;  %v3716_v9 = vmul.f32 %v3708_v14, %v3704_v27  ;;  %v3652_v3 = vcombine.high %v3629_v1, %v3630_v60  ;;  %v3554_v62 = vsel %vm3552_vm14, 0.0, %v3548_v2 }
 0x3d7   :  { %v3638_v5 = vsel %vm3634_vm12, 1, %v9986_v8  ;;  %v3772_v35 = vmul.f32 %v3554_v62, %v8398_v16  ;;  %v3780_v23 = vmul.f32 %v3776_v39, %v3554_v62  ;;  %v3788_v45 = vmul.f32 %v3784_v6, %v3554_v62 }
 0x3d8   :  { %v3640_v44 = vcombine.high %v3637_v32, %v3638_v5  ;;  %v3728_v17 = vrot.slane %v3716_v9, 6  ;;  %v3654_v43 = vrot.slane %v3652_v3, 7  ;;  %v3820_v49 = vrot.slane %v3554_v62, %v9979_v18 }
 0x3d9   :  { %v3824_v24 = vrot.slane %v3554_v62, %v8395_v38  ;;  %v3886_v41 = vrot.slane %v3772_v35, %v9979_v18  ;;  %v3890_v52 = vrot.slane %v3772_v35, %v8395_v38  ;;  %v3908_v26 = vrot.slane %v3780_v23, %v9979_v18 }
 0x3da   :  { %v3642_v48 = vrot.slane %v3640_v44, 7  ;;  %v3736_v61 = vsel %vm3350_vm7, %v3728_v17, 0.0  ;;  %v3912_v40 = vrot.slane %v3780_v23, %v8395_v38  ;;  %v3930_v12 = vrot.slane %v3788_v45, %v9979_v18 }
 0x3db   :  { %vm3740_vm12 = vcmp.lt.f32.partialorder %v3736_v61, 0.0  ;;  %v3758_v42 = vcombine.high %v3735_v57, %v3736_v61  ;;  %v3934_v54 = vrot.slane %v3788_v45, %v8395_v38 }
 0x3dc   :  { %vm3644_vm11 = vcmp.ne.s32.totalorder %v3642_v48, 0  ;;  %v3744_v63 = vsel %vm3740_vm12, 1, %v9986_v8 }
 0x3dd   :  { %vm3646_vm6 = vmand %vm3522_vm9, %vm3644_vm11  ;;  %v3746_v7 = vcombine.high %v3743_v58, %v3744_v63  ;;  %v3760_v55 = vrot.slane %v3758_v42, 6 }
 0x3de   :  { %v3658_v30 = vsel %vm3646_vm6, 0.0, %v3654_v43 }
 0x3df   :  { %vm3660_vm5 = vcmp.gt.f32.partialorder %v3658_v30, 0.0  ;;  %v3748_v22 = vrot.slane %v3746_v7, 6 }
 0x3e0   :  { %vm3662_vm7 = vmand %vm3524_vm8, %vm3660_vm5 }
 0x3e1   :  { %v3664_v37 = vsel %vm3662_vm7, 0.0, %v3658_v30  ;;  %vm3750_vm14 = vcmp.ne.s32.totalorder %v3748_v22, 0 }
 0x3e2   :  { %v3794_v8 = vmul.f32 %v3790_v10, %v3664_v37  ;;  %vm3752_vm10 = vmand %vm3522_vm9, %vm3750_vm14  ;;  %v3798_v59 = vmul.f32 %v3776_v39, %v3664_v37  ;;  %v3842_v15 = vrot.slane %v3664_v37, %v9984_v56  ;;  %v3846_v11 = vrot.slane %v3664_v37, %v8401_v20 }
 0x3e3   :  { %v3764_v13 = vsel %vm3752_vm10, 0.0, %v3760_v55  ;;  %v3796_v28 = vmul.f32 %v3664_v37, %v8398_v16 }
 0x3e4   :  { %vm3766_vm11 = vcmp.gt.f32.partialorder %v3764_v13, 0.0  ;;  %v3952_v21 = vrot.slane %v3794_v8, %v9984_v56  ;;  %v3956_v1 = vrot.slane %v3794_v8, %v8401_v20  ;;  %v3996_v31 = vrot.slane %v3798_v59, %v9984_v56 }
 0x3e5   :  { %vm3768_vm9 = vmand %vm3524_vm8, %vm3766_vm11  ;;  %v4000_v51 = vrot.slane %v3798_v59, %v8401_v20  ;;  %v4073_v19 = vsel %vm3145_vm3, %v3820_v49, %v3842_v15  ;;  %v4074_v34 = vsel %vm3145_vm3, %v3824_v24, %v3846_v11  ;;  %v3974_v53 = vrot.slane %v3796_v28, %v9984_v56 }
 0x3e6   :  { %v3770_v36 = vsel %vm3768_vm9, 0.0, %v3764_v13  ;;  %v3978_v33 = vrot.slane %v3796_v28, %v8401_v20 }
 0x3e7   :  { %v3802_v0 = vmul.f32 %v3783_v47, %v3770_v36  ;;  %v3804_v50 = vmul.f32 %v3790_v10, %v3770_v36  ;;  %v3806_v29 = vmul.f32 %v3770_v36, %v8398_v16  ;;  %v3864_v18 = vrot.slane %v3770_v36, %v9985_v46 }
 0x3e8   :  { %v3868_v38 = vrot.slane %v3770_v36, %v8404_v4 }
 0x3e9   :  { %v4018_v14 = vrot.slane %v3802_v0, %v9985_v46  ;;  %v4022_v2 = vrot.slane %v3802_v0, %v8404_v4  ;;  %v4040_v60 = vrot.slane %v3804_v50, %v9985_v46  ;;  %v4044_v27 = vrot.slane %v3804_v50, %v8404_v4 }
 0x3ea   :  { %v4062_v16 = vrot.slane %v3806_v29, %v9985_v46  ;;  %v4066_v32 = vrot.slane %v3806_v29, %v8404_v4  ;;  %v4077_v5 = vsel %vm3147_vm0, %v4073_v19, %v3864_v18  ;;  %v4078_v9 = vsel %vm3147_vm0, %v4074_v34, %v3868_v38 }
 0x3eb   :  { %v4081_v56 = vsel %vm3139_vm15, %v4077_v5, %v3886_v41  ;;  %v4082_v20 = vsel %vm3139_vm15, %v4078_v9, %v3890_v52  ;;  %v4103_v57 = vsel %vm3145_vm3, %v3996_v31, %v4018_v14  ;;  %v4104_v44 = vsel %vm3145_vm3, %v4000_v51, %v4022_v2 }
 0x3ec   :  { %v4085_v3 = vsel %vm3150_vm4, %v4081_v56, %v3908_v26  ;;  %v4086_v46 = vsel %vm3150_vm4, %v4082_v20, %v3912_v40  ;;  %v4107_v4 = vsel %vm3147_vm0, %v4103_v57, %v4040_v60  ;;  %v4108_v17 = vsel %vm3147_vm0, %v4104_v44, %v4044_v27 }
 0x3ed   :  { %v4089_v25 = vsel %vm3152_vm1, %v4085_v3, %v3930_v12  ;;  %v4090_v48 = vsel %vm3152_vm1, %v4086_v46, %v3934_v54  ;;  %v4111_v47 = vsel %vm3139_vm15, %v4107_v4, %v4062_v16  ;;  %v4112_v61 = vsel %vm3139_vm15, %v4108_v17, %v4066_v32 }
 0x3ee   :  { %v4094_v43 = vsel %vm4091_vm13, %v4089_v25, %v3952_v21  ;;  %v4095_v62 = vsel %vm4091_vm13, %v4090_v48, %v3956_v1  ;;  %4119 = vst [vmem:[#allocation3 + $0x30] sm:$0xf] %v4111_v47  ;;  %4120 = vst [vmem:[#allocation3 + $0x38] sm:$0xf] %v4112_v61 }
 0x3ef   :  { %v4099_v58 = vsel %vm4096_vm2, %v4094_v43, %v3974_v53  ;;  %v4100_v63 = vsel %vm4096_vm2, %v4095_v62, %v3978_v33 }
 0x3f0   :  { %4115 = vst [vmem:[#allocation3 + $0x10] sm:$0xff] %v4099_v58  ;;  %4116 = vst [vmem:[#allocation3 + $0x18] sm:$0xff] %v4100_v63 }
 0x3f1   :  { %4330 = shalt.err (!%p4327_p4)
}
 0x3f2   :  { %s4346_s20 = smov 512   ;;  %s4347_s21 = smov 32  }
 0x3f3   :  { %4132 = dma.vmem_to_hbm [thread:$0]  %s4127_s18, 1024, %s8763_s8, [#allocation4], %s4346_s20, %s4346_s20, %s4347_s21  }
 0x3f4   :  { %4339 = dma.done.wait [#allocation4], 1024  }
 0x3f5   :  { %4340 = vsyncadd [#allocation4], 4294966272 }
 0x3f6   :  { %4136 = vsyncpa [#allocation4], 1 }

</bundles_post_ra>
